<compile_context>
chip_gen: v7x
topology: tpu7x:2x2x1
jax: 0.10.0
libtpu: 0.0.40
codegen_flags: <defaults>
</compile_context>

<pallas_src>
import jax
import jax.numpy as jnp
from jax.experimental import pallas as pl
from jax.experimental.pallas import tpu as pltpu

BN_EPS = 1e-5


# ----------------------------- fused Pallas kernel ----------------------------- #

def make_fused_kernel(cfg, n_shift, pad, ksize):
    """Whole-network kernel.

    Activation layout: fixed (RB, V*C) f32 frame. Row r = 1 + nm*TP + lt with
    nm = n*M + m, TP = T + 2*pad; lt = pad + t holds time step t, lt = 0 / TP-1 are
    zero temporal-pad rows (kept zero via the row masks / selection matrices).
    """
    nb = len(cfg)
    offsets = [d for d in range(-pad, ksize - pad) if d != 0]
    off_idx = {d: i for i, d in enumerate(offsets)}
    assert n_shift == len(offsets)

    def kernel(*refs):
        x_ref = refs[0]
        shift_refs = refs[1:1 + n_shift]
        out_ref = refs[-1]

        h = x_ref[...]                                   # (RB, V*C0) f32, pad rows zero
        for bi, c in enumerate(cfg):
            base = 1 + n_shift + 6 * bi
            wg_ref, sg_ref, wt_ref, st_ref, mask_ref, post_ref = refs[base:base + 6]
            mask_in = mask_ref[...]                      # (RB, 1) valid-row mask

            # ---- spatial GCN: (rows, V*Cin) @ (V*Cin, V*Cout)
            #      (1x1 conv + adjacency einsum + BN scale folded into the weight)
            y = jnp.dot(h.astype(jnp.bfloat16), wg_ref[...],
                        preferred_element_type=jnp.float32)
            y = y + sg_ref[...]
            if c["gcn_res"]:
                y = y + h                                # identity residual (Cin == Cout)
            h = jnp.maximum(y, 0.0) * mask_in            # keep temporal-pad rows zero

            # ---- temporal TCN: ksize accumulating GEMMs over row-shifted activations
            #      with block-diagonal (V*C, V*C) weights (lane-dense output).
            acc = None
            for kt in range(ksize):
                d = kt - pad
                if d == 0:
                    hk = h
                else:                                    # exact row shift via 0/1 GEMM
                    hk = jnp.dot(shift_refs[off_idx[d]][...], h,
                                 preferred_element_type=jnp.float32)
                contrib = jnp.dot(hk.astype(jnp.bfloat16), wt_ref[kt],
                                  preferred_element_type=jnp.float32)
                acc = contrib if acc is None else acc + contrib
            acc = acc + st_ref[...]
            if c["stride"] == 1:
                if c["tcn_res"]:
                    acc = acc + h                        # identity residual
                h = jnp.maximum(acc, 0.0) * post_ref[...]
            else:
                # strided temporal conv: select every `stride`-th time step and compact
                # rows with a (RB, RB) 0/1 selection matrix (also zeroes all pad rows).
                h = jnp.dot(post_ref[...], jnp.maximum(acc, 0.0),
                            preferred_element_type=jnp.float32)

        out_ref[...] = h

    return kernel


# --------------------------------- forward pass --------------------------------- #

def model_forward(x, params, static):
    """x: (N, C, T, V, M) f32 -> (features (N*M, C_out, T_out, V), logits (N, num_class))."""
    N, C, T, V, M = x.shape
    cfg, RB, TP, pad = static["cfg"], static["RB"], static["TP"], static["pad"]
    NM = N * M

    # data_bn (eval-mode affine over (m, v, c) channels) -- fused by XLA into the
    # unavoidable boundary layout transform (single tiny fusion, no separate pass).
    db = params["data_bn"]
    inv = db["gamma"] / jnp.sqrt(db["rv"] + BN_EPS)
    s = inv.reshape(M, V, C)
    b = (db["beta"] - db["rm"] * inv).reshape(M, V, C)
    xb = jnp.transpose(x, (0, 4, 3, 1, 2))                       # (N, M, V, C, T)
    xb = xb * s[None, :, :, :, None] + b[None, :, :, :, None]
    hk = jnp.transpose(xb, (0, 1, 4, 2, 3)).reshape(NM, T, V * C)  # (NM, T, V*C) v-major

    # embed into the fixed zero-padded row frame used by the fused kernel
    x_emb = jnp.pad(hk, ((0, 0), (pad, pad), (0, 0))).reshape(NM * TP, V * C)
    x_emb = jnp.pad(x_emb, ((1, RB - 1 - NM * TP), (0, 0)))

    flat = [x_emb] + list(params["shift_mats"])
    for blk in params["blocks"]:
        flat += [blk["wg"], blk["sg"], blk["wt"], blk["st"], blk["mask_in"], blk["post"]]

    vc_last = cfg[-1]["vc_out"]
    vmem_spec = pl.BlockSpec(memory_space=pltpu.MemorySpace.VMEM)
    feat_frame = pl.pallas_call(
        make_fused_kernel(cfg, static["n_shift"], pad, static["ksize"]),
        out_shape=jax.ShapeDtypeStruct((RB, vc_last), jnp.float32),
        in_specs=[vmem_spec] * len(flat),
        out_specs=vmem_spec,
    )(*flat)

    # unpack features into PyTorch layout (N*M, C, T_out, V)
    t_last = cfg[-1]["t_out"]
    c_last = vc_last // V
    body = feat_frame[1:1 + NM * TP].reshape(NM, TP, V, c_last)
    features = jnp.transpose(body[:, pad:pad + t_last], (0, 3, 1, 2))

    # head (plain JAX): GAP over (T, V) -> mean over persons -> FC
    pooled = features.reshape(N, M, c_last, t_last * V).mean(axis=(1, 3))
    logits = pooled @ params["fc_w"] + params["fc_b"]
    return features, logits


# ------------------------------ deterministic init ------------------------------ #

def build_adjacency(V):
    I = jnp.eye(V, dtype=jnp.float32)
    fwd = jnp.zeros((V, V), jnp.float32).at[jnp.arange(V - 1), jnp.arange(1, V)].set(1.0)
    bwd = fwd.T

    def norm(a):
        d = a.sum(axis=0)
        return a * jnp.where(d > 0, 1.0 / jnp.maximum(d, 1e-6), 0.0)[None, :]

    return jnp.stack([I, norm(fwd), norm(bwd)], axis=0)              # (K=3, V, V)


def init_params(key, block_args, A, V, M, N, T, ksize, num_class):
    K = A.shape[0]
    C0 = block_args[0][0]
    NM = N * M
    pad = (ksize - 1) // 2
    TP = T + 2 * pad
    RB = ((NM * TP + 2) + 7) // 8 * 8                 # fixed row frame, multiple of 8
    keys = iter(jax.random.split(key, 4 * len(block_args) + 2))

    def row_mask(t_valid):
        vals = []
        for r in range(RB):
            j = r - 1
            nmi, lt = divmod(j, TP)
            ok = (0 <= j < NM * TP) and (pad <= lt < pad + t_valid)
            vals.append(1.0 if ok else 0.0)
        return jnp.asarray(vals, jnp.float32).reshape(RB, 1)

    def downsample_select(t_in, stride):
        t_out = (t_in + 2 * pad - ksize) // stride + 1
        S = [[0.0] * RB for _ in range(RB)]
        for nmi in range(NM):
            for to in range(t_out):
                S[1 + nmi * TP + pad + to][1 + nmi * TP + pad + to * stride] = 1.0
        return jnp.asarray(S, jnp.float32), t_out

    def shift_mat(d):                                  # (Sd @ h)[r] = h[r + d] (zero pad)
        Sd = [[0.0] * RB for _ in range(RB)]
        for r in range(RB):
            if 0 <= r + d < RB:
                Sd[r][r + d] = 1.0
        return jnp.asarray(Sd, jnp.float32)

    shift_offsets = [d for d in range(-pad, ksize - pad) if d != 0]
    shift_mats = [shift_mat(d) for d in shift_offsets]

    blocks, cfg = [], []
    mask_cache = {}

    def get_mask(tv):
        if tv not in mask_cache:
            mask_cache[tv] = row_mask(tv)
        return mask_cache[tv]

    t_cur = T
    for (cin, cout, res, stride) in block_args:
        # BN params per bn_init(m, 1): gamma=1, beta=0, running stats (0, 1)
        scale_o = jnp.ones((cout,), jnp.float32) / jnp.sqrt(1.0 + BN_EPS)
        shift_o = jnp.zeros((cout,), jnp.float32)

        # ---- GCN (SpatialGraphCov rewritten as one (V*Cin, V*Cout) GEMM, BN folded) ----
        wg1 = jax.random.normal(next(keys), (K, cout, cin), jnp.float32) / jnp.sqrt(cin * K)
        bg = jax.random.normal(next(keys), (K, cout), jnp.float32) * 0.01
        Wcomb = jnp.einsum("kvw,koc->vcwo", A, wg1).reshape(V * cin, V * cout)
        b_eff = jnp.einsum("ko,kw->wo", bg, A.sum(axis=1))            # (V, cout)
        Wg = (Wcomb * jnp.tile(scale_o, V)[None, :]).astype(jnp.bfloat16)
        Sg = (scale_o[None, :] * b_eff + shift_o[None, :]).reshape(1, V * cout)

        # ---- TCN ((ksize,1) conv as per-tap block-diagonal (V*C, V*C) weights) ----
        wt1 = jax.random.normal(next(keys), (cout, cout, ksize), jnp.float32) / jnp.sqrt(cout * ksize)
        bt = jax.random.normal(next(keys), (cout,), jnp.float32) * 0.01
        Wblk = jnp.transpose(wt1, (2, 1, 0)) * scale_o[None, None, :]  # (ksize, cin, cout)
        Wt = jnp.einsum("vw,kio->kviwo", jnp.eye(V, dtype=jnp.float32), Wblk)
        Wt = Wt.reshape(ksize, V * cout, V * cout).astype(jnp.bfloat16)
        St = jnp.tile(scale_o * bt + shift_o, V).reshape(1, V * cout)

        if stride == 1:
            t_out, post = t_cur, get_mask(t_cur)
        else:
            post, t_out = downsample_select(t_cur, stride)

        cfg.append(dict(vc_in=V * cin, vc_out=V * cout, t_in=t_cur, t_out=t_out,
                        stride=stride,
                        gcn_res=bool(res) and cin == cout,
                        tcn_res=bool(res) and stride == 1))
        blocks.append(dict(wg=Wg, sg=Sg, wt=Wt, st=St,
                           mask_in=get_mask(t_cur), post=post))
        t_cur = t_out

    c_last = block_args[-1][1]
    params = dict(
        data_bn=dict(gamma=jnp.ones((M * V * C0,), jnp.float32),
                     beta=jnp.zeros((M * V * C0,), jnp.float32),
                     rm=jnp.zeros((M * V * C0,), jnp.float32),
                     rv=jnp.ones((M * V * C0,), jnp.float32)),
        shift_mats=shift_mats,
        blocks=blocks,
        fc_w=jax.random.normal(next(keys), (c_last, num_class), jnp.float32)
             * jnp.sqrt(2.0 / num_class),
        fc_b=jnp.zeros((num_class,), jnp.float32),
    )
    static = dict(cfg=cfg, RB=RB, TP=TP, pad=pad, ksize=ksize, n_shift=len(shift_mats))
    return params, static


# ------------------------------------- main ------------------------------------- #

if __name__ == "__main__":
    N, C0, T, V, M = 2, 3, 16, 16, 2
    num_class = 10
    kernel_size = 3
    # block_args: (in_channels, out_channels, residual, stride)
    block_args = [(3, 8, False, 1), (8, 8, True, 1), (8, 16, False, 2), (16, 16, True, 1)]

    A = build_adjacency(V)
    params, static = init_params(jax.random.PRNGKey(0), block_args, A, V, M, N, T,
                                 kernel_size, num_class)
    x = jax.random.normal(jax.random.PRNGKey(0), (N, C0, T, V, M), jnp.float32)

    fwd = jax.jit(lambda xx, pp: model_forward(xx, pp, static))
    features, logits = fwd(x, params)
    jax.block_until_ready((features, logits))

    assert features.shape == (N * M, block_args[-1][1], T // 2, V)
    assert logits.shape == (N, num_class)
    print("KERNEL_OK")
</pallas_src>

<mosaic_0001>
module attributes {stable_mosaic.version = 11 : i64} {
  func.func @kernel(%arg0: memref<80x48xf32, #tpu.memory_space<vmem>>, %arg1: memref<80x80xf32, #tpu.memory_space<vmem>>, %arg2: memref<80x80xf32, #tpu.memory_space<vmem>>, %arg3: memref<48x128xbf16, #tpu.memory_space<vmem>>, %arg4: memref<1x128xf32, #tpu.memory_space<vmem>>, %arg5: memref<3x128x128xbf16, #tpu.memory_space<vmem>>, %arg6: memref<1x128xf32, #tpu.memory_space<vmem>>, %arg7: memref<80x1xf32, #tpu.memory_space<vmem>>, %arg8: memref<80x1xf32, #tpu.memory_space<vmem>>, %arg9: memref<128x128xbf16, #tpu.memory_space<vmem>>, %arg10: memref<1x128xf32, #tpu.memory_space<vmem>>, %arg11: memref<3x128x128xbf16, #tpu.memory_space<vmem>>, %arg12: memref<1x128xf32, #tpu.memory_space<vmem>>, %arg13: memref<80x1xf32, #tpu.memory_space<vmem>>, %arg14: memref<80x1xf32, #tpu.memory_space<vmem>>, %arg15: memref<128x256xbf16, #tpu.memory_space<vmem>>, %arg16: memref<1x256xf32, #tpu.memory_space<vmem>>, %arg17: memref<3x256x256xbf16, #tpu.memory_space<vmem>>, %arg18: memref<1x256xf32, #tpu.memory_space<vmem>>, %arg19: memref<80x1xf32, #tpu.memory_space<vmem>>, %arg20: memref<80x80xf32, #tpu.memory_space<vmem>>, %arg21: memref<256x256xbf16, #tpu.memory_space<vmem>>, %arg22: memref<1x256xf32, #tpu.memory_space<vmem>>, %arg23: memref<3x256x256xbf16, #tpu.memory_space<vmem>>, %arg24: memref<1x256xf32, #tpu.memory_space<vmem>>, %arg25: memref<80x1xf32, #tpu.memory_space<vmem>>, %arg26: memref<80x1xf32, #tpu.memory_space<vmem>>, %arg27: memref<80x256xf32, #tpu.memory_space<vmem>>) attributes {dimension_semantics = [], scalar_prefetch = 0 : i64, scratch_operands = 0 : i64, tpu.core_type = #tpu.core_type<tc>} {
    %c0 = arith.constant 0 : index
    %c0_0 = arith.constant 0 : index
    %0 = vector.load %arg0[%c0, %c0_0] : memref<80x48xf32, #tpu.memory_space<vmem>>, vector<80x48xf32>
    %c0_1 = arith.constant 0 : index
    %c0_2 = arith.constant 0 : index
    %1 = vector.load %arg7[%c0_1, %c0_2] : memref<80x1xf32, #tpu.memory_space<vmem>>, vector<80x1xf32>
    %2 = arith.truncf %0 : vector<80x48xf32> to vector<80x48xbf16>
    %c0_3 = arith.constant 0 : index
    %c0_4 = arith.constant 0 : index
    %3 = vector.load %arg3[%c0_3, %c0_4] : memref<48x128xbf16, #tpu.memory_space<vmem>>, vector<48x128xbf16>
    %cst = arith.constant dense<0.000000e+00> : vector<80x128xf32>
    %4 = tpu.matmul %2, %3, %cst {dimension_numbers = #tpu.dot_dimension_numbers<[1], [0], [0], [1], [0, 0, 1, 1], [], []>} : vector<80x48xbf16>, vector<48x128xbf16>, vector<80x128xf32> -> vector<80x128xf32>
    %c0_5 = arith.constant 0 : index
    %c0_6 = arith.constant 0 : index
    %5 = vector.load %arg4[%c0_5, %c0_6] : memref<1x128xf32, #tpu.memory_space<vmem>>, vector<1x128xf32>
    %6 = vector.broadcast %5 : vector<1x128xf32> to vector<80x128xf32>
    %7 = arith.addf %4, %6 : vector<80x128xf32>
    %cst_7 = arith.constant 0.000000e+00 : f32
    %8 = vector.broadcast %cst_7 : f32 to vector<80x128xf32>
    %9 = arith.maximumf %7, %8 : vector<80x128xf32>
    %10 = vector.broadcast %1 : vector<80x1xf32> to vector<80x128xf32>
    %11 = arith.mulf %9, %10 : vector<80x128xf32>
    %c0_8 = arith.constant 0 : index
    %c0_9 = arith.constant 0 : index
    %12 = vector.load %arg1[%c0_8, %c0_9] : memref<80x80xf32, #tpu.memory_space<vmem>>, vector<80x80xf32>
    %cst_10 = arith.constant dense<0.000000e+00> : vector<80x128xf32>
    %13 = tpu.matmul %12, %11, %cst_10 {dimension_numbers = #tpu.dot_dimension_numbers<[1], [0], [0], [1], [0, 0, 1, 1], [], []>} : vector<80x80xf32>, vector<80x128xf32>, vector<80x128xf32> -> vector<80x128xf32>
    %14 = arith.truncf %13 : vector<80x128xf32> to vector<80x128xbf16>
    %c0_11 = arith.constant 0 : index
    %c0_12 = arith.constant 0 : index
    %c0_13 = arith.constant 0 : index
    %15 = vector.load %arg5[%c0_11, %c0_12, %c0_13] : memref<3x128x128xbf16, #tpu.memory_space<vmem>>, vector<1x128x128xbf16>
    %16 = vector.shape_cast %15 : vector<1x128x128xbf16> to vector<128x128xbf16>
    %cst_14 = arith.constant dense<0.000000e+00> : vector<80x128xf32>
    %17 = tpu.matmul %14, %16, %cst_14 {dimension_numbers = #tpu.dot_dimension_numbers<[1], [0], [0], [1], [0, 0, 1, 1], [], []>} : vector<80x128xbf16>, vector<128x128xbf16>, vector<80x128xf32> -> vector<80x128xf32>
    %18 = arith.truncf %11 : vector<80x128xf32> to vector<80x128xbf16>
    %c1 = arith.constant 1 : index
    %c0_15 = arith.constant 0 : index
    %c0_16 = arith.constant 0 : index
    %19 = vector.load %arg5[%c1, %c0_15, %c0_16] : memref<3x128x128xbf16, #tpu.memory_space<vmem>>, vector<1x128x128xbf16>
    %20 = vector.shape_cast %19 : vector<1x128x128xbf16> to vector<128x128xbf16>
    %cst_17 = arith.constant dense<0.000000e+00> : vector<80x128xf32>
    %21 = tpu.matmul %18, %20, %cst_17 {dimension_numbers = #tpu.dot_dimension_numbers<[1], [0], [0], [1], [0, 0, 1, 1], [], []>} : vector<80x128xbf16>, vector<128x128xbf16>, vector<80x128xf32> -> vector<80x128xf32>
    %22 = arith.addf %17, %21 : vector<80x128xf32>
    %c0_18 = arith.constant 0 : index
    %c0_19 = arith.constant 0 : index
    %23 = vector.load %arg2[%c0_18, %c0_19] : memref<80x80xf32, #tpu.memory_space<vmem>>, vector<80x80xf32>
    %cst_20 = arith.constant dense<0.000000e+00> : vector<80x128xf32>
    %24 = tpu.matmul %23, %11, %cst_20 {dimension_numbers = #tpu.dot_dimension_numbers<[1], [0], [0], [1], [0, 0, 1, 1], [], []>} : vector<80x80xf32>, vector<80x128xf32>, vector<80x128xf32> -> vector<80x128xf32>
    %25 = arith.truncf %24 : vector<80x128xf32> to vector<80x128xbf16>
    %c2 = arith.constant 2 : index
    %c0_21 = arith.constant 0 : index
    %c0_22 = arith.constant 0 : index
    %26 = vector.load %arg5[%c2, %c0_21, %c0_22] : memref<3x128x128xbf16, #tpu.memory_space<vmem>>, vector<1x128x128xbf16>
    %27 = vector.shape_cast %26 : vector<1x128x128xbf16> to vector<128x128xbf16>
    %cst_23 = arith.constant dense<0.000000e+00> : vector<80x128xf32>
    %28 = tpu.matmul %25, %27, %cst_23 {dimension_numbers = #tpu.dot_dimension_numbers<[1], [0], [0], [1], [0, 0, 1, 1], [], []>} : vector<80x128xbf16>, vector<128x128xbf16>, vector<80x128xf32> -> vector<80x128xf32>
    %29 = arith.addf %22, %28 : vector<80x128xf32>
    %c0_24 = arith.constant 0 : index
    %c0_25 = arith.constant 0 : index
    %30 = vector.load %arg6[%c0_24, %c0_25] : memref<1x128xf32, #tpu.memory_space<vmem>>, vector<1x128xf32>
    %31 = vector.broadcast %30 : vector<1x128xf32> to vector<80x128xf32>
    %32 = arith.addf %29, %31 : vector<80x128xf32>
    %cst_26 = arith.constant 0.000000e+00 : f32
    %33 = vector.broadcast %cst_26 : f32 to vector<80x128xf32>
    %34 = arith.maximumf %32, %33 : vector<80x128xf32>
    %c0_27 = arith.constant 0 : index
    %c0_28 = arith.constant 0 : index
    %35 = vector.load %arg8[%c0_27, %c0_28] : memref<80x1xf32, #tpu.memory_space<vmem>>, vector<80x1xf32>
    %36 = vector.broadcast %35 : vector<80x1xf32> to vector<80x128xf32>
    %37 = arith.mulf %34, %36 : vector<80x128xf32>
    %c0_29 = arith.constant 0 : index
    %c0_30 = arith.constant 0 : index
    %38 = vector.load %arg13[%c0_29, %c0_30] : memref<80x1xf32, #tpu.memory_space<vmem>>, vector<80x1xf32>
    %39 = arith.truncf %37 : vector<80x128xf32> to vector<80x128xbf16>
    %c0_31 = arith.constant 0 : index
    %c0_32 = arith.constant 0 : index
    %40 = vector.load %arg9[%c0_31, %c0_32] : memref<128x128xbf16, #tpu.memory_space<vmem>>, vector<128x128xbf16>
    %cst_33 = arith.constant dense<0.000000e+00> : vector<80x128xf32>
    %41 = tpu.matmul %39, %40, %cst_33 {dimension_numbers = #tpu.dot_dimension_numbers<[1], [0], [0], [1], [0, 0, 1, 1], [], []>} : vector<80x128xbf16>, vector<128x128xbf16>, vector<80x128xf32> -> vector<80x128xf32>
    %c0_34 = arith.constant 0 : index
    %c0_35 = arith.constant 0 : index
    %42 = vector.load %arg10[%c0_34, %c0_35] : memref<1x128xf32, #tpu.memory_space<vmem>>, vector<1x128xf32>
    %43 = vector.broadcast %42 : vector<1x128xf32> to vector<80x128xf32>
    %44 = arith.addf %41, %43 : vector<80x128xf32>
    %45 = arith.addf %44, %37 : vector<80x128xf32>
    %cst_36 = arith.constant 0.000000e+00 : f32
    %46 = vector.broadcast %cst_36 : f32 to vector<80x128xf32>
    %47 = arith.maximumf %45, %46 : vector<80x128xf32>
    %48 = vector.broadcast %38 : vector<80x1xf32> to vector<80x128xf32>
    %49 = arith.mulf %47, %48 : vector<80x128xf32>
    %c0_37 = arith.constant 0 : index
    %c0_38 = arith.constant 0 : index
    %50 = vector.load %arg1[%c0_37, %c0_38] : memref<80x80xf32, #tpu.memory_space<vmem>>, vector<80x80xf32>
    %cst_39 = arith.constant dense<0.000000e+00> : vector<80x128xf32>
    %51 = tpu.matmul %50, %49, %cst_39 {dimension_numbers = #tpu.dot_dimension_numbers<[1], [0], [0], [1], [0, 0, 1, 1], [], []>} : vector<80x80xf32>, vector<80x128xf32>, vector<80x128xf32> -> vector<80x128xf32>
    %52 = arith.truncf %51 : vector<80x128xf32> to vector<80x128xbf16>
    %c0_40 = arith.constant 0 : index
    %c0_41 = arith.constant 0 : index
    %c0_42 = arith.constant 0 : index
    %53 = vector.load %arg11[%c0_40, %c0_41, %c0_42] : memref<3x128x128xbf16, #tpu.memory_space<vmem>>, vector<1x128x128xbf16>
    %54 = vector.shape_cast %53 : vector<1x128x128xbf16> to vector<128x128xbf16>
    %cst_43 = arith.constant dense<0.000000e+00> : vector<80x128xf32>
    %55 = tpu.matmul %52, %54, %cst_43 {dimension_numbers = #tpu.dot_dimension_numbers<[1], [0], [0], [1], [0, 0, 1, 1], [], []>} : vector<80x128xbf16>, vector<128x128xbf16>, vector<80x128xf32> -> vector<80x128xf32>
    %56 = arith.truncf %49 : vector<80x128xf32> to vector<80x128xbf16>
    %c1_44 = arith.constant 1 : index
    %c0_45 = arith.constant 0 : index
    %c0_46 = arith.constant 0 : index
    %57 = vector.load %arg11[%c1_44, %c0_45, %c0_46] : memref<3x128x128xbf16, #tpu.memory_space<vmem>>, vector<1x128x128xbf16>
    %58 = vector.shape_cast %57 : vector<1x128x128xbf16> to vector<128x128xbf16>
    %cst_47 = arith.constant dense<0.000000e+00> : vector<80x128xf32>
    %59 = tpu.matmul %56, %58, %cst_47 {dimension_numbers = #tpu.dot_dimension_numbers<[1], [0], [0], [1], [0, 0, 1, 1], [], []>} : vector<80x128xbf16>, vector<128x128xbf16>, vector<80x128xf32> -> vector<80x128xf32>
    %60 = arith.addf %55, %59 : vector<80x128xf32>
    %c0_48 = arith.constant 0 : index
    %c0_49 = arith.constant 0 : index
    %61 = vector.load %arg2[%c0_48, %c0_49] : memref<80x80xf32, #tpu.memory_space<vmem>>, vector<80x80xf32>
    %cst_50 = arith.constant dense<0.000000e+00> : vector<80x128xf32>
    %62 = tpu.matmul %61, %49, %cst_50 {dimension_numbers = #tpu.dot_dimension_numbers<[1], [0], [0], [1], [0, 0, 1, 1], [], []>} : vector<80x80xf32>, vector<80x128xf32>, vector<80x128xf32> -> vector<80x128xf32>
    %63 = arith.truncf %62 : vector<80x128xf32> to vector<80x128xbf16>
    %c2_51 = arith.constant 2 : index
    %c0_52 = arith.constant 0 : index
    %c0_53 = arith.constant 0 : index
    %64 = vector.load %arg11[%c2_51, %c0_52, %c0_53] : memref<3x128x128xbf16, #tpu.memory_space<vmem>>, vector<1x128x128xbf16>
    %65 = vector.shape_cast %64 : vector<1x128x128xbf16> to vector<128x128xbf16>
    %cst_54 = arith.constant dense<0.000000e+00> : vector<80x128xf32>
    %66 = tpu.matmul %63, %65, %cst_54 {dimension_numbers = #tpu.dot_dimension_numbers<[1], [0], [0], [1], [0, 0, 1, 1], [], []>} : vector<80x128xbf16>, vector<128x128xbf16>, vector<80x128xf32> -> vector<80x128xf32>
    %67 = arith.addf %60, %66 : vector<80x128xf32>
    %c0_55 = arith.constant 0 : index
    %c0_56 = arith.constant 0 : index
    %68 = vector.load %arg12[%c0_55, %c0_56] : memref<1x128xf32, #tpu.memory_space<vmem>>, vector<1x128xf32>
    %69 = vector.broadcast %68 : vector<1x128xf32> to vector<80x128xf32>
    %70 = arith.addf %67, %69 : vector<80x128xf32>
    %71 = arith.addf %70, %49 : vector<80x128xf32>
    %cst_57 = arith.constant 0.000000e+00 : f32
    %72 = vector.broadcast %cst_57 : f32 to vector<80x128xf32>
    %73 = arith.maximumf %71, %72 : vector<80x128xf32>
    %c0_58 = arith.constant 0 : index
    %c0_59 = arith.constant 0 : index
    %74 = vector.load %arg14[%c0_58, %c0_59] : memref<80x1xf32, #tpu.memory_space<vmem>>, vector<80x1xf32>
    %75 = vector.broadcast %74 : vector<80x1xf32> to vector<80x128xf32>
    %76 = arith.mulf %73, %75 : vector<80x128xf32>
    %c0_60 = arith.constant 0 : index
    %c0_61 = arith.constant 0 : index
    %77 = vector.load %arg19[%c0_60, %c0_61] : memref<80x1xf32, #tpu.memory_space<vmem>>, vector<80x1xf32>
    %78 = arith.truncf %76 : vector<80x128xf32> to vector<80x128xbf16>
    %c0_62 = arith.constant 0 : index
    %c0_63 = arith.constant 0 : index
    %79 = vector.load %arg15[%c0_62, %c0_63] : memref<128x256xbf16, #tpu.memory_space<vmem>>, vector<128x256xbf16>
    %cst_64 = arith.constant dense<0.000000e+00> : vector<80x256xf32>
    %80 = tpu.matmul %78, %79, %cst_64 {dimension_numbers = #tpu.dot_dimension_numbers<[1], [0], [0], [1], [0, 0, 1, 1], [], []>} : vector<80x128xbf16>, vector<128x256xbf16>, vector<80x256xf32> -> vector<80x256xf32>
    %c0_65 = arith.constant 0 : index
    %c0_66 = arith.constant 0 : index
    %81 = vector.load %arg16[%c0_65, %c0_66] : memref<1x256xf32, #tpu.memory_space<vmem>>, vector<1x256xf32>
    %82 = vector.broadcast %81 : vector<1x256xf32> to vector<80x256xf32>
    %83 = arith.addf %80, %82 : vector<80x256xf32>
    %cst_67 = arith.constant 0.000000e+00 : f32
    %84 = vector.broadcast %cst_67 : f32 to vector<80x256xf32>
    %85 = arith.maximumf %83, %84 : vector<80x256xf32>
    %86 = vector.broadcast %77 : vector<80x1xf32> to vector<80x256xf32>
    %87 = arith.mulf %85, %86 : vector<80x256xf32>
    %c0_68 = arith.constant 0 : index
    %c0_69 = arith.constant 0 : index
    %88 = vector.load %arg1[%c0_68, %c0_69] : memref<80x80xf32, #tpu.memory_space<vmem>>, vector<80x80xf32>
    %cst_70 = arith.constant dense<0.000000e+00> : vector<80x256xf32>
    %89 = tpu.matmul %88, %87, %cst_70 {dimension_numbers = #tpu.dot_dimension_numbers<[1], [0], [0], [1], [0, 0, 1, 1], [], []>} : vector<80x80xf32>, vector<80x256xf32>, vector<80x256xf32> -> vector<80x256xf32>
    %90 = arith.truncf %89 : vector<80x256xf32> to vector<80x256xbf16>
    %c0_71 = arith.constant 0 : index
    %c0_72 = arith.constant 0 : index
    %c0_73 = arith.constant 0 : index
    %91 = vector.load %arg17[%c0_71, %c0_72, %c0_73] : memref<3x256x256xbf16, #tpu.memory_space<vmem>>, vector<1x256x256xbf16>
    %92 = vector.shape_cast %91 : vector<1x256x256xbf16> to vector<256x256xbf16>
    %cst_74 = arith.constant dense<0.000000e+00> : vector<80x256xf32>
    %93 = tpu.matmul %90, %92, %cst_74 {dimension_numbers = #tpu.dot_dimension_numbers<[1], [0], [0], [1], [0, 0, 1, 1], [], []>} : vector<80x256xbf16>, vector<256x256xbf16>, vector<80x256xf32> -> vector<80x256xf32>
    %94 = arith.truncf %87 : vector<80x256xf32> to vector<80x256xbf16>
    %c1_75 = arith.constant 1 : index
    %c0_76 = arith.constant 0 : index
    %c0_77 = arith.constant 0 : index
    %95 = vector.load %arg17[%c1_75, %c0_76, %c0_77] : memref<3x256x256xbf16, #tpu.memory_space<vmem>>, vector<1x256x256xbf16>
    %96 = vector.shape_cast %95 : vector<1x256x256xbf16> to vector<256x256xbf16>
    %cst_78 = arith.constant dense<0.000000e+00> : vector<80x256xf32>
    %97 = tpu.matmul %94, %96, %cst_78 {dimension_numbers = #tpu.dot_dimension_numbers<[1], [0], [0], [1], [0, 0, 1, 1], [], []>} : vector<80x256xbf16>, vector<256x256xbf16>, vector<80x256xf32> -> vector<80x256xf32>
    %98 = arith.addf %93, %97 : vector<80x256xf32>
    %c0_79 = arith.constant 0 : index
    %c0_80 = arith.constant 0 : index
    %99 = vector.load %arg2[%c0_79, %c0_80] : memref<80x80xf32, #tpu.memory_space<vmem>>, vector<80x80xf32>
    %cst_81 = arith.constant dense<0.000000e+00> : vector<80x256xf32>
    %100 = tpu.matmul %99, %87, %cst_81 {dimension_numbers = #tpu.dot_dimension_numbers<[1], [0], [0], [1], [0, 0, 1, 1], [], []>} : vector<80x80xf32>, vector<80x256xf32>, vector<80x256xf32> -> vector<80x256xf32>
    %101 = arith.truncf %100 : vector<80x256xf32> to vector<80x256xbf16>
    %c2_82 = arith.constant 2 : index
    %c0_83 = arith.constant 0 : index
    %c0_84 = arith.constant 0 : index
    %102 = vector.load %arg17[%c2_82, %c0_83, %c0_84] : memref<3x256x256xbf16, #tpu.memory_space<vmem>>, vector<1x256x256xbf16>
    %103 = vector.shape_cast %102 : vector<1x256x256xbf16> to vector<256x256xbf16>
    %cst_85 = arith.constant dense<0.000000e+00> : vector<80x256xf32>
    %104 = tpu.matmul %101, %103, %cst_85 {dimension_numbers = #tpu.dot_dimension_numbers<[1], [0], [0], [1], [0, 0, 1, 1], [], []>} : vector<80x256xbf16>, vector<256x256xbf16>, vector<80x256xf32> -> vector<80x256xf32>
    %105 = arith.addf %98, %104 : vector<80x256xf32>
    %c0_86 = arith.constant 0 : index
    %c0_87 = arith.constant 0 : index
    %106 = vector.load %arg18[%c0_86, %c0_87] : memref<1x256xf32, #tpu.memory_space<vmem>>, vector<1x256xf32>
    %107 = vector.broadcast %106 : vector<1x256xf32> to vector<80x256xf32>
    %108 = arith.addf %105, %107 : vector<80x256xf32>
    %c0_88 = arith.constant 0 : index
    %c0_89 = arith.constant 0 : index
    %109 = vector.load %arg20[%c0_88, %c0_89] : memref<80x80xf32, #tpu.memory_space<vmem>>, vector<80x80xf32>
    %cst_90 = arith.constant 0.000000e+00 : f32
    %110 = vector.broadcast %cst_90 : f32 to vector<80x256xf32>
    %111 = arith.maximumf %108, %110 : vector<80x256xf32>
    %cst_91 = arith.constant dense<0.000000e+00> : vector<80x256xf32>
    %112 = tpu.matmul %109, %111, %cst_91 {dimension_numbers = #tpu.dot_dimension_numbers<[1], [0], [0], [1], [0, 0, 1, 1], [], []>} : vector<80x80xf32>, vector<80x256xf32>, vector<80x256xf32> -> vector<80x256xf32>
    %c0_92 = arith.constant 0 : index
    %c0_93 = arith.constant 0 : index
    %113 = vector.load %arg25[%c0_92, %c0_93] : memref<80x1xf32, #tpu.memory_space<vmem>>, vector<80x1xf32>
    %114 = arith.truncf %112 : vector<80x256xf32> to vector<80x256xbf16>
    %c0_94 = arith.constant 0 : index
    %c0_95 = arith.constant 0 : index
    %115 = vector.load %arg21[%c0_94, %c0_95] : memref<256x256xbf16, #tpu.memory_space<vmem>>, vector<256x256xbf16>
    %cst_96 = arith.constant dense<0.000000e+00> : vector<80x256xf32>
    %116 = tpu.matmul %114, %115, %cst_96 {dimension_numbers = #tpu.dot_dimension_numbers<[1], [0], [0], [1], [0, 0, 1, 1], [], []>} : vector<80x256xbf16>, vector<256x256xbf16>, vector<80x256xf32> -> vector<80x256xf32>
    %c0_97 = arith.constant 0 : index
    %c0_98 = arith.constant 0 : index
    %117 = vector.load %arg22[%c0_97, %c0_98] : memref<1x256xf32, #tpu.memory_space<vmem>>, vector<1x256xf32>
    %118 = vector.broadcast %117 : vector<1x256xf32> to vector<80x256xf32>
    %119 = arith.addf %116, %118 : vector<80x256xf32>
    %120 = arith.addf %119, %112 : vector<80x256xf32>
    %cst_99 = arith.constant 0.000000e+00 : f32
    %121 = vector.broadcast %cst_99 : f32 to vector<80x256xf32>
    %122 = arith.maximumf %120, %121 : vector<80x256xf32>
    %123 = vector.broadcast %113 : vector<80x1xf32> to vector<80x256xf32>
    %124 = arith.mulf %122, %123 : vector<80x256xf32>
    %c0_100 = arith.constant 0 : index
    %c0_101 = arith.constant 0 : index
    %125 = vector.load %arg1[%c0_100, %c0_101] : memref<80x80xf32, #tpu.memory_space<vmem>>, vector<80x80xf32>
    %cst_102 = arith.constant dense<0.000000e+00> : vector<80x256xf32>
    %126 = tpu.matmul %125, %124, %cst_102 {dimension_numbers = #tpu.dot_dimension_numbers<[1], [0], [0], [1], [0, 0, 1, 1], [], []>} : vector<80x80xf32>, vector<80x256xf32>, vector<80x256xf32> -> vector<80x256xf32>
    %127 = arith.truncf %126 : vector<80x256xf32> to vector<80x256xbf16>
    %c0_103 = arith.constant 0 : index
    %c0_104 = arith.constant 0 : index
    %c0_105 = arith.constant 0 : index
    %128 = vector.load %arg23[%c0_103, %c0_104, %c0_105] : memref<3x256x256xbf16, #tpu.memory_space<vmem>>, vector<1x256x256xbf16>
    %129 = vector.shape_cast %128 : vector<1x256x256xbf16> to vector<256x256xbf16>
    %cst_106 = arith.constant dense<0.000000e+00> : vector<80x256xf32>
    %130 = tpu.matmul %127, %129, %cst_106 {dimension_numbers = #tpu.dot_dimension_numbers<[1], [0], [0], [1], [0, 0, 1, 1], [], []>} : vector<80x256xbf16>, vector<256x256xbf16>, vector<80x256xf32> -> vector<80x256xf32>
    %131 = arith.truncf %124 : vector<80x256xf32> to vector<80x256xbf16>
    %c1_107 = arith.constant 1 : index
    %c0_108 = arith.constant 0 : index
    %c0_109 = arith.constant 0 : index
    %132 = vector.load %arg23[%c1_107, %c0_108, %c0_109] : memref<3x256x256xbf16, #tpu.memory_space<vmem>>, vector<1x256x256xbf16>
    %133 = vector.shape_cast %132 : vector<1x256x256xbf16> to vector<256x256xbf16>
    %cst_110 = arith.constant dense<0.000000e+00> : vector<80x256xf32>
    %134 = tpu.matmul %131, %133, %cst_110 {dimension_numbers = #tpu.dot_dimension_numbers<[1], [0], [0], [1], [0, 0, 1, 1], [], []>} : vector<80x256xbf16>, vector<256x256xbf16>, vector<80x256xf32> -> vector<80x256xf32>
    %135 = arith.addf %130, %134 : vector<80x256xf32>
    %c0_111 = arith.constant 0 : index
    %c0_112 = arith.constant 0 : index
    %136 = vector.load %arg2[%c0_111, %c0_112] : memref<80x80xf32, #tpu.memory_space<vmem>>, vector<80x80xf32>
    %cst_113 = arith.constant dense<0.000000e+00> : vector<80x256xf32>
    %137 = tpu.matmul %136, %124, %cst_113 {dimension_numbers = #tpu.dot_dimension_numbers<[1], [0], [0], [1], [0, 0, 1, 1], [], []>} : vector<80x80xf32>, vector<80x256xf32>, vector<80x256xf32> -> vector<80x256xf32>
    %138 = arith.truncf %137 : vector<80x256xf32> to vector<80x256xbf16>
    %c2_114 = arith.constant 2 : index
    %c0_115 = arith.constant 0 : index
    %c0_116 = arith.constant 0 : index
    %139 = vector.load %arg23[%c2_114, %c0_115, %c0_116] : memref<3x256x256xbf16, #tpu.memory_space<vmem>>, vector<1x256x256xbf16>
    %140 = vector.shape_cast %139 : vector<1x256x256xbf16> to vector<256x256xbf16>
    %cst_117 = arith.constant dense<0.000000e+00> : vector<80x256xf32>
    %141 = tpu.matmul %138, %140, %cst_117 {dimension_numbers = #tpu.dot_dimension_numbers<[1], [0], [0], [1], [0, 0, 1, 1], [], []>} : vector<80x256xbf16>, vector<256x256xbf16>, vector<80x256xf32> -> vector<80x256xf32>
    %142 = arith.addf %135, %141 : vector<80x256xf32>
    %c0_118 = arith.constant 0 : index
    %c0_119 = arith.constant 0 : index
    %143 = vector.load %arg24[%c0_118, %c0_119] : memref<1x256xf32, #tpu.memory_space<vmem>>, vector<1x256xf32>
    %144 = vector.broadcast %143 : vector<1x256xf32> to vector<80x256xf32>
    %145 = arith.addf %142, %144 : vector<80x256xf32>
    %146 = arith.addf %145, %124 : vector<80x256xf32>
    %cst_120 = arith.constant 0.000000e+00 : f32
    %147 = vector.broadcast %cst_120 : f32 to vector<80x256xf32>
    %148 = arith.maximumf %146, %147 : vector<80x256xf32>
    %c0_121 = arith.constant 0 : index
    %c0_122 = arith.constant 0 : index
    %149 = vector.load %arg26[%c0_121, %c0_122] : memref<80x1xf32, #tpu.memory_space<vmem>>, vector<80x1xf32>
    %150 = vector.broadcast %149 : vector<80x1xf32> to vector<80x256xf32>
    %151 = arith.mulf %148, %150 : vector<80x256xf32>
    %c0_123 = arith.constant 0 : index
    %c0_124 = arith.constant 0 : index
    %152 = vector.load %arg27[%c0_123, %c0_124] : memref<80x256xf32, #tpu.memory_space<vmem>>, vector<80x256xf32>
    tpu.vector_store %arg27[%c0_123, %c0_124], %151 {strides = array<i32>} : memref<80x256xf32, #tpu.memory_space<vmem>>, vector<80x256xf32>,
    return
  }
}

</mosaic_0001>

<bundles_post_ra>
// kernel: _lambda_.1
= control target key start
LH: loop header
LB: loop body
LE: loop exit
PB: predicated region body
PF: predicated region fallthrough
CT: control target
= control target key end

     0   :  { %s10440_s0 = inlined_call_operand.vmem [shape: f32[80,48], index: 0, kind: input, shape index: {}]   ;;  %s10441_s1 = inlined_call_operand.vmem [shape: f32[80,80], index: 1, kind: input, shape index: {}]   ;;  %s10442_s2 = inlined_call_operand.hbm [shape: f32[80,80], index: 2, kind: input, shape index: {}]   ;;  %s10443_s3 = inlined_call_operand.vmem [shape: bf16[48,128], index: 3, kind: input, shape index: {}]   ;;  %s10444_s4 = inlined_call_operand.hbm [shape: f32[1,128], index: 4, kind: input, shape index: {}]   ;;  %s10445_s5 = inlined_call_operand.vmem [shape: bf16[3,128,128], index: 5, kind: input, shape index: {}]   ;;  %s10446_s6 = inlined_call_operand.hbm [shape: f32[1,128], index: 6, kind: input, shape index: {}]   ;;  %s10447_s7 = inlined_call_operand.vmem [shape: f32[80,1], index: 7, kind: input, shape index: {}]   ;;  %s10448_s8 = inlined_call_operand.vmem [shape: f32[80,1], index: 8, kind: input, shape index: {}]   ;;  %s10449_s9 = inlined_call_operand.hbm [shape: bf16[128,128], index: 9, kind: input, shape index: {}]   ;;  %s10450_s10 = inlined_call_operand.hbm [shape: f32[1,128], index: 10, kind: input, shape index: {}]   ;;  %s10451_s11 = inlined_call_operand.vmem [shape: bf16[3,128,128], index: 11, kind: input, shape index: {}]   ;;  %s10452_s12 = inlined_call_operand.hbm [shape: f32[1,128], index: 12, kind: input, shape index: {}]   ;;  %s10453_s13 = inlined_call_operand.vmem [shape: f32[80,1], index: 13, kind: input, shape index: {}]   ;;  %s10454_s14 = inlined_call_operand.vmem [shape: f32[80,1], index: 14, kind: input, shape index: {}]   ;;  %s10455_s15 = inlined_call_operand.hbm [shape: bf16[128,256], index: 15, kind: input, shape index: {}]   ;;  %s10456_s16 = inlined_call_operand.hbm [shape: f32[1,256], index: 16, kind: input, shape index: {}]   ;;  %s10457_s17 = inlined_call_operand.vmem [shape: bf16[3,256,256], index: 17, kind: input, shape index: {}]   ;;  %s10458_s18 = inlined_call_operand.hbm [shape: f32[1,256], index: 18, kind: input, shape index: {}]   ;;  %s10459_s19 = inlined_call_operand.vmem [shape: f32[80,1], index: 19, kind: input, shape index: {}]   ;;  %s10460_s20 = inlined_call_operand.hbm [shape: f32[80,80], index: 20, kind: input, shape index: {}]   ;;  %s10461_s21 = inlined_call_operand.vmem [shape: bf16[256,256], index: 21, kind: input, shape index: {}]   ;;  %s10462_s22 = inlined_call_operand.hbm [shape: f32[1,256], index: 22, kind: input, shape index: {}]   ;;  %s10463_s23 = inlined_call_operand.vmem [shape: bf16[3,256,256], index: 23, kind: input, shape index: {}]   ;;  %s10464_s24 = inlined_call_operand.hbm [shape: f32[1,256], index: 24, kind: input, shape index: {}]   ;;  %s10465_s25 = inlined_call_operand.vmem [shape: f32[80,1], index: 25, kind: input, shape index: {}]   ;;  %s10466_s26 = inlined_call_operand.vmem [shape: f32[80,1], index: 26, kind: input, shape index: {}]   ;;  %s10467_s27 = inlined_call_operand.vmem [shape: f32[80,256], index: 27, kind: output, shape index: {}]  }
   0x1   :  { %10482 = sst [smem:[#allocation28_spill]] %s10440_s0 }
   0x2   :  { %10483 = sst [smem:[#allocation29_spill]] %s10441_s1 }
   0x3   :  { %10484 = sst [smem:[#allocation30_spill]] %s10442_s2 }
   0x4   :  { %10485 = sst [smem:[#allocation31_spill]] %s10443_s3 }
   0x5   :  { %10486 = sst [smem:[#allocation32_spill]] %s10444_s4 }
   0x6   :  { %10487 = sst [smem:[#allocation33_spill]] %s10445_s5 }
   0x7   :  { %10488 = sst [smem:[#allocation34_spill]] %s10446_s6 }
   0x8   :  { %10489 = sst [smem:[#allocation35_spill]] %s10447_s7 }
   0x9   :  { %10490 = sst [smem:[#allocation36_spill]] %s10448_s8 }
   0xa   :  { %10491 = sst [smem:[#allocation37_spill]] %s10449_s9 }
   0xb   :  { %10492 = sst [smem:[#allocation38_spill]] %s10450_s10 }
   0xc   :  { %10493 = sst [smem:[#allocation39_spill]] %s10451_s11 }
   0xd   :  { %10494 = sst [smem:[#allocation40_spill]] %s10463_s23 }
   0xe   :  { %10495 = sst [smem:[#allocation41_spill]] %s10467_s27 }
   0xf   :  { %32 = vsyncpa [#allocation3], 0 }
  0x10   :  { %33 = vsyncpa [#allocation5], 0 }
  0x11   :  { %34 = vsyncpa [#allocation8], 0 }
  0x12   :  { %35 = vsyncpa [#allocation11], 0 }
  0x13   :  { %36 = vsyncpa [#allocation14], 0 }
  0x14   :  { %37 = vsyncpa [#allocation17], 0 }
  0x15   :  { %38 = vsyncpa [#allocation20], 0  ;;  %s7887_s7 = smov [#allocation4]   ;;  %s7888_s8 = smov [#allocation7]  }
  0x16   :  { %s63_s4 = sshll.u32 %s7887_s7, 4  ;;  %s88_s30 = sshll.u32 %s7888_s8, 4  ;;  %s64_s4 = int_to_ptr.vmem [resolvable:$true] %s63_s4  ;;  %s8046_s30 = int_to_ptr.vmem [resolvable:$true] %s88_s30 }
  0x17   :  { %s10496_s28 = sld [smem:[#allocation32_spill]] }
  0x1d   :  { %s7609_s0 = scalar_lea.hbm %s10496_s28, 16 }
  0x1e   :  { %p7610_p0 = scmp.ne.s32.totalorder %s10496_s28, %s7609_s0  ;;  %p7613_p1 = scmp.lt.u32.totalorder %s7609_s0, %s10496_s28 }
  0x20   :  { %p7615_p2 = pnand %p7613_p1, %p7610_p0 }
  0x22   :  { %7618 = shalt.err (!%p7615_p2)
}
  0x23   :  { %s7619_s11 = scalar_lea.vmem %s64_s4, 16  ;;  %s7623_s2 = scalar_lea.vmem %s64_s4, 32 }
  0x24   :  { %p7620_p3 = scmp.ne.s32.totalorder %s64_s4, %s7619_s11  ;;  %p7624_p4 = scmp.lt.s32.totalorder %s64_s4, %s64_s4 }
  0x25   :  { %p7625_p5 = scmp.lt.s32.totalorder %s7623_s2, %s7619_s11 }
  0x27   :  { %p7626_p6 = por %p7625_p5, %p7624_p4 }
  0x29   :  { %p7627_p7 = pnand %p7626_p6, %p7620_p3 }
  0x2b   :  { %7630 = shalt.err (!%p7627_p7)
}
  0x2c   :  { %66 = dma.hbm_to_vmem [thread:$0]  %s10496_s28, 16, %s64_s4, [#allocation5]  }
  0x2d   :  { %s10497_s5 = sld [smem:[#allocation37_spill]] }
  0x33   :  { %s7631_s10 = scalar_lea.hbm %s10497_s5, 1024 }
  0x34   :  { %p7632_p8 = scmp.ne.s32.totalorder %s10497_s5, %s7631_s10  ;;  %p7635_p9 = scmp.lt.u32.totalorder %s7631_s10, %s10497_s5 }
  0x36   :  { %p7637_p10 = pnand %p7635_p9, %p7632_p8 }
  0x38   :  { %7640 = shalt.err (!%p7637_p10)
}
  0x39   :  { %s7641_s11 = scalar_lea.vmem %s8046_s30, 1024  ;;  %p7646_p12 = scmp.lt.s32.totalorder %s8046_s30, %s8046_s30 }
  0x3a   :  { %p7642_p11 = scmp.ne.s32.totalorder %s8046_s30, %s7641_s11  ;;  %p7647_p13 = scmp.lt.s32.totalorder %s7641_s11, %s7641_s11 }
  0x3c   :  { %p7648_p0 = por %p7647_p13, %p7646_p12 }
  0x3e   :  { %p7649_p1 = pnand %p7648_p0, %p7642_p11 }
  0x40   :  { %7652 = shalt.err (!%p7649_p1)
}
  0x41   :  { %s7889_s4 = smov 64   ;;  %s7890_s28 = smov 4  }
  0x42   :  { %94 = dma.hbm_to_vmem [thread:$0]  %s10497_s5, 1024, %s8046_s30, [#allocation8], %s7889_s4, %s7889_s4, %s7890_s28  }
  0x43   :  { %s7891_s7 = smov [#allocation10]   ;;  %s7892_s9 = smov [#allocation13]  }
  0x44   :  { %s113_s8 = sshll.u32 %s7891_s7, 4  ;;  %s139_s10 = sshll.u32 %s7892_s9, 4  ;;  %s114_s8 = int_to_ptr.vmem [resolvable:$true] %s113_s8  ;;  %s140_s10 = int_to_ptr.vmem [resolvable:$true] %s139_s10 }
  0x45   :  { %s7653_s1 = scalar_lea.hbm %s10452_s12, 16 }
  0x46   :  { %p7654_p2 = scmp.ne.s32.totalorder %s10452_s12, %s7653_s1  ;;  %p7657_p3 = scmp.lt.u32.totalorder %s7653_s1, %s10452_s12 }
  0x48   :  { %p7659_p4 = pnand %p7657_p3, %p7654_p2 }
  0x4a   :  { %7662 = shalt.err (!%p7659_p4)
}
  0x4b   :  { %s7663_s30 = scalar_lea.vmem %s114_s8, 16  ;;  %s7667_s5 = scalar_lea.vmem %s114_s8, 32 }
  0x4c   :  { %p7664_p5 = scmp.ne.s32.totalorder %s114_s8, %s7663_s30  ;;  %p7668_p6 = scmp.lt.s32.totalorder %s114_s8, %s114_s8 }
  0x4d   :  { %p7669_p7 = scmp.lt.s32.totalorder %s7667_s5, %s7663_s30 }
  0x4f   :  { %p7670_p8 = por %p7669_p7, %p7668_p6 }
  0x51   :  { %p7671_p9 = pnand %p7670_p8, %p7664_p5 }
  0x53   :  { %7674 = shalt.err (!%p7671_p9)
}
  0x54   :  { %116 = dma.hbm_to_vmem [thread:$0]  %s10452_s12, 16, %s114_s8, [#allocation11]  }
  0x55   :  { %s7675_s7 = scalar_lea.hbm %s10456_s16, 32 }
  0x56   :  { %p7676_p10 = scmp.ne.s32.totalorder %s10456_s16, %s7675_s7  ;;  %p7679_p11 = scmp.lt.u32.totalorder %s7675_s7, %s10456_s16 }
  0x58   :  { %p7681_p12 = pnand %p7679_p11, %p7676_p10 }
  0x5a   :  { %7684 = shalt.err (!%p7681_p12)
}
  0x5b   :  { %s7685_s0 = scalar_lea.vmem %s140_s10, 32  ;;  %p7690_p0 = scmp.lt.s32.totalorder %s140_s10, %s140_s10 }
  0x5c   :  { %p7686_p13 = scmp.ne.s32.totalorder %s140_s10, %s7685_s0  ;;  %p7691_p1 = scmp.lt.s32.totalorder %s7685_s0, %s7685_s0 }
  0x5e   :  { %p7692_p2 = por %p7691_p1, %p7690_p0 }
  0x60   :  { %p7693_p3 = pnand %p7692_p2, %p7686_p13 }
  0x62   :  { %7696 = shalt.err (!%p7693_p3)
}
  0x63   :  { %142 = dma.hbm_to_vmem [thread:$0]  %s10456_s16, 32, %s140_s10, [#allocation14]  }
  0x64   :  { %s7893_s1 = smov [#allocation16]   ;;  %s7894_s11 = smov [#allocation2]  }
  0x65   :  { %s162_s6 = sshll.u32 %s7893_s1, 4  ;;  %s48_s30 = sshll.u32 %s7894_s11, 4  ;;  %s163_s6 = int_to_ptr.vmem [resolvable:$true] %s162_s6  ;;  %s8101_s30 = int_to_ptr.vmem [resolvable:$true] %s48_s30 }
  0x66   :  { %s7697_s28 = scalar_lea.hbm %s10460_s20, 1280 }
  0x67   :  { %p7698_p4 = scmp.ne.s32.totalorder %s10460_s20, %s7697_s28  ;;  %p7701_p5 = scmp.lt.u32.totalorder %s7697_s28, %s10460_s20 }
  0x69   :  { %p7703_p6 = pnand %p7701_p5, %p7698_p4 }
  0x6b   :  { %7706 = shalt.err (!%p7703_p6)
}
  0x6c   :  { %s7707_s16 = scalar_lea.vmem %s163_s6, 1280  ;;  %p7712_p8 = scmp.lt.s32.totalorder %s163_s6, %s163_s6 }
  0x6d   :  { %p7708_p7 = scmp.ne.s32.totalorder %s163_s6, %s7707_s16  ;;  %p7713_p9 = scmp.lt.s32.totalorder %s7707_s16, %s7707_s16 }
  0x6f   :  { %p7714_p10 = por %p7713_p9, %p7712_p8 }
  0x71   :  { %p7715_p11 = pnand %p7714_p10, %p7708_p7 }
  0x73   :  { %7718 = shalt.err (!%p7715_p11)
}
  0x74   :  { %s7895_s10 = smov 128   ;;  %s7896_s27 = smov 8  }
  0x75   :  { %168 = dma.hbm_to_vmem [thread:$0]  %s10460_s20, 1280, %s163_s6, [#allocation17], %s7895_s10, %s7895_s10, %s7896_s27  }
  0x76   :  { %s10498_s8 = sld [smem:[#allocation30_spill]] }
  0x7c   :  { %s7719_s1 = scalar_lea.hbm %s10498_s8, 1280 }
  0x7d   :  { %p7720_p12 = scmp.ne.s32.totalorder %s10498_s8, %s7719_s1  ;;  %p7723_p13 = scmp.lt.u32.totalorder %s7719_s1, %s10498_s8 }
  0x7f   :  { %p7725_p0 = pnand %p7723_p13, %p7720_p12 }
  0x81   :  { %7728 = shalt.err (!%p7725_p0)
}
  0x82   :  { %s7729_s2 = scalar_lea.vmem %s8101_s30, 1280  ;;  %p7734_p2 = scmp.lt.s32.totalorder %s8101_s30, %s8101_s30 }
  0x83   :  { %p7730_p1 = scmp.ne.s32.totalorder %s8101_s30, %s7729_s2  ;;  %p7735_p3 = scmp.lt.s32.totalorder %s7729_s2, %s7729_s2 }
  0x85   :  { %p7736_p4 = por %p7735_p3, %p7734_p2 }
  0x87   :  { %p7737_p5 = pnand %p7736_p4, %p7730_p1 }
  0x89   :  { %7740 = shalt.err (!%p7737_p5)
}
  0x8a   :  { %54 = dma.hbm_to_vmem [thread:$0]  %s10498_s8, 1280, %s8101_s30, [#allocation3], %s7895_s10, %s7895_s10, %s7896_s27  }
  0x8b   :  { %s7897_s3 = smov [#allocation6]   ;;  %s7898_s23 = smov [#allocation9]  }
  0x8c   :  { %s75_s7 = sshll.u32 %s7897_s3, 4  ;;  %s101_s16 = sshll.u32 %s7898_s23, 4  ;;  %s76_s7 = int_to_ptr.vmem [resolvable:$true] %s75_s7  ;;  %s102_s16 = int_to_ptr.vmem [resolvable:$true] %s101_s16 }
  0x8d   :  { %s10499_s0 = sld [smem:[#allocation34_spill]] }
  0x93   :  { %s7741_s12 = scalar_lea.hbm %s10499_s0, 16 }
  0x94   :  { %p7742_p6 = scmp.ne.s32.totalorder %s10499_s0, %s7741_s12  ;;  %p7745_p7 = scmp.lt.u32.totalorder %s7741_s12, %s10499_s0 }
  0x96   :  { %p7747_p8 = pnand %p7745_p7, %p7742_p6 }
  0x98   :  { %7750 = shalt.err (!%p7747_p8)
}
  0x99   :  { %s7751_s30 = scalar_lea.vmem %s76_s7, 16  ;;  %s7755_s8 = scalar_lea.vmem %s76_s7, 32 }
  0x9a   :  { %p7752_p9 = scmp.ne.s32.totalorder %s76_s7, %s7751_s30  ;;  %p7756_p10 = scmp.lt.s32.totalorder %s76_s7, %s76_s7 }
  0x9b   :  { %p7757_p11 = scmp.lt.s32.totalorder %s7755_s8, %s7751_s30 }
  0x9d   :  { %p7758_p12 = por %p7757_p11, %p7756_p10 }
  0x9f   :  { %p7759_p13 = pnand %p7758_p12, %p7752_p9 }
  0xa1   :  { %7762 = shalt.err (!%p7759_p13)
}
  0xa2   :  { %78 = dma.hbm_to_vmem [thread:$0]  %s10499_s0, 16, %s76_s7, [#allocation5]  }
  0xa3   :  { %s10500_s3 = sld [smem:[#allocation38_spill]] }
  0xa9   :  { %s7763_s23 = scalar_lea.hbm %s10500_s3, 16 }
  0xaa   :  { %p7764_p0 = scmp.ne.s32.totalorder %s10500_s3, %s7763_s23  ;;  %p7767_p1 = scmp.lt.u32.totalorder %s7763_s23, %s10500_s3 }
  0xac   :  { %p7769_p2 = pnand %p7767_p1, %p7764_p0 }
  0xae   :  { %7772 = shalt.err (!%p7769_p2)
}
  0xaf   :  { %s7773_s11 = scalar_lea.vmem %s102_s16, 16  ;;  %s7777_s5 = scalar_lea.vmem %s102_s16, 32 }
  0xb0   :  { %p7774_p3 = scmp.ne.s32.totalorder %s102_s16, %s7773_s11  ;;  %p7778_p4 = scmp.lt.s32.totalorder %s102_s16, %s102_s16 }
  0xb1   :  { %p7779_p5 = scmp.lt.s32.totalorder %s7777_s5, %s7773_s11 }
  0xb3   :  { %p7780_p6 = por %p7779_p5, %p7778_p4 }
  0xb5   :  { %p7781_p7 = pnand %p7780_p6, %p7774_p3 }
  0xb7   :  { %7784 = shalt.err (!%p7781_p7)
}
  0xb8   :  { %104 = dma.hbm_to_vmem [thread:$0]  %s10500_s3, 16, %s102_s16, [#allocation8]  }
  0xb9   :  { %s7899_s4 = smov [#allocation12]   ;;  %s7900_s8 = smov [#allocation15]  }
  0xba   :  { %s126_s30 = sshll.u32 %s7899_s4, 4  ;;  %s151_s28 = sshll.u32 %s7900_s8, 4  ;;  %s127_s30 = int_to_ptr.vmem [resolvable:$true] %s126_s30  ;;  %s152_s28 = int_to_ptr.vmem [resolvable:$true] %s151_s28 }
  0xbb   :  { %s7785_s6 = scalar_lea.hbm %s10455_s15, 2048 }
  0xbc   :  { %p7786_p8 = scmp.ne.s32.totalorder %s10455_s15, %s7785_s6  ;;  %p7789_p9 = scmp.lt.u32.totalorder %s7785_s6, %s10455_s15 }
  0xbe   :  { %p7791_p10 = pnand %p7789_p9, %p7786_p8 }
  0xc0   :  { %7794 = shalt.err (!%p7791_p10)
}
  0xc1   :  { %s7795_s16 = scalar_lea.vmem %s127_s30, 2048  ;;  %p7800_p12 = scmp.lt.s32.totalorder %s127_s30, %s127_s30 }
  0xc2   :  { %p7796_p11 = scmp.ne.s32.totalorder %s127_s30, %s7795_s16  ;;  %p7801_p13 = scmp.lt.s32.totalorder %s7795_s16, %s7795_s16 }
  0xc4   :  { %p7802_p0 = por %p7801_p13, %p7800_p12 }
  0xc6   :  { %p7803_p1 = pnand %p7802_p0, %p7796_p11 }
  0xc8   :  { %7806 = shalt.err (!%p7803_p1)
}
  0xc9   :  { %132 = dma.hbm_to_vmem [thread:$0]  %s10455_s15, 2048, %s127_s30, [#allocation11], %s7895_s10, %s7895_s10, %s7896_s27  }
  0xca   :  { %s7807_s7 = scalar_lea.hbm %s10458_s18, 32 }
  0xcb   :  { %p7808_p2 = scmp.ne.s32.totalorder %s10458_s18, %s7807_s7  ;;  %p7811_p3 = scmp.lt.u32.totalorder %s7807_s7, %s10458_s18 }
  0xcd   :  { %p7813_p4 = pnand %p7811_p3, %p7808_p2 }
  0xcf   :  { %7816 = shalt.err (!%p7813_p4)
}
  0xd0   :  { %s7817_s20 = scalar_lea.vmem %s152_s28, 32  ;;  %p7822_p6 = scmp.lt.s32.totalorder %s152_s28, %s152_s28 }
  0xd1   :  { %p7818_p5 = scmp.ne.s32.totalorder %s152_s28, %s7817_s20  ;;  %p7823_p7 = scmp.lt.s32.totalorder %s7817_s20, %s7817_s20 }
  0xd3   :  { %p7824_p8 = por %p7823_p7, %p7822_p6 }
  0xd5   :  { %p7825_p9 = pnand %p7824_p8, %p7818_p5 }
  0xd7   :  { %7828 = shalt.err (!%p7825_p9)
}
  0xd8   :  { %154 = dma.hbm_to_vmem [thread:$0]  %s10458_s18, 32, %s152_s28, [#allocation14]  }
  0xd9   :  { %s7901_s27 = smov [#allocation18]   ;;  %s7902_s6 = smov [#allocation19]  }
  0xda   :  { %s177_s30 = sshll.u32 %s7901_s27, 4  ;;  %s189_s23 = sshll.u32 %s7902_s6, 4  ;;  %s178_s30 = int_to_ptr.vmem [resolvable:$true] %s177_s30  ;;  %s190_s23 = int_to_ptr.vmem [resolvable:$true] %s189_s23 }
  0xdb   :  { %s7829_s12 = scalar_lea.hbm %s10462_s22, 32 }
  0xdc   :  { %p7830_p10 = scmp.ne.s32.totalorder %s10462_s22, %s7829_s12  ;;  %p7833_p11 = scmp.lt.u32.totalorder %s7829_s12, %s10462_s22 }
  0xde   :  { %p7835_p12 = pnand %p7833_p11, %p7830_p10 }
  0xe0   :  { %7838 = shalt.err (!%p7835_p12)
}
  0xe1   :  { %s7839_s18 = scalar_lea.vmem %s178_s30, 32  ;;  %p7844_p0 = scmp.lt.s32.totalorder %s178_s30, %s178_s30 }
  0xe2   :  { %p7840_p13 = scmp.ne.s32.totalorder %s178_s30, %s7839_s18  ;;  %p7845_p1 = scmp.lt.s32.totalorder %s7839_s18, %s7839_s18 }
  0xe4   :  { %p7846_p2 = por %p7845_p1, %p7844_p0 }
  0xe6   :  { %p7847_p3 = pnand %p7846_p2, %p7840_p13 }
  0xe8   :  { %7850 = shalt.err (!%p7847_p3)
}
  0xe9   :  { %180 = dma.hbm_to_vmem [thread:$0]  %s10462_s22, 32, %s178_s30, [#allocation17]  }
  0xea   :  { %s7851_s4 = scalar_lea.hbm %s10464_s24, 32 }
  0xeb   :  { %p7852_p4 = scmp.ne.s32.totalorder %s10464_s24, %s7851_s4  ;;  %p7855_p5 = scmp.lt.u32.totalorder %s7851_s4, %s10464_s24 }
  0xed   :  { %p7857_p6 = pnand %p7855_p5, %p7852_p4 }
  0xef   :  { %7860 = shalt.err (!%p7857_p6)
}
  0xf0   :  { %s7861_s10 = scalar_lea.vmem %s190_s23, 32  ;;  %p7866_p8 = scmp.lt.s32.totalorder %s190_s23, %s190_s23 }
  0xf1   :  { %p7862_p7 = scmp.ne.s32.totalorder %s190_s23, %s7861_s10  ;;  %p7867_p9 = scmp.lt.s32.totalorder %s7861_s10, %s7861_s10 }
  0xf3   :  { %p7868_p10 = por %p7867_p9, %p7866_p8 }
  0xf5   :  { %p7869_p11 = pnand %p7868_p10, %p7862_p7 }
  0xf7   :  { %7872 = shalt.err (!%p7869_p11)
}
  0xf8   :  { %192 = dma.hbm_to_vmem [thread:$0]  %s10464_s24, 32, %s190_s23, [#allocation20]  }
  0xf9   :  { %7873 = dma.done.wait [#allocation3], 1280  }
  0xfa   :  { %7874 = vsyncadd [#allocation3], 4294966016 }
  0xfb   :  { %7875 = dma.done.wait [#allocation5], 32  }
  0xfc   :  { %7876 = vsyncadd [#allocation5], 4294967264 }
  0xfd   :  { %7877 = dma.done.wait [#allocation8], 1040  }
  0xfe   :  { %7878 = vsyncadd [#allocation8], 4294966256 }
  0xff   :  { %7879 = dma.done.wait [#allocation11], 2064  }
 0x100   :  { %7880 = vsyncadd [#allocation11], 4294965232 }
 0x101   :  { %7881 = dma.done.wait [#allocation14], 64  }
 0x102   :  { %7882 = vsyncadd [#allocation14], 4294967232 }
 0x103   :  { %7883 = dma.done.wait [#allocation17], 1312  }
 0x104   :  { %7884 = vsyncadd [#allocation17], 4294965984 }
 0x105   :  { %7885 = dma.done.wait [#allocation20], 32  }
 0x106   :  { %7886 = vsyncadd [#allocation20], 4294967264  ;;  %v7903_v0 = vmov 0   ;;  %v7904_v1 = vmov 0.0   ;;  %vm7905_vm0 = vmmov 0   ;;  %s10501_s6 = sld [smem:[#allocation35_spill]] }
 0x107   :  { %7149 = vset.pattern.permute.xlu1 %v7903_v0  ;;  %7148 = vset.pattern.permute.xlu0 %v7903_v0  ;;  %s10502_s16 = sld [smem:[#allocation31_spill]]  ;;  %s10503_s22 = sld [smem:[#allocation28_spill]]  ;;  %vm290_vm1 = vcmask 392192   ;;  %v1296_v40 = vld [vmem:[%s10453_s13 + $0x8] sm:$0xff]  ;;  %v1295_v41 = vld [vmem:[%s10453_s13] sm:$0xff]  ;;  %v1298_v42 = vld [vmem:[%s10453_s13 + $0x18] sm:$0xff] }
 0x108   :  { %6445 = vmatprep.subr.bf16.mxu0 %v7904_v1  ;;  %7043 = vmatprep.subr.bf16.mxu1 %v7904_v1  ;;  %s10504_s15 = sld [smem:[#allocation36_spill]]  ;;  %v1297_v43 = vld [vmem:[%s10453_s13 + $0x10] sm:$0xff]  ;;  %v1300_v44 = vld [vmem:[%s10453_s13 + $0x28] sm:$0xff]  ;;  %v1299_v45 = vld [vmem:[%s10453_s13 + $0x20] sm:$0xff]  ;;  %s10505_s8 = sld [smem:[#allocation33_spill]]  ;;  %vm459_vm2 = vcmask 654336  }
 0x109   :  { %6451 = vmatprep.mubr.msk.bf16.mxu0 %vm7905_vm0, %v7904_v1  ;;  %6467 = vmatprep.mubr.msk.bf16.mxu1 %vm7905_vm0, %v7904_v1  ;;  %v1302_v46 = vld [vmem:[%s10453_s13 + $0x38] sm:$0xff]  ;;  %v1301_v47 = vld [vmem:[%s10453_s13 + $0x30] sm:$0xff]  ;;  %v1304_v48 = vld [vmem:[%s10453_s13 + $0x48] sm:$0xff]  ;;  %s10506_s0 = sld [smem:[#allocation29_spill]]  ;;  %s10507_s28 = sld [smem:[#allocation39_spill]] }
 0x10a   :  { %v1303_v49 = vld [vmem:[%s10453_s13 + $0x40] sm:$0xff]  ;;  %v2240_v50 = vld [vmem:[%s10454_s14 + $0x8] sm:$0xff]  ;;  %v2242_v52 = vld [vmem:[%s10454_s14 + $0x18] sm:$0xff] }
 0x10b   :  { %v2239_v51 = vld [vmem:[%s10454_s14] sm:$0xff]  ;;  %v2241_v53 = vld [vmem:[%s10454_s14 + $0x10] sm:$0xff]  ;;  %v2244_v54 = vld [vmem:[%s10454_s14 + $0x28] sm:$0xff] }
 0x10c   :  { %v246_v2 = vld [vmem:[%s10501_s6 + $0x10] sm:$0xff]  ;;  %v244_v3 = vld [vmem:[%s10501_s6] sm:$0xff]  ;;  %v247_v5 = vld [vmem:[%s10501_s6 + $0x18] sm:$0xff] }
 0x10d   :  { %401 = vperm.xlu1 %7149, %v246_v2   ;;  %391 = vperm.xlu0 %7148, %v244_v3   ;;  %v7150_v4 = vld [vmem:[%s10502_s16] sm:$0xff]   ;;  %v245_v6 = vld [vmem:[%s10501_s6 + $0x8] sm:$0xff]  ;;  %v7152_v10 = vld [vmem:[%s10502_s16 + $0x10] sm:$0xff]  }
 0x10e   :  { %6446 = vmatpush3.bf16.msra.mxu0 %v7150_v4  ;;  %v7151_v7 = vld [vmem:[%s10502_s16 + $0x8] sm:$0xff]   ;;  %7046 = vmatpush3.bf16.msra.mxu1 %v7150_v4  ;;  %v248_v9 = vld [vmem:[%s10501_s6 + $0x20] sm:$0xff]  ;;  %v251_v15 = vld [vmem:[%s10501_s6 + $0x38] sm:$0xff] }
 0x10f   :  { %6447 = vmatprep.subr.bf16.mxu0 %v7904_v1  ;;  %7044 = vmatprep.subr.bf16.mxu1 %v7904_v1  ;;  %v249_v8 = vld [vmem:[%s10501_s6 + $0x28] sm:$0xff]  ;;  %v234_v11 = vld [vmem:[%s10503_s22] sm:$0xff]  ;;  %v250_v16 = vld [vmem:[%s10501_s6 + $0x30] sm:$0xff] }
 0x110   :  { %v235_v12 = vld [vmem:[%s10503_s22 + $0x8] sm:$0xff]  ;;  %v242_v13 = vld [vmem:[%s10503_s22 + $0x40] sm:$0xff]  ;;  %v236_v21 = vld [vmem:[%s10503_s22 + $0x10] sm:$0xff] }
 0x111   :  { %406 = vperm.xlu1 %7149, %v247_v5   ;;  %396 = vperm.xlu0 %7148, %v245_v6   ;;  %v243_v14 = vld [vmem:[%s10503_s22 + $0x48] sm:$0xff]  ;;  %v254_v17 = vpack.c.bf16 %v235_v12, %v234_v11  ;;  %v252_v20 = vld [vmem:[%s10501_s6 + $0x40] sm:$0xff]  ;;  %v237_v22 = vld [vmem:[%s10503_s22 + $0x18] sm:$0xff] }
 0x112   :  { %6448 = vmatpush3.bf16.msra.mxu0 %v7151_v7  ;;  %7047 = vmatpush3.bf16.msra.mxu1 %v7151_v7  ;;  %v258_v18 = vpack.c.bf16 %v243_v14, %v242_v13  ;;  %v253_v19 = vld [vmem:[%s10501_s6 + $0x48] sm:$0xff]  ;;  %v1225_v24 = vld [vmem:[%s10504_s15] sm:$0xff]  ;;  %v255_v25 = vpack.c.bf16 %v237_v22, %v236_v21  ;;  %v1228_v26 = vld [vmem:[%s10504_s15 + $0x18] sm:$0xff] }
 0x113   :  { %6449 = vmatprep.subr.bf16.mxu0 %v7904_v1  ;;  %7045 = vmatprep.subr.bf16.mxu1 %v7904_v1  ;;  %v1226_v23 = vld [vmem:[%s10504_s15 + $0x8] sm:$0xff]  ;;  %v1227_v27 = vld [vmem:[%s10504_s15 + $0x10] sm:$0xff]  ;;  %v238_v28 = vld [vmem:[%s10503_s22 + $0x20] sm:$0xff] }
 0x114   :  { %v239_v29 = vld [vmem:[%s10503_s22 + $0x28] sm:$0xff]  ;;  %v1229_v31 = vld [vmem:[%s10504_s15 + $0x20] sm:$0xff]  ;;  %v1232_v33 = vld [vmem:[%s10504_s15 + $0x38] sm:$0xff] }
 0x115   :  { %416 = vperm.xlu1 %7149, %v249_v8   ;;  %411 = vperm.xlu0 %7148, %v248_v9   ;;  %v1230_v30 = vld [vmem:[%s10504_s15 + $0x28] sm:$0xff]  ;;  %v256_v32 = vpack.c.bf16 %v239_v29, %v238_v28  ;;  %v1231_v34 = vld [vmem:[%s10504_s15 + $0x30] sm:$0xff]  ;;  %v241_v36 = vld [vmem:[%s10503_s22 + $0x38] sm:$0xff] }
 0x116   :  { %6450 = vmatpush3.bf16.msra.mxu0 %v7152_v10  ;;  %7048 = vmatpush3.bf16.msra.mxu1 %v7152_v10  ;;  %v240_v35 = vld [vmem:[%s10503_s22 + $0x30] sm:$0xff]  ;;  %v1234_v37 = vld [vmem:[%s10504_s15 + $0x48] sm:$0xff]  ;;  %v1233_v38 = vld [vmem:[%s10504_s15 + $0x40] sm:$0xff]  ;;  %s10508_s22 = sld [smem:[#allocation40_spill]]  ;;  %s10509_s15 = sld [smem:[#allocation41_spill]] }
 0x117   :  { %6506 = vmatprep.subr.bf16.mxu0 %v7904_v1  ;;  %v257_v39 = vpack.c.bf16 %v241_v36, %v240_v35  ;;  %v2243_v55 = vld [vmem:[%s10454_s14 + $0x20] sm:$0xff]  ;;  %v2246_v56 = vld [vmem:[%s10454_s14 + $0x38] sm:$0xff]  ;;  %v2245_v57 = vld [vmem:[%s10454_s14 + $0x30] sm:$0xff] }
 0x118   :  { %v2248_v58 = vld [vmem:[%s10454_s14 + $0x48] sm:$0xff]  ;;  %v2247_v59 = vld [vmem:[%s10454_s14 + $0x40] sm:$0xff]  ;;  %v2312_v2 = vld [vmem:[%s10459_s19 + $0x18] sm:$0xff] }
 0x119   :  { %426 = vperm.xlu1 %7149, %v251_v15   ;;  %421 = vperm.xlu0 %7148, %v250_v16   ;;  %v7153_v60 = vld [vmem:[%s10505_s8 + $0x40] sm:$0xff]   ;;  %v2310_v61 = vld [vmem:[%s10459_s19 + $0x8] sm:$0xff]  ;;  %v2311_v3 = vld [vmem:[%s10459_s19 + $0x10] sm:$0xff] }
 0x11a   :  { %6452 = vmatmul.mubr.msk.bf16.vlgmr.msra.gmra.mrb[0].mxu0 %vm290_vm1, %v254_v17  ;;  %6468 = vmatmul.mubr.msk.bf16.vlgmr.msra.gmra.mrb[0].mxu1 %vm290_vm1, %v258_v18  ;;  %v2309_v62 = vld [vmem:[%s10459_s19] sm:$0xff]  ;;  %v7154_v63 = vld [vmem:[%s10505_s8 + $0x48] sm:$0xff]   ;;  %v7155_v4 = vld [vmem:[%s10505_s8 + $0x50] sm:$0xff]  }
 0x11b   :  { %6455 = vmatprep.mubr.msk.bf16.mxu0 %vm7905_vm0, %v7904_v1  ;;  %6507 = vmatpush3.bf16.msra.mxu0 %v7153_v60  ;;  %v2314_v5 = vld [vmem:[%s10459_s19 + $0x28] sm:$0xff]  ;;  %v2313_v6 = vld [vmem:[%s10459_s19 + $0x20] sm:$0xff]  ;;  %v7156_v7 = vld [vmem:[%s10505_s8 + $0x58] sm:$0xff]  }
 0x11c   :  { %6508 = vmatprep.subr.bf16.mxu0 %v7904_v1  ;;  %v2316_v8 = vld [vmem:[%s10459_s19 + $0x38] sm:$0xff]  ;;  %v2315_v9 = vld [vmem:[%s10459_s19 + $0x30] sm:$0xff]  ;;  %v7157_v10 = vld [vmem:[%s10505_s8 + $0x60] sm:$0xff]  }
 0x11d   :  { %436 = vperm.xlu1 %7149, %v253_v19   ;;  %431 = vperm.xlu0 %7148, %v252_v20   ;;  %v2318_v11 = vld [vmem:[%s10459_s19 + $0x48] sm:$0xff]  ;;  %v2317_v12 = vld [vmem:[%s10459_s19 + $0x40] sm:$0xff]  ;;  %v3952_v16 = vld [vmem:[%s10465_s25 + $0x18] sm:$0xff] }
 0x11e   :  { %v7158_v13 = vld [vmem:[%s10505_s8 + $0x68] sm:$0xff]   ;;  %v3949_v15 = vld [vmem:[%s10465_s25] sm:$0xff]  ;;  %v3951_v17 = vld [vmem:[%s10465_s25 + $0x10] sm:$0xff] }
 0x11f   :  { %6509 = vmatpush3.bf16.msra.mxu0 %v7154_v63  ;;  %v3950_v14 = vld [vmem:[%s10465_s25 + $0x8] sm:$0xff]  ;;  %v7159_v18 = vld [vmem:[%s10505_s8 + $0x70] sm:$0xff]   ;;  %v3953_v20 = vld [vmem:[%s10465_s25 + $0x20] sm:$0xff] }
 0x120   :  { %6510 = vmatprep.subr.bf16.mxu0 %v7904_v1  ;;  %v3954_v19 = vld [vmem:[%s10465_s25 + $0x28] sm:$0xff]  ;;  %v7160_v21 = vld [vmem:[%s10505_s8 + $0x78] sm:$0xff]   ;;  %v5567_v29 = vld [vmem:[%s10466_s26 + $0x10] sm:$0xff] }
 0x121   :  { %1242 = vperm.xlu1 %7149, %v1226_v23   ;;  %1237 = vperm.xlu0 %7148, %v1225_v24   ;;  %v3956_v22 = vld [vmem:[%s10465_s25 + $0x38] sm:$0xff]  ;;  %v3955_v23 = vld [vmem:[%s10465_s25 + $0x30] sm:$0xff]  ;;  %v3958_v24 = vld [vmem:[%s10465_s25 + $0x48] sm:$0xff] }
 0x122   :  { %6456 = vmatmul.mubr.msk.bf16.gmra.mrb[4].mxu0 %vm290_vm1, %v255_v25  ;;  %v3957_v25 = vld [vmem:[%s10465_s25 + $0x40] sm:$0xff]  ;;  %v5568_v28 = vld [vmem:[%s10466_s26 + $0x18] sm:$0xff] }
 0x123   :  { %6459 = vmatprep.mubr.msk.bf16.mxu0 %vm7905_vm0, %v7904_v1  ;;  %6511 = vmatpush3.bf16.msra.mxu0 %v7155_v4  ;;  %v5573_v35 = vld [vmem:[%s10466_s26 + $0x40] sm:$0xff] }
 0x124   :  { %6512 = vmatprep.subr.bf16.mxu0 %v7904_v1  ;;  %v8522_v36 = vld [vmem:[%s10506_s0] sm:$0xff] }
 0x125   :  { %1252 = vperm.xlu1 %7149, %v1228_v26   ;;  %1247 = vperm.xlu0 %7148, %v1227_v27   ;;  %v5566_v26 = vld [vmem:[%s10466_s26 + $0x8] sm:$0xff]  ;;  %v5565_v27 = vld [vmem:[%s10466_s26] sm:$0xff] }
 0x126   :  { %6491 = vmatprep.mubr.msk.f32.mxu1 %vm459_vm2, %v8522_v36 }
 0x127   :  { %6513 = vmatpush3.bf16.msra.mxu0 %v7156_v7 }
 0x128   :  { %6514 = vmatprep.subr.bf16.mxu0 %v7904_v1 }
 0x129   :  { %1262 = vperm.xlu1 %7149, %v1230_v30   ;;  %1257 = vperm.xlu0 %7148, %v1229_v31   ;;  %v5570_v30 = vld [vmem:[%s10466_s26 + $0x28] sm:$0xff]  ;;  %v5569_v31 = vld [vmem:[%s10466_s26 + $0x20] sm:$0xff] }
 0x12a   :  { %6460 = vmatmul.mubr.msk.bf16.gmra.mrb[8].mxu0 %vm290_vm1, %v256_v32  ;;  %v5572_v32 = vld [vmem:[%s10466_s26 + $0x38] sm:$0xff] }
 0x12b   :  { %6463 = vmatprep.mubr.msk.bf16.mxu0 %vm7905_vm0, %v7904_v1  ;;  %6515 = vmatpush3.bf16.msra.mxu0 %v7157_v10 }
 0x12c   :  { %6516 = vmatprep.subr.bf16.mxu0 %v7904_v1 }
 0x12d   :  { %1272 = vperm.xlu1 %7149, %v1232_v33   ;;  %1267 = vperm.xlu0 %7148, %v1231_v34   ;;  %v5571_v33 = vld [vmem:[%s10466_s26 + $0x30] sm:$0xff]  ;;  %v5574_v34 = vld [vmem:[%s10466_s26 + $0x48] sm:$0xff] }
 0x12f   :  { %6517 = vmatpush3.bf16.msra.mxu0 %v7158_v13 }
 0x130   :  { %6518 = vmatprep.subr.bf16.mxu0 %v7904_v1 }
 0x131   :  { %1282 = vperm.xlu1 %7149, %v1234_v37   ;;  %1277 = vperm.xlu0 %7148, %v1233_v38  }
 0x132   :  { %6464 = vmatmul.mubr.msk.bf16.gmra.mrb[12].mxu0 %vm290_vm1, %v257_v39 }
 0x133   :  { %6522 = vmatprep.mubr.msk.bf16.mxu0 %vm7905_vm0, %v7904_v1  ;;  %6519 = vmatpush3.bf16.msra.mxu0 %v7159_v18 }
 0x134   :  { %6520 = vmatprep.subr.bf16.mxu0 %v7904_v1 }
 0x135   :  { %1481 = vperm.xlu1 %7149, %v1296_v40   ;;  %1476 = vperm.xlu0 %7148, %v1295_v41  }
 0x137   :  { %6521 = vmatpush3.bf16.msra.mxu0 %v7160_v21 }
 0x139   :  { %1491 = vperm.xlu1 %7149, %v1298_v42   ;;  %1486 = vperm.xlu0 %7148, %v1297_v43  }
 0x13d   :  { %1501 = vperm.xlu1 %7149, %v1300_v44   ;;  %1496 = vperm.xlu0 %7148, %v1299_v45   ;;  %v8528_v44 = vld [vmem:[#allocation4] ss:$0 sm:$0xff] }
 0x141   :  { %1511 = vperm.xlu1 %7149, %v1302_v46   ;;  %1506 = vperm.xlu0 %7148, %v1301_v47  }
 0x145   :  { %1521 = vperm.xlu1 %7149, %v1304_v48   ;;  %1516 = vperm.xlu0 %7148, %v1303_v49  }
 0x149   :  { %2256 = vperm.xlu1 %7149, %v2240_v50   ;;  %2251 = vperm.xlu0 %7148, %v2239_v51  }
 0x14d   :  { %2266 = vperm.xlu1 %7149, %v2242_v52   ;;  %2261 = vperm.xlu0 %7148, %v2241_v53  }
 0x151   :  { %2276 = vperm.xlu1 %7149, %v2244_v54   ;;  %2271 = vperm.xlu0 %7148, %v2243_v55  }
 0x155   :  { %2286 = vperm.xlu1 %7149, %v2246_v56   ;;  %2281 = vperm.xlu0 %7148, %v2245_v57  }
 0x159   :  { %2296 = vperm.xlu1 %7149, %v2248_v58   ;;  %2291 = vperm.xlu0 %7148, %v2247_v59  }
 0x15d   :  { %2542 = vperm.xlu1 %7149, %v2310_v61   ;;  %2537 = vperm.xlu0 %7148, %v2309_v62  }
 0x161   :  { %2552 = vperm.xlu1 %7149, %v2312_v2   ;;  %2547 = vperm.xlu0 %7148, %v2311_v3  }
 0x165   :  { %2562 = vperm.xlu1 %7149, %v2314_v5   ;;  %2557 = vperm.xlu0 %7148, %v2313_v6  }
 0x169   :  { %2572 = vperm.xlu1 %7149, %v2316_v8   ;;  %2567 = vperm.xlu0 %7148, %v2315_v9  }
 0x16d   :  { %2582 = vperm.xlu1 %7149, %v2318_v11   ;;  %2577 = vperm.xlu0 %7148, %v2317_v12  }
 0x171   :  { %4303 = vperm.xlu1 %7149, %v3950_v14   ;;  %4298 = vperm.xlu0 %7148, %v3949_v15  }
 0x175   :  { %4313 = vperm.xlu1 %7149, %v3952_v16   ;;  %4308 = vperm.xlu0 %7148, %v3951_v17  }
 0x179   :  { %4323 = vperm.xlu1 %7149, %v3954_v19   ;;  %4318 = vperm.xlu0 %7148, %v3953_v20  }
 0x17d   :  { %4333 = vperm.xlu1 %7149, %v3956_v22   ;;  %4328 = vperm.xlu0 %7148, %v3955_v23  }
 0x181   :  { %4343 = vperm.xlu1 %7149, %v3958_v24   ;;  %4338 = vperm.xlu0 %7148, %v3957_v25  }
 0x185   :  { %5582 = vperm.xlu1 %7149, %v5566_v26   ;;  %5577 = vperm.xlu0 %7148, %v5565_v27  }
 0x189   :  { %5592 = vperm.xlu1 %7149, %v5568_v28   ;;  %5587 = vperm.xlu0 %7148, %v5567_v29  }
 0x18c   :  { %v392_v37 = vpop.permute.xlu0 %391  ;;  %v402_v38 = vpop.permute.xlu1 %401 }
 0x18d   :  { %5602 = vperm.xlu1 %7149, %v5570_v30   ;;  %5597 = vperm.xlu0 %7148, %v5569_v31  }
 0x190   :  { %v397_v39 = vpop.permute.xlu0 %396  ;;  %v407_v40 = vpop.permute.xlu1 %406 }
 0x191   :  { %5612 = vperm.xlu1 %7149, %v5572_v32   ;;  %5607 = vperm.xlu0 %7148, %v5571_v33  }
 0x194   :  { %v412_v41 = vpop.permute.xlu0 %411  ;;  %v417_v42 = vpop.permute.xlu1 %416 }
 0x195   :  { %5622 = vperm.xlu1 %7149, %v5574_v34   ;;  %5617 = vperm.xlu0 %7148, %v5573_v35  }
 0x198   :  { %v8526_v43 = vpop.permute.xlu0 %421  ;;  %v8530_v45 = vpop.permute.xlu1 %426 }
 0x19c   :  { %v432_v54 = vpop.permute.xlu0 %431  ;;  %v437_v2 = vpop.permute.xlu1 %436 }
 0x1ed   :  { %v340_v46 = vpop.f32.mrb[0].mxu0  ;;  %v372_v47 = vpop.f32.mrb[0].mxu1 }
 0x1ee   :  { %v341_v48 = vadd.f32 %v8528_v44, %v340_v46  ;;  %v6453_v49 = vpop.f32.mrb[1].mxu0  ;;  %v373_v50 = vadd.f32 %v8528_v44, %v372_v47  ;;  %v6469_v51 = vpop.f32.mrb[1].mxu1  ;;  %v8587_v46 = vld [vmem:[%s10506_s0 + $0x20] sm:$0xff]  ;;  %v8596_v47 = vld [vmem:[%s10506_s0 + $0x28] sm:$0xff] }
 0x1ef   :  { %v343_v52 = vpop.f32.mrb[2].mxu0  ;;  %v375_v53 = vpop.f32.mrb[2].mxu1  ;;  %v8603_v49 = vld [vmem:[%s10506_s0 + $0x30] sm:$0xff]  ;;  %v8616_v51 = vld [vmem:[%s10506_s0 + $0x38] sm:$0xff] }
 0x1f0   :  { %v379_v55 = vmax.f32 %v341_v48, 0.0  ;;  %v344_v56 = vadd.f32 %v8528_v44, %v343_v52  ;;  %v387_v57 = vmax.f32 %v373_v50, 0.0  ;;  %v376_v58 = vadd.f32 %v8528_v44, %v375_v53  ;;  %v6454_v59 = vpop.f32.mrb[3].mxu0  ;;  %v6470_v60 = vpop.f32.mrb[3].mxu1  ;;  %v8598_v48 = vld [vmem:[#allocation2 + $0x8] sm:$0xff]  ;;  %v8605_v50 = vld [vmem:[#allocation2 + $0x10] sm:$0xff] }
 0x1f1   :  { %v8620_v52 = vld [vmem:[#allocation2 + $0x18] sm:$0xff]  ;;  %v8625_v53 = vld [vmem:[%s10506_s0 + $0x40] sm:$0xff]  ;;  %v8662_v60 = vld [vmem:[#allocation2 + $0x48] sm:$0xff] }
 0x1f2   :  { %v380_v61 = vmax.f32 %v344_v56, 0.0  ;;  %v447_v62 = vmul.f32 %v432_v54, %v387_v57  ;;  %v388_v63 = vmax.f32 %v376_v58, 0.0  ;;  %v439_v3 = vmul.f32 %v392_v37, %v379_v55  ;;  %v8627_v54 = vld [vmem:[#allocation2 + $0x20] sm:$0xff]  ;;  %v8638_v55 = vld [vmem:[%s10506_s0 + $0x48] sm:$0xff]  ;;  %v8644_v57 = vld [vmem:[#allocation2 + $0x30] sm:$0xff] }
 0x1f3   :  { %v8642_v56 = vld [vmem:[#allocation2 + $0x28] sm:$0xff]  ;;  %v8652_v58 = vld [vmem:[#allocation2 + $0x38] sm:$0xff]  ;;  %v8656_v59 = vld [vmem:[#allocation2 + $0x40] sm:$0xff] }
 0x1f4   :  { %v440_v4 = vmul.f32 %v397_v39, %v380_v61  ;;  %v448_v5 = vmul.f32 %v437_v2, %v388_v63  ;;  %v7161_v61 = vld [vmem:[%s10505_s8] sm:$0xff]   ;;  %v7163_v63 = vld [vmem:[%s10505_s8 + $0x10] sm:$0xff]   ;;  %v7164_v2 = vld [vmem:[%s10505_s8 + $0x18] sm:$0xff]  }
 0x1f5   :  { %v348_v6 = vpop.f32.mrb[4].mxu0 }
 0x1f6   :  { %v6863_v7 = vpack.c.bf16 %v440_v4, %v439_v3  ;;  %v349_v8 = vadd.f32 %v8528_v44, %v348_v6  ;;  %v6457_v9 = vpop.f32.mrb[5].mxu0  ;;  %v8537_v10 = vpack.c.bf16 %v448_v5, %v447_v62  ;;  %v7162_v62 = vld [vmem:[%s10505_s8 + $0x8] sm:$0xff]   ;;  %v7165_v3 = vld [vmem:[%s10505_s8 + $0x20] sm:$0xff]   ;;  %v7167_v5 = vld [vmem:[%s10505_s8 + $0x30] sm:$0xff]  }
 0x1f7   :  { %v351_v11 = vpop.f32.mrb[6].mxu0  ;;  %v7166_v4 = vld [vmem:[%s10505_s8 + $0x28] sm:$0xff]   ;;  %v7168_v6 = vld [vmem:[%s10505_s8 + $0x38] sm:$0xff]  }
 0x1f8   :  { %v381_v12 = vmax.f32 %v349_v8, 0.0  ;;  %v352_v13 = vadd.f32 %v8528_v44, %v351_v11  ;;  %6864 = vmatprep.subr.bf16.mxu1 %v6863_v7  ;;  %6523 = vmatmul.mubr.bf16.vlgmr.msra.gmra.mrb[16].mxu0 %v6863_v7  ;;  %v6458_v14 = vpop.f32.mrb[7].mxu0 }
 0x1f9   :  { %6884 = vmatprep.subr.bf16.mxu0 %v6863_v7  ;;  %6866 = vmatpush3.bf16.msra.mxu1 %v6863_v7 }
 0x1fa   :  { %v382_v15 = vmax.f32 %v352_v13, 0.0  ;;  %6886 = vmatpush3.bf16.msra.mxu0 %v6863_v7  ;;  %6526 = vmatprep.mubr.msk.bf16.mxu0 %vm7905_vm0, %v7904_v1  ;;  %v441_v16 = vmul.f32 %v402_v38, %v381_v12 }
 0x1fc   :  { %v442_v17 = vmul.f32 %v407_v40, %v382_v15 }
 0x1fd   :  { %v356_v18 = vpop.f32.mrb[8].mxu0 }
 0x1fe   :  { %v6867_v19 = vpack.c.bf16 %v442_v17, %v441_v16  ;;  %v357_v20 = vadd.f32 %v8528_v44, %v356_v18  ;;  %v6461_v21 = vpop.f32.mrb[9].mxu0 }
 0x1ff   :  { %v359_v22 = vpop.f32.mrb[10].mxu0 }
 0x200   :  { %v383_v23 = vmax.f32 %v357_v20, 0.0  ;;  %v360_v24 = vadd.f32 %v8528_v44, %v359_v22  ;;  %6868 = vmatprep.subr.bf16.mxu1 %v6867_v19  ;;  %6527 = vmatmul.mubr.bf16.gmra.mrb[20].mxu0 %v6867_v19  ;;  %v6462_v25 = vpop.f32.mrb[11].mxu0 }
 0x201   :  { %6888 = vmatprep.subr.bf16.mxu0 %v6867_v19  ;;  %6870 = vmatpush3.bf16.msra.mxu1 %v6867_v19 }
 0x202   :  { %v384_v26 = vmax.f32 %v360_v24, 0.0  ;;  %6890 = vmatpush3.bf16.msra.mxu0 %v6867_v19  ;;  %6530 = vmatprep.mubr.msk.bf16.mxu0 %vm7905_vm0, %v7904_v1  ;;  %v443_v27 = vmul.f32 %v412_v41, %v383_v23 }
 0x204   :  { %v444_v28 = vmul.f32 %v417_v42, %v384_v26  ;;  %v8560_v42 = vld [vmem:[%s10506_s0 + $0x8] sm:$0xff] }
 0x205   :  { %v364_v29 = vpop.f32.mrb[12].mxu0 }
 0x206   :  { %v6871_v30 = vpack.c.bf16 %v444_v28, %v443_v27  ;;  %v365_v31 = vadd.f32 %v8528_v44, %v364_v29  ;;  %v6465_v32 = vpop.f32.mrb[13].mxu0  ;;  %v7169_v27 = vld [vmem:[%s10505_s8 + $0x80] sm:$0xff]  }
 0x207   :  { %v367_v33 = vpop.f32.mrb[14].mxu0 }
 0x208   :  { %v385_v34 = vmax.f32 %v365_v31, 0.0  ;;  %v368_v35 = vadd.f32 %v8528_v44, %v367_v33  ;;  %6872 = vmatprep.subr.bf16.mxu1 %v6871_v30  ;;  %6531 = vmatmul.mubr.bf16.gmra.mrb[24].mxu0 %v6871_v30  ;;  %v6466_v37 = vpop.f32.mrb[15].mxu0  ;;  %v8568_v44 = vld [vmem:[#allocation2] sm:$0xff]  ;;  %v7170_v33 = vld [vmem:[%s10505_s8 + $0x88] sm:$0xff]  }
 0x209   :  { %6892 = vmatprep.subr.bf16.mxu0 %v6871_v30  ;;  %6874 = vmatpush3.bf16.msra.mxu1 %v6871_v30 }
 0x20a   :  { %v386_v38 = vmax.f32 %v368_v35, 0.0  ;;  %6894 = vmatpush3.bf16.msra.mxu0 %v6871_v30  ;;  %6534 = vmatprep.mubr.msk.bf16.mxu0 %vm7905_vm0, %v7904_v1  ;;  %v445_v39 = vmul.f32 %v8526_v43, %v385_v34  ;;  %v8566_v43 = vld [vmem:[%s10506_s0 + $0x10] sm:$0xff] }
 0x20c   :  { %v446_v40 = vmul.f32 %v8530_v45, %v386_v38  ;;  %v8580_v45 = vld [vmem:[%s10506_s0 + $0x18] sm:$0xff] }
 0x20e   :  { %v6875_v41 = vpack.c.bf16 %v446_v40, %v445_v39  ;;  %v7171_v39 = vld [vmem:[%s10505_s8 + $0x90] sm:$0xff]  }
 0x210   :  { %6876 = vmatprep.subr.bf16.mxu1 %v6875_v41  ;;  %6535 = vmatmul.mubr.bf16.gmra.mrb[28].mxu0 %v6875_v41 }
 0x211   :  { %6896 = vmatprep.subr.bf16.mxu0 %v6875_v41  ;;  %6878 = vmatpush3.bf16.msra.mxu1 %v6875_v41 }
 0x212   :  { %6898 = vmatpush3.bf16.msra.mxu0 %v6875_v41  ;;  %6880 = vmatprep.subr.bf16.mxu1 %v8537_v10 }
 0x213   :  { %6900 = vmatprep.subr.bf16.mxu0 %v8537_v10  ;;  %6538 = vmatprep.mubr.msk.bf16.mxu0 %vm7905_vm0, %v7904_v1 }
 0x215   :  { %6882 = vmatpush3.bf16.msra.mxu1 %v8537_v10 }
 0x216   :  { %6902 = vmatpush3.bf16.msra.mxu0 %v8537_v10  ;;  %6542 = vmatprep.subr.bf16.mxu1 %v7904_v1 }
 0x217   :  { %6649 = vmatprep.subr.bf16.mxu0 %v7904_v1 }
 0x218   :  { %6492 = vmatmul.mubr.msk.f32.vlgmr.msra.gmra.mrb[4].mxu1 %vm459_vm2, %v8560_v42  ;;  %6539 = vmatmul.mubr.bf16.gmra.mrb[32].mxu0 %v8537_v10 }
 0x219   :  { %6494 = vmatprep.mubr.msk.f32.mxu1 %vm459_vm2, %v8566_v43  ;;  %6598 = vmatprep.mubr.msk.f32.mxu0 %vm459_vm2, %v8568_v44 }
 0x21a   :  { %6543 = vmatpush3.bf16.msra.mxu1 %v7161_v61 }
 0x21b   :  { %6544 = vmatprep.subr.bf16.mxu1 %v7904_v1 }
 0x21c   :  { %6495 = vmatmul.mubr.msk.f32.gmra.mrb[6].mxu1 %vm459_vm2, %v8580_v45 }
 0x21d   :  { %6497 = vmatprep.mubr.msk.f32.mxu1 %vm459_vm2, %v8587_v46 }
 0x21e   :  { %6545 = vmatpush3.bf16.msra.mxu1 %v7162_v62 }
 0x21f   :  { %6546 = vmatprep.subr.bf16.mxu1 %v7904_v1 }
 0x220   :  { %6498 = vmatmul.mubr.msk.f32.gmra.mrb[8].mxu1 %vm459_vm2, %v8596_v47  ;;  %6599 = vmatmul.mubr.msk.f32.vlgmr.msra.gmra.mrb[36].mxu0 %vm459_vm2, %v8598_v48 }
 0x221   :  { %6500 = vmatprep.mubr.msk.f32.mxu1 %vm459_vm2, %v8603_v49  ;;  %6601 = vmatprep.mubr.msk.f32.mxu0 %vm459_vm2, %v8605_v50 }
 0x222   :  { %6547 = vmatpush3.bf16.msra.mxu1 %v7163_v63 }
 0x223   :  { %6548 = vmatprep.subr.bf16.mxu1 %v7904_v1 }
 0x224   :  { %6501 = vmatmul.mubr.msk.f32.gmra.mrb[10].mxu1 %vm459_vm2, %v8616_v51  ;;  %6602 = vmatmul.mubr.msk.f32.gmra.mrb[38].mxu0 %vm459_vm2, %v8620_v52 }
 0x225   :  { %6503 = vmatprep.mubr.msk.f32.mxu1 %vm459_vm2, %v8625_v53  ;;  %6604 = vmatprep.mubr.msk.f32.mxu0 %vm459_vm2, %v8627_v54 }
 0x226   :  { %6549 = vmatpush3.bf16.msra.mxu1 %v7164_v2 }
 0x227   :  { %6550 = vmatprep.subr.bf16.mxu1 %v7904_v1 }
 0x228   :  { %6504 = vmatmul.mubr.msk.f32.gmra.mrb[12].mxu1 %vm459_vm2, %v8638_v55  ;;  %6605 = vmatmul.mubr.msk.f32.gmra.mrb[40].mxu0 %vm459_vm2, %v8642_v56 }
 0x229   :  { %6607 = vmatprep.mubr.msk.f32.mxu0 %vm459_vm2, %v8644_v57  ;;  %6558 = vmatprep.mubr.msk.bf16.mxu1 %vm7905_vm0, %v7904_v1 }
 0x22a   :  { %6551 = vmatpush3.bf16.msra.mxu1 %v7165_v3  ;;  %v7172_v3 = vld [vmem:[%s10505_s8 + $0x98] sm:$0xff]  }
 0x22b   :  { %6552 = vmatprep.subr.bf16.mxu1 %v7904_v1 }
 0x22c   :  { %6608 = vmatmul.mubr.msk.f32.gmra.mrb[42].mxu0 %vm459_vm2, %v8652_v58 }
 0x22d   :  { %6610 = vmatprep.mubr.msk.f32.mxu0 %vm459_vm2, %v8656_v59 }
 0x22e   :  { %6553 = vmatpush3.bf16.msra.mxu1 %v7166_v4 }
 0x22f   :  { %6554 = vmatprep.subr.bf16.mxu1 %v7904_v1 }
 0x230   :  { %6611 = vmatmul.mubr.msk.f32.gmra.mrb[44].mxu0 %vm459_vm2, %v8662_v60 }
 0x231   :  { %6665 = vmatprep.mubr.msk.bf16.mxu0 %vm7905_vm0, %v7904_v1 }
 0x232   :  { %6555 = vmatpush3.bf16.msra.mxu1 %v7167_v5 }
 0x233   :  { %6556 = vmatprep.subr.bf16.mxu1 %v7904_v1 }
 0x236   :  { %6557 = vmatpush3.bf16.msra.mxu1 %v7168_v6 }
 0x237   :  { %6613 = vmatprep.subr.bf16.mxu1 %v7904_v1 }
 0x2cb   :  { %v8700_v7 = vpop.f32.mrb[16].mxu0 }
 0x2cc   :  { %v6524_v8 = vpop.f32.mrb[17].mxu0 }
 0x2cd   :  { %v8702_v9 = vpop.f32.mrb[18].mxu0 }
 0x2ce   :  { %v6525_v10 = vpop.f32.mrb[19].mxu0 }
 0x2d3   :  { %v8704_v11 = vpop.f32.mrb[20].mxu0 }
 0x2d4   :  { %v6528_v12 = vpop.f32.mrb[21].mxu0 }
 0x2d5   :  { %v8706_v13 = vpop.f32.mrb[22].mxu0  ;;  %v7173_v12 = vld [vmem:[%s10505_s8 + $0xa0] sm:$0xff]  }
 0x2d6   :  { %v6529_v14 = vpop.f32.mrb[23].mxu0 }
 0x2db   :  { %v8708_v15 = vpop.f32.mrb[24].mxu0 }
 0x2dc   :  { %v6532_v16 = vpop.f32.mrb[25].mxu0 }
 0x2dd   :  { %v8710_v17 = vpop.f32.mrb[26].mxu0 }
 0x2de   :  { %v6533_v18 = vpop.f32.mrb[27].mxu0 }
 0x2e3   :  { %v8712_v19 = vpop.f32.mrb[28].mxu0 }
 0x2e4   :  { %v6536_v20 = vpop.f32.mrb[29].mxu0 }
 0x2e5   :  { %v8714_v21 = vpop.f32.mrb[30].mxu0 }
 0x2e6   :  { %v6537_v22 = vpop.f32.mrb[31].mxu0 }
 0x2eb   :  { %v6493_v23 = vpop.f32.mrb[4].mxu1  ;;  %v8716_v24 = vpop.f32.mrb[32].mxu0 }
 0x2ec   :  { %v556_v25 = vpop.f32.mrb[5].mxu1  ;;  %v6540_v26 = vpop.f32.mrb[33].mxu0 }
 0x2ed   :  { %v605_v28 = vpack.c.bf16 %v6493_v23, %v556_v25  ;;  %v8721_v29 = vpop.f32.mrb[34].mxu0  ;;  %v7174_v23 = vld [vmem:[%s10505_s8 + $0xa8] sm:$0xff]  }
 0x2ee   :  { %v6541_v30 = vpop.f32.mrb[35].mxu0 }
 0x2ef   :  { %6559 = vmatmul.mubr.bf16.vlgmr.msra.gmra.mrb[16].mxu1 %v605_v28  ;;  %v6496_v31 = vpop.f32.mrb[6].mxu1  ;;  %v7175_v28 = vld [vmem:[%s10505_s8 + $0xb0] sm:$0xff]  }
 0x2f0   :  { %v566_v32 = vpop.f32.mrb[7].mxu1  ;;  %6614 = vmatpush3.bf16.msra.mxu1 %v7169_v27  ;;  %6562 = vmatprep.mubr.msk.bf16.mxu1 %vm7905_vm0, %v7904_v1 }
 0x2f1   :  { %v606_v34 = vpack.c.bf16 %v6496_v31, %v566_v32  ;;  %6615 = vmatprep.subr.bf16.mxu1 %v7904_v1  ;;  %v7176_v32 = vld [vmem:[%s10505_s8 + $0xb8] sm:$0xff]  }
 0x2f3   :  { %v6499_v35 = vpop.f32.mrb[8].mxu1  ;;  %v6600_v37 = vpop.f32.mrb[36].mxu0 }
 0x2f4   :  { %6616 = vmatpush3.bf16.msra.mxu1 %v7170_v33  ;;  %v576_v38 = vpop.f32.mrb[9].mxu1  ;;  %v996_v40 = vpop.f32.mrb[37].mxu0  ;;  %v7177_v33 = vld [vmem:[#allocation7] sm:$0xff]  }
 0x2f5   :  { %v607_v41 = vpack.c.bf16 %v6499_v35, %v576_v38  ;;  %6617 = vmatprep.subr.bf16.mxu1 %v7904_v1  ;;  %v1045_v61 = vpack.c.bf16 %v6600_v37, %v996_v40  ;;  %6650 = vmatpush3.bf16.msra.mxu0 %v7177_v33  ;;  %v7179_v35 = vld [vmem:[#allocation7 + $0x10] sm:$0xff]   ;;  %v7180_v37 = vld [vmem:[#allocation7 + $0x18] sm:$0xff]   ;;  %v7181_v38 = vld [vmem:[#allocation7 + $0x20] sm:$0xff]  }
 0x2f6   :  { %6651 = vmatprep.subr.bf16.mxu0 %v7904_v1  ;;  %v7184_v40 = vld [vmem:[#allocation7 + $0x38] sm:$0xff]  }
 0x2f7   :  { %6563 = vmatmul.mubr.bf16.gmra.mrb[20].mxu1 %v606_v34  ;;  %v6502_v62 = vpop.f32.mrb[10].mxu1  ;;  %v6603_v63 = vpop.f32.mrb[38].mxu0  ;;  %v7178_v34 = vld [vmem:[#allocation7 + $0x8] sm:$0xff]   ;;  %v8797_v33 = vld [vmem:[#allocation6] ss:$0 sm:$0xff] }
 0x2f8   :  { %6566 = vmatprep.mubr.msk.bf16.mxu1 %vm7905_vm0, %v7904_v1  ;;  %6618 = vmatpush3.bf16.msra.mxu1 %v7171_v39  ;;  %v586_v2 = vpop.f32.mrb[11].mxu1  ;;  %v1006_v4 = vpop.f32.mrb[39].mxu0  ;;  %v7183_v39 = vld [vmem:[#allocation7 + $0x30] sm:$0xff]  }
 0x2f9   :  { %6619 = vmatprep.subr.bf16.mxu1 %v7904_v1  ;;  %v608_v5 = vpack.c.bf16 %v6502_v62, %v586_v2  ;;  %v1046_v6 = vpack.c.bf16 %v6603_v63, %v1006_v4  ;;  %6652 = vmatpush3.bf16.msra.mxu0 %v7178_v34 }
 0x2fa   :  { %6653 = vmatprep.subr.bf16.mxu0 %v7904_v1 }
 0x2fb   :  { %v6505_v8 = vpop.f32.mrb[12].mxu1  ;;  %v6606_v10 = vpop.f32.mrb[40].mxu0 }
 0x2fc   :  { %6620 = vmatpush3.bf16.msra.mxu1 %v7172_v3  ;;  %v596_v14 = vpop.f32.mrb[13].mxu1  ;;  %v1016_v16 = vpop.f32.mrb[41].mxu0 }
 0x2fd   :  { %6621 = vmatprep.subr.bf16.mxu1 %v7904_v1  ;;  %v609_v18 = vpack.c.bf16 %v6505_v8, %v596_v14  ;;  %v1047_v20 = vpack.c.bf16 %v6606_v10, %v1016_v16  ;;  %6654 = vmatpush3.bf16.msra.mxu0 %v7179_v35 }
 0x2fe   :  { %6655 = vmatprep.subr.bf16.mxu0 %v7904_v1 }
 0x2ff   :  { %6567 = vmatmul.mubr.bf16.gmra.mrb[24].mxu1 %v607_v41  ;;  %v6609_v22 = vpop.f32.mrb[42].mxu0 }
 0x300   :  { %6570 = vmatprep.mubr.msk.bf16.mxu1 %vm7905_vm0, %v7904_v1  ;;  %6622 = vmatpush3.bf16.msra.mxu1 %v7173_v12  ;;  %v1026_v25 = vpop.f32.mrb[43].mxu0 }
 0x301   :  { %6623 = vmatprep.subr.bf16.mxu1 %v7904_v1  ;;  %v1048_v26 = vpack.c.bf16 %v6609_v22, %v1026_v25  ;;  %6656 = vmatpush3.bf16.msra.mxu0 %v7180_v37 }
 0x302   :  { %6657 = vmatprep.subr.bf16.mxu0 %v7904_v1 }
 0x303   :  { %v6612_v27 = vpop.f32.mrb[44].mxu0 }
 0x304   :  { %6624 = vmatpush3.bf16.msra.mxu1 %v7174_v23  ;;  %v1036_v30 = vpop.f32.mrb[45].mxu0 }
 0x305   :  { %6625 = vmatprep.subr.bf16.mxu1 %v7904_v1  ;;  %v1049_v31 = vpack.c.bf16 %v6612_v27, %v1036_v30  ;;  %6658 = vmatpush3.bf16.msra.mxu0 %v7181_v38 }
 0x306   :  { %6659 = vmatprep.subr.bf16.mxu0 %v7904_v1 }
 0x307   :  { %6571 = vmatmul.mubr.bf16.gmra.mrb[28].mxu1 %v608_v5 }
 0x308   :  { %6574 = vmatprep.mubr.msk.bf16.mxu1 %vm7905_vm0, %v7904_v1  ;;  %6626 = vmatpush3.bf16.msra.mxu1 %v7175_v28 }
 0x309   :  { %6627 = vmatprep.subr.bf16.mxu1 %v7904_v1 }
 0x30c   :  { %6628 = vmatpush3.bf16.msra.mxu1 %v7176_v32 }
 0x30f   :  { %6575 = vmatmul.mubr.bf16.gmra.mrb[32].mxu1 %v609_v18 }
 0x310   :  { %6629 = vmatprep.mubr.msk.bf16.mxu1 %vm7905_vm0, %v7904_v1 }
 0x317   :  { %6630 = vmatmul.mubr.bf16.vlgmr.msra.gmra.mrb[36].mxu1 %v1045_v61 }
 0x318   :  { %6633 = vmatprep.mubr.msk.bf16.mxu1 %vm7905_vm0, %v7904_v1 }
 0x31f   :  { %6634 = vmatmul.mubr.bf16.gmra.mrb[40].mxu1 %v1046_v6 }
 0x320   :  { %6637 = vmatprep.mubr.msk.bf16.mxu1 %vm7905_vm0, %v7904_v1 }
 0x327   :  { %6638 = vmatmul.mubr.bf16.gmra.mrb[44].mxu1 %v1047_v20 }
 0x328   :  { %6641 = vmatprep.mubr.msk.bf16.mxu1 %vm7905_vm0, %v7904_v1 }
 0x32f   :  { %6642 = vmatmul.mubr.bf16.gmra.mrb[48].mxu1 %v1048_v26 }
 0x330   :  { %6645 = vmatprep.mubr.msk.bf16.mxu1 %vm7905_vm0, %v7904_v1 }
 0x337   :  { %6646 = vmatmul.mubr.bf16.gmra.mrb[52].mxu1 %v1049_v31 }
 0x338   :  { %6705 = vmatprep.mubr.msk.f32.mxu1 %vm459_vm2, %v8522_v36  ;;  %v7182_v36 = vld [vmem:[#allocation7 + $0x28] sm:$0xff]  }
 0x339   :  { %6660 = vmatpush3.bf16.msra.mxu0 %v7182_v36 }
 0x33a   :  { %6661 = vmatprep.subr.bf16.mxu0 %v7904_v1 }
 0x33d   :  { %6662 = vmatpush3.bf16.msra.mxu0 %v7183_v39  ;;  %v1243_v39 = vpop.permute.xlu1 %1242 }
 0x33e   :  { %6663 = vmatprep.subr.bf16.mxu0 %v7904_v1 }
 0x341   :  { %6664 = vmatpush3.bf16.msra.mxu0 %v7184_v40 }
 0x342   :  { %6720 = vmatprep.subr.bf16.mxu0 %v7904_v1 }
 0x3c2   :  { %v851_v41 = vpop.f32.mrb[16].mxu1 }
 0x3c3   :  { %v852_v61 = vadd.f32 %v851_v41, %v8700_v7  ;;  %v6560_v62 = vpop.f32.mrb[17].mxu1  ;;  %v1238_v41 = vpop.permute.xlu0 %1237 }
 0x3c4   :  { %v854_v63 = vpop.f32.mrb[18].mxu1 }
 0x3c5   :  { %v855_v2 = vadd.f32 %v854_v63, %v8702_v9  ;;  %v6561_v3 = vpop.f32.mrb[19].mxu1 }
 0x3ca   :  { %v859_v4 = vpop.f32.mrb[20].mxu1 }
 0x3cb   :  { %v860_v5 = vadd.f32 %v859_v4, %v8704_v11  ;;  %v6564_v6 = vpop.f32.mrb[21].mxu1 }
 0x3cc   :  { %v862_v8 = vpop.f32.mrb[22].mxu1  ;;  %v7185_v6 = vld [vmem:[%s10507_s28 + $0x40] sm:$0xff]  }
 0x3cd   :  { %v863_v10 = vadd.f32 %v862_v8, %v8706_v13  ;;  %v6565_v12 = vpop.f32.mrb[23].mxu1 }
 0x3d2   :  { %v867_v14 = vpop.f32.mrb[24].mxu1 }
 0x3d3   :  { %v868_v16 = vadd.f32 %v867_v14, %v8708_v15  ;;  %v6568_v18 = vpop.f32.mrb[25].mxu1 }
 0x3d4   :  { %v870_v20 = vpop.f32.mrb[26].mxu1 }
 0x3d5   :  { %v871_v7 = vadd.f32 %v870_v20, %v8710_v17  ;;  %v6569_v22 = vpop.f32.mrb[27].mxu1 }
 0x3d6   :  { %v1253_v22 = vpop.permute.xlu1 %1252 }
 0x3da   :  { %v875_v23 = vpop.f32.mrb[28].mxu1 }
 0x3db   :  { %v8786_v9 = vadd.f32 %v875_v23, %v8712_v19  ;;  %v6572_v25 = vpop.f32.mrb[29].mxu1 }
 0x3dc   :  { %v878_v26 = vpop.f32.mrb[30].mxu1  ;;  %v1248_v25 = vpop.permute.xlu0 %1247 }
 0x3dd   :  { %v8789_v11 = vadd.f32 %v878_v26, %v8714_v21  ;;  %v6573_v27 = vpop.f32.mrb[31].mxu1 }
 0x3e2   :  { %v883_v13 = vpop.f32.mrb[32].mxu1 }
 0x3e3   :  { %v8792_v28 = vadd.f32 %v883_v13, %v8716_v24  ;;  %v6576_v15 = vpop.f32.mrb[33].mxu1 }
 0x3e4   :  { %v886_v30 = vpop.f32.mrb[34].mxu1 }
 0x3e5   :  { %v8795_v31 = vadd.f32 %v886_v30, %v8721_v29  ;;  %v6577_v17 = vpop.f32.mrb[35].mxu1 }
 0x3e6   :  { %v7187_v17 = vld [vmem:[%s10507_s28 + $0x50] sm:$0xff]  }
 0x3ea   :  { %v1149_v32 = vpop.f32.mrb[36].mxu1 }
 0x3eb   :  { %v1188_v19 = vadd.f32 %v1149_v32, %v852_v61  ;;  %v6631_v34 = vpop.f32.mrb[37].mxu1 }
 0x3ec   :  { %v1152_v35 = vpop.f32.mrb[38].mxu1 }
 0x3ed   :  { %v1205_v21 = vadd.f32 %v8797_v33, %v1188_v19  ;;  %v1189_v37 = vadd.f32 %v1152_v35, %v855_v2  ;;  %v6632_v38 = vpop.f32.mrb[39].mxu1 }
 0x3ee   :  { %v1263_v38 = vpop.permute.xlu1 %1262 }
 0x3ef   :  { %v1215_v36 = vmax.f32 %v1205_v21, 0.0  ;;  %v1206_v24 = vadd.f32 %v8797_v33, %v1189_v37 }
 0x3f1   :  { %v1216_v40 = vmax.f32 %v1206_v24, 0.0  ;;  %v8801_v29 = vmul.f32 %v1238_v41, %v1215_v36  ;;  %v1258_v36 = vpop.permute.xlu0 %1257 }
 0x3f2   :  { %v1157_v62 = vpop.f32.mrb[40].mxu1 }
 0x3f3   :  { %v8803_v63 = vmul.f32 %v1243_v39, %v1216_v40  ;;  %v1190_v3 = vadd.f32 %v1157_v62, %v860_v5  ;;  %v6635_v4 = vpop.f32.mrb[41].mxu1  ;;  %v7186_v5 = vld [vmem:[%s10507_s28 + $0x48] sm:$0xff]  }
 0x3f4   :  { %v1160_v61 = vpop.f32.mrb[42].mxu1  ;;  %v7189_v4 = vld [vmem:[%s10507_s28 + $0x60] sm:$0xff]  }
 0x3f5   :  { %v1305_v2 = vpack.c.bf16 %v8803_v63, %v8801_v29  ;;  %v1207_v8 = vadd.f32 %v8797_v33, %v1190_v3  ;;  %v1191_v12 = vadd.f32 %v1160_v61, %v863_v10  ;;  %v6636_v14 = vpop.f32.mrb[43].mxu1 }
 0x3f6   :  { %v1273_v14 = vpop.permute.xlu1 %1272 }
 0x3f7   :  { %v1217_v18 = vmax.f32 %v1207_v8, 0.0  ;;  %v1208_v20 = vadd.f32 %v8797_v33, %v1191_v12  ;;  %6666 = vmatmul.mubr.bf16.vlgmr.msra.gmra.mrb[48].mxu0 %v1305_v2 }
 0x3f8   :  { %6669 = vmatprep.mubr.msk.bf16.mxu0 %vm7905_vm0, %v7904_v1  ;;  %6721 = vmatpush3.bf16.msra.mxu0 %v7185_v6 }
 0x3f9   :  { %v1218_v23 = vmax.f32 %v1208_v20, 0.0  ;;  %6722 = vmatprep.subr.bf16.mxu0 %v7904_v1  ;;  %v8818_v10 = vmul.f32 %v1248_v25, %v1217_v18  ;;  %v1268_v20 = vpop.permute.xlu0 %1267 }
 0x3fa   :  { %v1165_v26 = vpop.f32.mrb[44].mxu1 }
 0x3fb   :  { %v8820_v27 = vmul.f32 %v1253_v22, %v1218_v23  ;;  %v1192_v13 = vadd.f32 %v1165_v26, %v868_v16  ;;  %v6639_v15 = vpop.f32.mrb[45].mxu1  ;;  %v7188_v16 = vld [vmem:[%s10507_s28 + $0x58] sm:$0xff]  }
 0x3fc   :  { %v1168_v30 = vpop.f32.mrb[46].mxu1  ;;  %6723 = vmatpush3.bf16.msra.mxu0 %v7186_v5 }
 0x3fd   :  { %v1209_v32 = vadd.f32 %v8797_v33, %v1192_v13  ;;  %v1193_v19 = vadd.f32 %v1168_v30, %v871_v7  ;;  %v6640_v34 = vpop.f32.mrb[47].mxu1  ;;  %v1306_v35 = vpack.c.bf16 %v8820_v27, %v8818_v10  ;;  %6724 = vmatprep.subr.bf16.mxu0 %v7904_v1 }
 0x3ff   :  { %v1219_v21 = vmax.f32 %v1209_v32, 0.0  ;;  %v1210_v37 = vadd.f32 %v8797_v33, %v1193_v19  ;;  %6670 = vmatmul.mubr.bf16.gmra.mrb[52].mxu0 %v1306_v35  ;;  %v1283_v35 = vpop.permute.xlu1 %1282 }
 0x400   :  { %6673 = vmatprep.mubr.msk.bf16.mxu0 %vm7905_vm0, %v7904_v1  ;;  %6725 = vmatpush3.bf16.msra.mxu0 %v7187_v17 }
 0x401   :  { %v1220_v7 = vmax.f32 %v1210_v37, 0.0  ;;  %6726 = vmatprep.subr.bf16.mxu0 %v7904_v1  ;;  %v8836_v39 = vmul.f32 %v1258_v36, %v1219_v21 }
 0x402   :  { %v1173_v24 = vpop.f32.mrb[48].mxu1 }
 0x403   :  { %v8838_v40 = vmul.f32 %v1263_v38, %v1220_v7  ;;  %v1194_v41 = vadd.f32 %v1173_v24, %v8786_v9  ;;  %v6643_v62 = vpop.f32.mrb[49].mxu1  ;;  %v7192_v38 = vld [vmem:[%s10507_s28 + $0x78] sm:$0xff]   ;;  %v8884_v7 = vld [vmem:[#allocation9] ss:$0 sm:$0xff] }
 0x404   :  { %v1176_v3 = vpop.f32.mrb[50].mxu1  ;;  %6727 = vmatpush3.bf16.msra.mxu0 %v7188_v16  ;;  %v7191_v16 = vld [vmem:[%s10507_s28 + $0x70] sm:$0xff]  }
 0x405   :  { %v1211_v61 = vadd.f32 %v8797_v33, %v1194_v41  ;;  %v1195_v6 = vadd.f32 %v1176_v3, %v8789_v11  ;;  %v6644_v2 = vpop.f32.mrb[51].mxu1  ;;  %v1307_v8 = vpack.c.bf16 %v8838_v40, %v8836_v39  ;;  %6728 = vmatprep.subr.bf16.mxu0 %v7904_v1 }
 0x407   :  { %v1221_v12 = vmax.f32 %v1211_v61, 0.0  ;;  %v1212_v9 = vadd.f32 %v8797_v33, %v1195_v6  ;;  %6674 = vmatmul.mubr.bf16.gmra.mrb[56].mxu0 %v1307_v8  ;;  %v1482_v8 = vpop.permute.xlu1 %1481 }
 0x408   :  { %6677 = vmatprep.mubr.msk.bf16.mxu0 %vm7905_vm0, %v7904_v1  ;;  %6729 = vmatpush3.bf16.msra.mxu0 %v7189_v4 }
 0x409   :  { %v1222_v18 = vmax.f32 %v1212_v9, 0.0  ;;  %6730 = vmatprep.subr.bf16.mxu0 %v7904_v1  ;;  %v8853_v5 = vmul.f32 %v1268_v20, %v1221_v12 }
 0x40a   :  { %v1181_v11 = vpop.f32.mrb[52].mxu1 }
 0x40b   :  { %v8855_v22 = vmul.f32 %v1273_v14, %v1222_v18  ;;  %v1196_v23 = vadd.f32 %v1181_v11, %v8792_v28  ;;  %v6647_v25 = vpop.f32.mrb[53].mxu1  ;;  %v1278_v28 = vpop.permute.xlu0 %1277 }
 0x40c   :  { %v1184_v26 = vpop.f32.mrb[54].mxu1 }
 0x40d   :  { %v1213_v13 = vadd.f32 %v8797_v33, %v1196_v23  ;;  %v1197_v15 = vadd.f32 %v1184_v26, %v8795_v31  ;;  %v6648_v30 = vpop.f32.mrb[55].mxu1  ;;  %v1308_v17 = vpack.c.bf16 %v8855_v22, %v8853_v5 }
 0x40f   :  { %v1223_v32 = vmax.f32 %v1213_v13, 0.0  ;;  %v1214_v19 = vadd.f32 %v8797_v33, %v1197_v15  ;;  %6678 = vmatmul.mubr.bf16.gmra.mrb[60].mxu0 %v1308_v17  ;;  %v7190_v33 = vld [vmem:[%s10507_s28 + $0x68] sm:$0xff]   ;;  %v1477_v9 = vpop.permute.xlu0 %1476  ;;  %v1492_v17 = vpop.permute.xlu1 %1491 }
 0x410   :  { %6681 = vmatprep.mubr.msk.bf16.mxu0 %vm7905_vm0, %v7904_v1  ;;  %6731 = vmatpush3.bf16.msra.mxu0 %v7190_v33 }
 0x411   :  { %v1224_v34 = vmax.f32 %v1214_v19, 0.0  ;;  %v8865_v21 = vmul.f32 %v1278_v28, %v1223_v32  ;;  %6732 = vmatprep.subr.bf16.mxu0 %v7904_v1 }
 0x413   :  { %v8867_v37 = vmul.f32 %v1283_v35, %v1224_v34  ;;  %v1487_v19 = vpop.permute.xlu0 %1486 }
 0x414   :  { %6733 = vmatpush3.bf16.msra.mxu0 %v7191_v16 }
 0x415   :  { %v1309_v31 = vpack.c.bf16 %v8867_v37, %v8865_v21  ;;  %6734 = vmatprep.subr.bf16.mxu0 %v7904_v1 }
 0x417   :  { %6682 = vmatmul.mubr.bf16.gmra.mrb[64].mxu0 %v1309_v31 }
 0x418   :  { %6736 = vmatprep.mubr.msk.bf16.mxu0 %vm7905_vm0, %v7904_v1  ;;  %6735 = vmatpush3.bf16.msra.mxu0 %v7192_v38 }
 0x4ca   :  { %v1415_v36 = vpop.f32.mrb[48].mxu0 }
 0x4cb   :  { %v1416_v24 = vadd.f32 %v8884_v7, %v1415_v36  ;;  %v6667_v41 = vpop.f32.mrb[49].mxu0 }
 0x4cc   :  { %v1418_v62 = vpop.f32.mrb[50].mxu0 }
 0x4cd   :  { %v1454_v3 = vadd.f32 %v1416_v24, %v8801_v29  ;;  %v1419_v4 = vadd.f32 %v8884_v7, %v1418_v62  ;;  %v6668_v61 = vpop.f32.mrb[51].mxu0  ;;  %v1502_v62 = vpop.permute.xlu1 %1501 }
 0x4cf   :  { %v1464_v6 = vmax.f32 %v1454_v3, 0.0  ;;  %v1455_v2 = vadd.f32 %v1419_v4, %v8803_v63  ;;  %v1497_v4 = vpop.permute.xlu0 %1496 }
 0x4d1   :  { %v1465_v12 = vmax.f32 %v1455_v2, 0.0  ;;  %v8890_v18 = vmul.f32 %v1477_v9, %v1464_v6 }
 0x4d2   :  { %v1423_v14 = vpop.f32.mrb[52].mxu0 }
 0x4d3   :  { %v8892_v20 = vmul.f32 %v1482_v8, %v1465_v12  ;;  %v1424_v11 = vadd.f32 %v8884_v7, %v1423_v14  ;;  %v6671_v23 = vpop.f32.mrb[53].mxu0 }
 0x4d4   :  { %v1426_v25 = vpop.f32.mrb[54].mxu0 }
 0x4d5   :  { %v6903_v29 = vpack.c.bf16 %v8892_v20, %v8890_v18  ;;  %v1456_v26 = vadd.f32 %v1424_v11, %v8818_v10  ;;  %v1427_v13 = vadd.f32 %v8884_v7, %v1426_v25  ;;  %v6672_v63 = vpop.f32.mrb[55].mxu0 }
 0x4d7   :  { %v1466_v15 = vmax.f32 %v1456_v26, 0.0  ;;  %v1457_v30 = vadd.f32 %v1427_v13, %v8820_v27  ;;  %6904 = vmatprep.subr.bf16.mxu1 %v6903_v29  ;;  %6737 = vmatmul.mubr.bf16.vlgmr.msra.gmra.mrb[68].mxu0 %v6903_v29  ;;  %v1507_v13 = vpop.permute.xlu0 %1506 }
 0x4d8   :  { %6924 = vmatprep.subr.bf16.mxu0 %v6903_v29  ;;  %6906 = vmatpush3.bf16.msra.mxu1 %v6903_v29 }
 0x4d9   :  { %v1467_v32 = vmax.f32 %v1457_v30, 0.0  ;;  %6926 = vmatpush3.bf16.msra.mxu0 %v6903_v29  ;;  %6740 = vmatprep.mubr.msk.bf16.mxu0 %vm7905_vm0, %v7904_v1  ;;  %v8902_v35 = vmul.f32 %v1487_v19, %v1466_v15  ;;  %v1512_v29 = vpop.permute.xlu1 %1511 }
 0x4da   :  { %v1431_v34 = vpop.f32.mrb[56].mxu0 }
 0x4db   :  { %v8904_v10 = vmul.f32 %v1492_v17, %v1467_v32  ;;  %v1432_v28 = vadd.f32 %v8884_v7, %v1431_v34  ;;  %v6675_v31 = vpop.f32.mrb[57].mxu0 }
 0x4dc   :  { %v1434_v27 = vpop.f32.mrb[58].mxu0 }
 0x4dd   :  { %v6907_v33 = vpack.c.bf16 %v8904_v10, %v8902_v35  ;;  %v1458_v16 = vadd.f32 %v1432_v28, %v8836_v39  ;;  %v1435_v38 = vadd.f32 %v8884_v7, %v1434_v27  ;;  %v6676_v36 = vpop.f32.mrb[59].mxu0 }
 0x4df   :  { %v1468_v24 = vmax.f32 %v1458_v16, 0.0  ;;  %v1459_v41 = vadd.f32 %v1435_v38, %v8838_v40  ;;  %6908 = vmatprep.subr.bf16.mxu1 %v6907_v33  ;;  %6741 = vmatmul.mubr.bf16.gmra.mrb[72].mxu0 %v6907_v33  ;;  %v1522_v16 = vpop.permute.xlu1 %1521  ;;  %v1517_v38 = vpop.permute.xlu0 %1516 }
 0x4e0   :  { %6928 = vmatprep.subr.bf16.mxu0 %v6907_v33  ;;  %6910 = vmatpush3.bf16.msra.mxu1 %v6907_v33 }
 0x4e1   :  { %v1469_v3 = vmax.f32 %v1459_v41, 0.0  ;;  %6930 = vmatpush3.bf16.msra.mxu0 %v6907_v33  ;;  %6744 = vmatprep.mubr.msk.bf16.mxu0 %vm7905_vm0, %v7904_v1  ;;  %v8914_v6 = vmul.f32 %v1497_v4, %v1468_v24 }
 0x4e2   :  { %v1439_v61 = vpop.f32.mrb[60].mxu0 }
 0x4e3   :  { %v8916_v39 = vmul.f32 %v1502_v62, %v1469_v3  ;;  %v1440_v2 = vadd.f32 %v8884_v7, %v1439_v61  ;;  %v6679_v8 = vpop.f32.mrb[61].mxu0 }
 0x4e4   :  { %v1442_v40 = vpop.f32.mrb[62].mxu0 }
 0x4e5   :  { %v6911_v12 = vpack.c.bf16 %v8916_v39, %v8914_v6  ;;  %v1460_v9 = vadd.f32 %v1440_v2, %v8853_v5  ;;  %v1443_v14 = vadd.f32 %v8884_v7, %v1442_v40  ;;  %v6680_v11 = vpop.f32.mrb[63].mxu0 }
 0x4e7   :  { %v1470_v23 = vmax.f32 %v1460_v9, 0.0  ;;  %v1461_v25 = vadd.f32 %v1443_v14, %v8855_v22  ;;  %6912 = vmatprep.subr.bf16.mxu1 %v6911_v12  ;;  %6745 = vmatmul.mubr.bf16.gmra.mrb[76].mxu0 %v6911_v12  ;;  %v7201_v9 = vld [vmem:[%s10507_s28 + $0x80] sm:$0xff]  }
 0x4e8   :  { %6932 = vmatprep.subr.bf16.mxu0 %v6911_v12  ;;  %6914 = vmatpush3.bf16.msra.mxu1 %v6911_v12 }
 0x4e9   :  { %v1471_v26 = vmax.f32 %v1461_v25, 0.0  ;;  %6934 = vmatpush3.bf16.msra.mxu0 %v6911_v12  ;;  %6748 = vmatprep.mubr.msk.bf16.mxu0 %vm7905_vm0, %v7904_v1  ;;  %v8926_v15 = vmul.f32 %v1507_v13, %v1470_v23 }
 0x4ea   :  { %v1447_v63 = vpop.f32.mrb[64].mxu0 }
 0x4eb   :  { %v8928_v5 = vmul.f32 %v1512_v29, %v1471_v26  ;;  %v1448_v30 = vadd.f32 %v8884_v7, %v1447_v63  ;;  %v6683_v17 = vpop.f32.mrb[65].mxu0  ;;  %v7202_v29 = vld [vmem:[%s10507_s28 + $0x88] sm:$0xff]  }
 0x4ec   :  { %v1450_v22 = vpop.f32.mrb[66].mxu0 }
 0x4ed   :  { %v6915_v32 = vpack.c.bf16 %v8928_v5, %v8926_v15  ;;  %v1462_v19 = vadd.f32 %v1448_v30, %v8865_v21  ;;  %v1451_v34 = vadd.f32 %v8884_v7, %v1450_v22  ;;  %v6684_v28 = vpop.f32.mrb[67].mxu0 }
 0x4ef   :  { %v1472_v31 = vmax.f32 %v1462_v19, 0.0  ;;  %v1463_v27 = vadd.f32 %v1451_v34, %v8867_v37  ;;  %6916 = vmatprep.subr.bf16.mxu1 %v6915_v32  ;;  %6749 = vmatmul.mubr.bf16.gmra.mrb[80].mxu0 %v6915_v32 }
 0x4f0   :  { %6936 = vmatprep.subr.bf16.mxu0 %v6915_v32  ;;  %6918 = vmatpush3.bf16.msra.mxu1 %v6915_v32 }
 0x4f1   :  { %v1473_v33 = vmax.f32 %v1463_v27, 0.0  ;;  %6938 = vmatpush3.bf16.msra.mxu0 %v6915_v32  ;;  %6752 = vmatprep.mubr.msk.bf16.mxu0 %vm7905_vm0, %v7904_v1  ;;  %v8938_v36 = vmul.f32 %v1517_v38, %v1472_v31  ;;  %v7203_v32 = vld [vmem:[%s10507_s28 + $0x90] sm:$0xff]  }
 0x4f3   :  { %v8940_v21 = vmul.f32 %v1522_v16, %v1473_v33  ;;  %v7204_v16 = vld [vmem:[%s10507_s28 + $0x98] sm:$0xff]  }
 0x4f5   :  { %v6919_v7 = vpack.c.bf16 %v8940_v21, %v8938_v36 }
 0x4f7   :  { %6920 = vmatprep.subr.bf16.mxu1 %v6919_v7  ;;  %6753 = vmatmul.mubr.bf16.gmra.mrb[84].mxu0 %v6919_v7 }
 0x4f8   :  { %6940 = vmatprep.subr.bf16.mxu0 %v6919_v7  ;;  %6922 = vmatpush3.bf16.msra.mxu1 %v6919_v7 }
 0x4f9   :  { %6942 = vmatpush3.bf16.msra.mxu0 %v6919_v7  ;;  %6812 = vmatprep.mubr.msk.f32.mxu0 %vm459_vm2, %v8568_v44  ;;  %v7195_v44 = vld [vmem:[%s10507_s28 + $0x10] sm:$0xff]  }
 0x4fa   :  { %6756 = vmatprep.subr.bf16.mxu1 %v7904_v1 }
 0x4fb   :  { %6706 = vmatmul.mubr.msk.f32.vlgmr.msra.gmra.mrb[14].mxu1 %vm459_vm2, %v8560_v42  ;;  %v7193_v42 = vld [vmem:[%s10507_s28] sm:$0xff]  }
 0x4fc   :  { %6708 = vmatprep.mubr.msk.f32.mxu1 %vm459_vm2, %v8566_v43  ;;  %6757 = vmatpush3.bf16.msra.mxu1 %v7193_v42  ;;  %v7194_v43 = vld [vmem:[%s10507_s28 + $0x8] sm:$0xff]  }
 0x4fd   :  { %6758 = vmatprep.subr.bf16.mxu1 %v7904_v1 }
 0x4ff   :  { %6709 = vmatmul.mubr.msk.f32.gmra.mrb[56].mxu1 %vm459_vm2, %v8580_v45  ;;  %6813 = vmatmul.mubr.msk.f32.vlgmr.msra.gmra.mrb[46].mxu0 %vm459_vm2, %v8598_v48  ;;  %v7196_v45 = vld [vmem:[%s10507_s28 + $0x18] sm:$0xff]   ;;  %v7199_v48 = vld [vmem:[%s10507_s28 + $0x30] sm:$0xff]  }
 0x500   :  { %6711 = vmatprep.mubr.msk.f32.mxu1 %vm459_vm2, %v8587_v46  ;;  %6815 = vmatprep.mubr.msk.f32.mxu0 %vm459_vm2, %v8605_v50  ;;  %v7197_v46 = vld [vmem:[%s10507_s28 + $0x20] sm:$0xff]  }
 0x501   :  { %6759 = vmatpush3.bf16.msra.mxu1 %v7194_v43 }
 0x502   :  { %6760 = vmatprep.subr.bf16.mxu1 %v7904_v1 }
 0x503   :  { %6712 = vmatmul.mubr.msk.f32.gmra.mrb[58].mxu1 %vm459_vm2, %v8596_v47  ;;  %6816 = vmatmul.mubr.msk.f32.gmra.mrb[88].mxu0 %vm459_vm2, %v8620_v52  ;;  %v7198_v47 = vld [vmem:[%s10507_s28 + $0x28] sm:$0xff]  }
 0x504   :  { %6714 = vmatprep.mubr.msk.f32.mxu1 %vm459_vm2, %v8603_v49  ;;  %6818 = vmatprep.mubr.msk.f32.mxu0 %vm459_vm2, %v8627_v54  ;;  %v7200_v49 = vld [vmem:[%s10507_s28 + $0x38] sm:$0xff]  }
 0x505   :  { %6761 = vmatpush3.bf16.msra.mxu1 %v7195_v44 }
 0x506   :  { %6762 = vmatprep.subr.bf16.mxu1 %v7904_v1 }
 0x507   :  { %6715 = vmatmul.mubr.msk.f32.gmra.mrb[60].mxu1 %vm459_vm2, %v8616_v51  ;;  %6819 = vmatmul.mubr.msk.f32.gmra.mrb[90].mxu0 %vm459_vm2, %v8642_v56 }
 0x508   :  { %6717 = vmatprep.mubr.msk.f32.mxu1 %vm459_vm2, %v8625_v53  ;;  %6821 = vmatprep.mubr.msk.f32.mxu0 %vm459_vm2, %v8644_v57 }
 0x509   :  { %6763 = vmatpush3.bf16.msra.mxu1 %v7196_v45  ;;  %v7205_v45 = vld [vmem:[%s10507_s28 + $0xa0] sm:$0xff]  }
 0x50a   :  { %6764 = vmatprep.subr.bf16.mxu1 %v7904_v1 }
 0x50b   :  { %6718 = vmatmul.mubr.msk.f32.gmra.mrb[62].mxu1 %vm459_vm2, %v8638_v55  ;;  %6822 = vmatmul.mubr.msk.f32.gmra.mrb[92].mxu0 %vm459_vm2, %v8652_v58 }
 0x50c   :  { %6824 = vmatprep.mubr.msk.f32.mxu0 %vm459_vm2, %v8656_v59  ;;  %6772 = vmatprep.mubr.msk.bf16.mxu1 %vm7905_vm0, %v7904_v1 }
 0x50d   :  { %6765 = vmatpush3.bf16.msra.mxu1 %v7197_v46 }
 0x50e   :  { %6766 = vmatprep.subr.bf16.mxu1 %v7904_v1 }
 0x50f   :  { %6825 = vmatmul.mubr.msk.f32.gmra.mrb[94].mxu0 %vm459_vm2, %v8662_v60 }
 0x510   :  { %2464 = vmatprep.mubr.bf16.mxu0 %v7903_v0 }
 0x511   :  { %6767 = vmatpush3.bf16.msra.mxu1 %v7198_v47 }
 0x512   :  { %6768 = vmatprep.subr.bf16.mxu1 %v7904_v1 }
 0x515   :  { %6769 = vmatpush3.bf16.msra.mxu1 %v7199_v48 }
 0x516   :  { %6770 = vmatprep.subr.bf16.mxu1 %v7904_v1 }
 0x519   :  { %6771 = vmatpush3.bf16.msra.mxu1 %v7200_v49 }
 0x51a   :  { %6827 = vmatprep.subr.bf16.mxu1 %v7904_v1 }
 0x5aa   :  { %v9018_v50 = vpop.f32.mrb[68].mxu0 }
 0x5ab   :  { %v6738_v51 = vpop.f32.mrb[69].mxu0 }
 0x5ac   :  { %v9020_v52 = vpop.f32.mrb[70].mxu0 }
 0x5ad   :  { %v6739_v53 = vpop.f32.mrb[71].mxu0 }
 0x5ae   :  { %v7206_v53 = vld [vmem:[%s10507_s28 + $0xa8] sm:$0xff]  }
 0x5b2   :  { %v9022_v54 = vpop.f32.mrb[72].mxu0 }
 0x5b3   :  { %v6742_v55 = vpop.f32.mrb[73].mxu0 }
 0x5b4   :  { %v9024_v56 = vpop.f32.mrb[74].mxu0 }
 0x5b5   :  { %v6743_v57 = vpop.f32.mrb[75].mxu0 }
 0x5ba   :  { %v9026_v58 = vpop.f32.mrb[76].mxu0 }
 0x5bb   :  { %v6746_v59 = vpop.f32.mrb[77].mxu0 }
 0x5bc   :  { %v9028_v60 = vpop.f32.mrb[78].mxu0  ;;  %v7207_v59 = vld [vmem:[%s10507_s28 + $0xb0] sm:$0xff]  }
 0x5bd   :  { %v6747_v37 = vpop.f32.mrb[79].mxu0 }
 0x5be   :  { %v7208_v37 = vld [vmem:[%s10507_s28 + $0xb8] sm:$0xff]  }
 0x5c2   :  { %v9030_v24 = vpop.f32.mrb[80].mxu0 }
 0x5c3   :  { %v6750_v41 = vpop.f32.mrb[81].mxu0 }
 0x5c4   :  { %v9032_v62 = vpop.f32.mrb[82].mxu0  ;;  %v7209_v41 = vld [vmem:[#allocation12] ss:$8 sps:$4 sm:$0xff]  }
 0x5c5   :  { %v6751_v3 = vpop.f32.mrb[83].mxu0 }
 0x5c6   :  { %v7211_v3 = vld [vmem:[#allocation12 + $0x4] ss:$8 sps:$4 sm:$0xff]  }
 0x5c7   :  { %2432 = vmatprep.subr.bf16.mxu0 %v7211_v3 }
 0x5c8   :  { %2433 = vmatpush1.bf16.msra.mxu0 %v7209_v41 }
 0x5ca   :  { %v9034_v4 = vpop.f32.mrb[84].mxu0 }
 0x5cb   :  { %v6754_v61 = vpop.f32.mrb[85].mxu0 }
 0x5cc   :  { %v9036_v2 = vpop.f32.mrb[86].mxu0  ;;  %v7214_v61 = vld [vmem:[#allocation12 + $0x14] ss:$8 sps:$4 sm:$0xff]  }
 0x5cd   :  { %v6755_v8 = vpop.f32.mrb[87].mxu0  ;;  %2434 = vmatprep.subr.bf16.mxu0 %v7214_v61 }
 0x5ce   :  { %v6707_v40 = vpop.f32.mrb[14].mxu1  ;;  %v7212_v8 = vld [vmem:[#allocation12 + $0x10] ss:$8 sps:$4 sm:$0xff]  }
 0x5cf   :  { %v1600_v12 = vpop.f32.mrb[15].mxu1  ;;  %2435 = vmatpush1.bf16.msra.mxu0 %v7212_v8 }
 0x5d0   :  { %v1649_v14 = vpack.c.bf16 %v6707_v40, %v1600_v12  ;;  %v7217_v40 = vld [vmem:[#allocation12 + $0x24] ss:$8 sps:$4 sm:$0xff]   ;;  %v7215_v12 = vld [vmem:[#allocation12 + $0x20] ss:$8 sps:$4 sm:$0xff]  }
 0x5d1   :  { %2436 = vmatprep.subr.bf16.mxu0 %v7217_v40 }
 0x5d2   :  { %6773 = vmatmul.mubr.bf16.vlgmr.msra.gmra.mrb[64].mxu1 %v1649_v14  ;;  %v6710_v11 = vpop.f32.mrb[56].mxu1  ;;  %v6814_v23 = vpop.f32.mrb[46].mxu0  ;;  %v7218_v14 = vld [vmem:[#allocation12 + $0x30] ss:$8 sps:$4 sm:$0xff]  }
 0x5d3   :  { %v1610_v25 = vpop.f32.mrb[57].mxu1  ;;  %6828 = vmatpush3.bf16.msra.mxu1 %v7201_v9  ;;  %6776 = vmatprep.mubr.msk.bf16.mxu1 %vm7905_vm0, %v7904_v1  ;;  %v2000_v26 = vpop.f32.mrb[47].mxu0  ;;  %v7220_v9 = vld [vmem:[#allocation12 + $0x34] ss:$8 sps:$4 sm:$0xff]  }
 0x5d4   :  { %v1650_v13 = vpack.c.bf16 %v6710_v11, %v1610_v25  ;;  %6829 = vmatprep.subr.bf16.mxu1 %v7904_v1  ;;  %v2049_v63 = vpack.c.bf16 %v6814_v23, %v2000_v26  ;;  %2437 = vmatpush1.bf16.msra.mxu0 %v7215_v12  ;;  %v7223_v11 = vld [vmem:[#allocation12 + $0x44] ss:$8 sps:$4 sm:$0xff]   ;;  %v7221_v23 = vld [vmem:[#allocation12 + $0x40] ss:$8 sps:$4 sm:$0xff]   ;;  %v7226_v25 = vld [vmem:[#allocation12 + $0x54] ss:$8 sps:$4 sm:$0xff]  }
 0x5d5   :  { %2438 = vmatprep.subr.bf16.mxu0 %v7220_v9  ;;  %v7229_v26 = vld [vmem:[#allocation12 + $0x64] ss:$8 sps:$4 sm:$0xff]  }
 0x5d6   :  { %v6713_v30 = vpop.f32.mrb[58].mxu1  ;;  %v6817_v17 = vpop.f32.mrb[88].mxu0 }
 0x5d7   :  { %6830 = vmatpush3.bf16.msra.mxu1 %v7202_v29  ;;  %v1620_v22 = vpop.f32.mrb[59].mxu1  ;;  %v2010_v19 = vpop.f32.mrb[89].mxu0  ;;  %v7224_v29 = vld [vmem:[#allocation12 + $0x50] ss:$8 sps:$4 sm:$0xff]  }
 0x5d8   :  { %v1651_v34 = vpack.c.bf16 %v6713_v30, %v1620_v22  ;;  %6831 = vmatprep.subr.bf16.mxu1 %v7904_v1  ;;  %v2050_v28 = vpack.c.bf16 %v6817_v17, %v2010_v19  ;;  %2439 = vmatpush1.bf16.msra.mxu0 %v7218_v14  ;;  %v7230_v30 = vld [vmem:[#allocation12 + $0x70] ss:$8 sps:$4 sm:$0xff]   ;;  %v2257_v14 = vpop.permute.xlu1 %2256 }
 0x5d9   :  { %2440 = vmatprep.subr.bf16.mxu0 %v7223_v11 }
 0x5da   :  { %6777 = vmatmul.mubr.bf16.gmra.mrb[68].mxu1 %v1650_v13  ;;  %v6716_v31 = vpop.f32.mrb[60].mxu1  ;;  %v6820_v27 = vpop.f32.mrb[90].mxu0  ;;  %v7227_v13 = vld [vmem:[#allocation12 + $0x60] ss:$8 sps:$4 sm:$0xff]  }
 0x5db   :  { %6780 = vmatprep.mubr.msk.bf16.mxu1 %vm7905_vm0, %v7904_v1  ;;  %6832 = vmatpush3.bf16.msra.mxu1 %v7203_v32  ;;  %v1630_v33 = vpop.f32.mrb[61].mxu1  ;;  %v2020_v38 = vpop.f32.mrb[91].mxu0 }
 0x5dc   :  { %6833 = vmatprep.subr.bf16.mxu1 %v7904_v1  ;;  %v1652_v7 = vpack.c.bf16 %v6716_v31, %v1630_v33  ;;  %v2051_v42 = vpack.c.bf16 %v6820_v27, %v2020_v38  ;;  %2441 = vmatpush1.bf16.msra.mxu0 %v7221_v23 }
 0x5dd   :  { %2442 = vmatprep.subr.bf16.mxu0 %v7226_v25 }
 0x5de   :  { %v6719_v43 = vpop.f32.mrb[62].mxu1  ;;  %v6823_v44 = vpop.f32.mrb[92].mxu0 }
 0x5df   :  { %6834 = vmatpush3.bf16.msra.mxu1 %v7204_v16  ;;  %v1640_v46 = vpop.f32.mrb[63].mxu1  ;;  %v2030_v47 = vpop.f32.mrb[93].mxu0 }
 0x5e0   :  { %6835 = vmatprep.subr.bf16.mxu1 %v7904_v1  ;;  %v1653_v48 = vpack.c.bf16 %v6719_v43, %v1640_v46  ;;  %v2052_v49 = vpack.c.bf16 %v6823_v44, %v2030_v47  ;;  %2443 = vmatpush1.bf16.msra.mxu0 %v7224_v29  ;;  %v2252_v29 = vpop.permute.xlu0 %2251 }
 0x5e1   :  { %2444 = vmatprep.subr.bf16.mxu0 %v7229_v26 }
 0x5e2   :  { %6781 = vmatmul.mubr.bf16.gmra.mrb[72].mxu1 %v1651_v34  ;;  %v6826_v51 = vpop.f32.mrb[94].mxu0 }
 0x5e3   :  { %6784 = vmatprep.mubr.msk.bf16.mxu1 %vm7905_vm0, %v7904_v1  ;;  %6836 = vmatpush3.bf16.msra.mxu1 %v7205_v45  ;;  %v2040_v55 = vpop.f32.mrb[95].mxu0 }
 0x5e4   :  { %6837 = vmatprep.subr.bf16.mxu1 %v7904_v1  ;;  %v2053_v57 = vpack.c.bf16 %v6826_v51, %v2040_v55  ;;  %2445 = vmatpush1.bf16.msra.mxu0 %v7227_v13 }
 0x5e7   :  { %6838 = vmatpush3.bf16.msra.mxu1 %v7206_v53 }
 0x5e8   :  { %6839 = vmatprep.subr.bf16.mxu1 %v7904_v1 }
 0x5ea   :  { %6785 = vmatmul.mubr.bf16.gmra.mrb[76].mxu1 %v1652_v7 }
 0x5eb   :  { %6788 = vmatprep.mubr.msk.bf16.mxu1 %vm7905_vm0, %v7904_v1  ;;  %6840 = vmatpush3.bf16.msra.mxu1 %v7207_v59 }
 0x5ec   :  { %6841 = vmatprep.subr.bf16.mxu1 %v7904_v1 }
 0x5ef   :  { %6842 = vmatpush3.bf16.msra.mxu1 %v7208_v37  ;;  %v9106_v37 = vld [vmem:[#allocation10] ss:$0 sm:$0xff] }
 0x5f2   :  { %6789 = vmatmul.mubr.bf16.gmra.mrb[80].mxu1 %v1653_v48 }
 0x5f3   :  { %6843 = vmatprep.mubr.msk.bf16.mxu1 %vm7905_vm0, %v7904_v1 }
 0x5fa   :  { %6844 = vmatmul.mubr.bf16.vlgmr.msra.gmra.mrb[84].mxu1 %v2049_v63  ;;  %v7232_v63 = vld [vmem:[#allocation12 + $0x74] ss:$8 sps:$4 sm:$0xff]  }
 0x5fb   :  { %6847 = vmatprep.mubr.msk.bf16.mxu1 %vm7905_vm0, %v7904_v1  ;;  %2446 = vmatprep.subr.bf16.mxu0 %v7232_v63 }
 0x5fc   :  { %2447 = vmatpush1.bf16.msra.mxu0 %v7230_v30 }
 0x602   :  { %6848 = vmatmul.mubr.bf16.gmra.mrb[88].mxu1 %v2050_v28 }
 0x603   :  { %6851 = vmatprep.mubr.msk.bf16.mxu1 %vm7905_vm0, %v7904_v1 }
 0x60a   :  { %6852 = vmatmul.mubr.bf16.gmra.mrb[92].mxu1 %v2051_v42 }
 0x60b   :  { %6855 = vmatprep.mubr.msk.bf16.mxu1 %vm7905_vm0, %v7904_v1 }
 0x612   :  { %6856 = vmatmul.mubr.bf16.gmra.mrb[96].mxu1 %v2052_v49 }
 0x613   :  { %6859 = vmatprep.mubr.msk.bf16.mxu1 %vm7905_vm0, %v7904_v1 }
 0x61a   :  { %6860 = vmatmul.mubr.bf16.gmra.mrb[100].mxu1 %v2053_v57 }
 0x61b   :  { %2669 = vmatprep.mubr.f32.mxu1 %v7904_v1 }
 0x6a5   :  { %v1895_v17 = vpop.f32.mrb[64].mxu1 }
 0x6a6   :  { %v1896_v22 = vadd.f32 %v1895_v17, %v9018_v50  ;;  %v6774_v32 = vpop.f32.mrb[65].mxu1 }
 0x6a7   :  { %v1898_v19 = vpop.f32.mrb[66].mxu1 }
 0x6a8   :  { %v1899_v34 = vadd.f32 %v1898_v19, %v9020_v52  ;;  %v6775_v28 = vpop.f32.mrb[67].mxu1 }
 0x6ad   :  { %v1903_v31 = vpop.f32.mrb[68].mxu1 }
 0x6ae   :  { %v1904_v27 = vadd.f32 %v1903_v31, %v9022_v54  ;;  %v6778_v33 = vpop.f32.mrb[69].mxu1  ;;  %v2267_v31 = vpop.permute.xlu1 %2266 }
 0x6af   :  { %v1906_v16 = vpop.f32.mrb[70].mxu1 }
 0x6b0   :  { %v1907_v38 = vadd.f32 %v1906_v16, %v9024_v56  ;;  %v6779_v7 = vpop.f32.mrb[71].mxu1 }
 0x6b1   :  { %v2262_v7 = vpop.permute.xlu0 %2261 }
 0x6b5   :  { %v1911_v42 = vpop.f32.mrb[72].mxu1 }
 0x6b6   :  { %v1912_v43 = vadd.f32 %v1911_v42, %v9026_v58  ;;  %v6782_v44 = vpop.f32.mrb[73].mxu1 }
 0x6b7   :  { %v1914_v45 = vpop.f32.mrb[74].mxu1 }
 0x6b8   :  { %v1915_v50 = vadd.f32 %v1914_v45, %v9028_v60  ;;  %v6783_v46 = vpop.f32.mrb[75].mxu1 }
 0x6bd   :  { %v1919_v47 = vpop.f32.mrb[76].mxu1 }
 0x6be   :  { %v9095_v52 = vadd.f32 %v1919_v47, %v9030_v24  ;;  %v6786_v48 = vpop.f32.mrb[77].mxu1 }
 0x6bf   :  { %v1922_v49 = vpop.f32.mrb[78].mxu1 }
 0x6c0   :  { %v9098_v54 = vadd.f32 %v1922_v49, %v9032_v62  ;;  %v6787_v51 = vpop.f32.mrb[79].mxu1 }
 0x6c5   :  { %v1927_v56 = vpop.f32.mrb[80].mxu1 }
 0x6c6   :  { %v9101_v53 = vadd.f32 %v1927_v56, %v9034_v4  ;;  %v6790_v58 = vpop.f32.mrb[81].mxu1 }
 0x6c7   :  { %v1930_v55 = vpop.f32.mrb[82].mxu1 }
 0x6c8   :  { %v9104_v57 = vadd.f32 %v1930_v55, %v9036_v2  ;;  %v6791_v60 = vpop.f32.mrb[83].mxu1 }
 0x6c9   :  { %v2272_v60 = vpop.permute.xlu0 %2271 }
 0x6cd   :  { %v2153_v59 = vpop.f32.mrb[84].mxu1 }
 0x6ce   :  { %v2192_v24 = vadd.f32 %v2153_v59, %v1896_v22  ;;  %v6845_v41 = vpop.f32.mrb[85].mxu1 }
 0x6cf   :  { %v2156_v3 = vpop.f32.mrb[86].mxu1 }
 0x6d0   :  { %v2209_v62 = vadd.f32 %v9106_v37, %v2192_v24  ;;  %v2193_v61 = vadd.f32 %v2156_v3, %v1899_v34  ;;  %v6846_v8 = vpop.f32.mrb[87].mxu1 }
 0x6d2   :  { %v2219_v40 = vadd.f32 %v2209_v62, %v8890_v18  ;;  %v2210_v4 = vadd.f32 %v9106_v37, %v2193_v61 }
 0x6d4   :  { %v2229_v12 = vmax.f32 %v2219_v40, 0.0  ;;  %v2220_v9 = vadd.f32 %v2210_v4, %v8892_v20 }
 0x6d5   :  { %v2161_v2 = vpop.f32.mrb[88].mxu1 }
 0x6d6   :  { %v2230_v11 = vmax.f32 %v2220_v9, 0.0  ;;  %v2194_v23 = vadd.f32 %v2161_v2, %v1904_v27  ;;  %v6849_v25 = vpop.f32.mrb[89].mxu1  ;;  %v2299_v13 = vmul.f32 %v2252_v29, %v2229_v12 }
 0x6d7   :  { %v2164_v26 = vpop.f32.mrb[90].mxu1 }
 0x6d8   :  { %v2300_v63 = vmul.f32 %v2257_v14, %v2230_v11  ;;  %v2211_v30 = vadd.f32 %v9106_v37, %v2194_v23  ;;  %v2195_v17 = vadd.f32 %v2164_v26, %v1907_v38  ;;  %v6850_v22 = vpop.f32.mrb[91].mxu1  ;;  %v2282_v14 = vpop.permute.xlu0 %2281 }
 0x6da   :  { %v2319_v32 = vpack.c.bf16 %v2300_v63, %v2299_v13  ;;  %v2221_v18 = vadd.f32 %v2211_v30, %v8902_v35  ;;  %v2212_v19 = vadd.f32 %v9106_v37, %v2195_v17 }
 0x6dc   :  { %v2231_v34 = vmax.f32 %v2221_v18, 0.0  ;;  %v2222_v20 = vadd.f32 %v2212_v19, %v8904_v10  ;;  %2465 = vmatmul.mubr.bf16.vlgmr.msra.gmra.mrb[96].mxu0 %v2319_v32  ;;  %v2292_v32 = vpop.permute.xlu0 %2291 }
 0x6dd   :  { %v2169_v28 = vpop.f32.mrb[92].mxu1  ;;  %2474 = vmatprep.mubr.bf16.mxu0 %v7903_v0 }
 0x6de   :  { %v2232_v27 = vmax.f32 %v2222_v20, 0.0  ;;  %v2196_v33 = vadd.f32 %v2169_v28, %v1912_v43  ;;  %v6853_v16 = vpop.f32.mrb[93].mxu1  ;;  %v2301_v35 = vmul.f32 %v2262_v7, %v2231_v34  ;;  %v2277_v43 = vpop.permute.xlu1 %2276  ;;  %v2342_v34 = vlaneseq }
 0x6df   :  { %v2172_v42 = vpop.f32.mrb[94].mxu1 }
 0x6e0   :  { %v2213_v38 = vadd.f32 %v9106_v37, %v2196_v33  ;;  %v2197_v44 = vadd.f32 %v2172_v42, %v1915_v50  ;;  %v6854_v45 = vpop.f32.mrb[95].mxu1  ;;  %v2302_v46 = vmul.f32 %v2267_v31, %v2232_v27  ;;  %v2343_v20 = vshrl.u32 %v2342_v34, 7 }
 0x6e2   :  { %v2223_v47 = vadd.f32 %v2213_v38, %v8914_v6  ;;  %v2214_v10 = vadd.f32 %v9106_v37, %v2197_v44  ;;  %v2320_v48 = vpack.c.bf16 %v2302_v46, %v2301_v35  ;;  %v2287_v12 = vpop.permute.xlu1 %2286  ;;  %v9136_v28 = vsub.s32 0, %v2343_v20 }
 0x6e4   :  { %v2233_v49 = vmax.f32 %v2223_v47, 0.0  ;;  %v2224_v51 = vadd.f32 %v2214_v10, %v8916_v39  ;;  %2475 = vmatmul.mubr.bf16.gmra.mrb[100].mxu0 %v2320_v48  ;;  %v2538_v10 = vpop.permute.xlu0 %2537 }
 0x6e5   :  { %v2177_v56 = vpop.f32.mrb[96].mxu1  ;;  %2484 = vmatprep.mubr.bf16.mxu0 %v7903_v0 }
 0x6e6   :  { %v2234_v58 = vmax.f32 %v2224_v51, 0.0  ;;  %v2198_v55 = vadd.f32 %v2177_v56, %v9095_v52  ;;  %v6857_v50 = vpop.f32.mrb[97].mxu1  ;;  %v2303_v3 = vmul.f32 %v2272_v60, %v2233_v49  ;;  %v2297_v22 = vpop.permute.xlu1 %2296 }
 0x6e7   :  { %v2180_v59 = vpop.f32.mrb[98].mxu1 }
 0x6e8   :  { %v2215_v24 = vadd.f32 %v9106_v37, %v2198_v55  ;;  %v2199_v6 = vadd.f32 %v2180_v59, %v9098_v54  ;;  %v6858_v41 = vpop.f32.mrb[99].mxu1  ;;  %v2304_v62 = vmul.f32 %v2277_v43, %v2234_v58 }
 0x6ea   :  { %v2225_v39 = vadd.f32 %v2215_v24, %v8926_v15  ;;  %v2216_v61 = vadd.f32 %v9106_v37, %v2199_v6  ;;  %v2321_v8 = vpack.c.bf16 %v2304_v62, %v2303_v3  ;;  %v2543_v47 = vpop.permute.xlu1 %2542 }
 0x6ec   :  { %v2235_v40 = vmax.f32 %v2225_v39, 0.0  ;;  %v2226_v4 = vadd.f32 %v2216_v61, %v8928_v5  ;;  %2485 = vmatmul.mubr.bf16.gmra.mrb[104].mxu0 %v2321_v8 }
 0x6ed   :  { %v2185_v52 = vpop.f32.mrb[100].mxu1  ;;  %2494 = vmatprep.mubr.bf16.mxu0 %v7903_v0 }
 0x6ee   :  { %v2236_v9 = vmax.f32 %v2226_v4, 0.0  ;;  %v2200_v2 = vadd.f32 %v2185_v52, %v9101_v53  ;;  %v6861_v54 = vpop.f32.mrb[101].mxu1  ;;  %v2305_v29 = vmul.f32 %v2282_v14, %v2235_v40  ;;  %v2553_v40 = vpop.permute.xlu1 %2552 }
 0x6ef   :  { %v2188_v11 = vpop.f32.mrb[102].mxu1  ;;  %v2548_v4 = vpop.permute.xlu0 %2547 }
 0x6f0   :  { %v2217_v23 = vadd.f32 %v9106_v37, %v2200_v2  ;;  %v2201_v15 = vadd.f32 %v2188_v11, %v9104_v57  ;;  %v6862_v25 = vpop.f32.mrb[103].mxu1  ;;  %v2306_v26 = vmul.f32 %v2287_v12, %v2236_v9 }
 0x6f2   :  { %v2227_v5 = vadd.f32 %v2217_v23, %v8938_v36  ;;  %v2218_v13 = vadd.f32 %v9106_v37, %v2201_v15  ;;  %v2322_v63 = vpack.c.bf16 %v2306_v26, %v2305_v29  ;;  %v2340_v36 = vld [vmem:[#allocation13] sm:$0x3]  ;;  %v9138_v37 = vsub.s32 1, %v2343_v20 }
 0x6f3   :  { %v9141_v31 = vrot.slane %v2340_v36, %v9136_v28 }
 0x6f4   :  { %v2237_v30 = vmax.f32 %v2227_v5, 0.0  ;;  %v2228_v17 = vadd.f32 %v2218_v13, %v8940_v21  ;;  %2495 = vmatmul.mubr.bf16.gmra.mrb[108].mxu0 %v2322_v63  ;;  %v9144_v21 = vrot.slane %v2340_v36, %v9138_v37 }
 0x6f5   :  { %2504 = vmatprep.mubr.bf16.mxu0 %v7903_v0 }
 0x6f6   :  { %v2238_v53 = vmax.f32 %v2228_v17, 0.0  ;;  %v2307_v18 = vmul.f32 %v2292_v32, %v2237_v30  ;;  %v2558_v32 = vpop.permute.xlu0 %2557 }
 0x6f8   :  { %v2308_v19 = vmul.f32 %v2297_v22, %v2238_v53  ;;  %v2563_v22 = vpop.permute.xlu1 %2562 }
 0x6fa   :  { %v2323_v57 = vpack.c.bf16 %v2308_v19, %v2307_v18 }
 0x6fc   :  { %2505 = vmatmul.mubr.bf16.gmra.mrb[112].mxu0 %v2323_v57 }
 0x7af   :  { %v2466_v0 = vpop.f32.mrb[96].mxu0 }
 0x7b0   :  { %v2467_v27 = vadd.f32 %v2466_v0, %v9141_v31  ;;  %v2468_v33 = vpop.f32.mrb[97].mxu0 }
 0x7b1   :  { %v2469_v16 = vadd.f32 %v2468_v33, %v9144_v21  ;;  %v2470_v7 = vpop.f32.mrb[98].mxu0 }
 0x7b2   :  { %v2515_v42 = vmax.f32 %v2467_v27, 0.0  ;;  %v2471_v38 = vadd.f32 %v2470_v7, %v9141_v31  ;;  %v2472_v44 = vpop.f32.mrb[99].mxu0 }
 0x7b3   :  { %v2516_v45 = vmax.f32 %v2469_v16, 0.0  ;;  %v2473_v35 = vadd.f32 %v2472_v44, %v9144_v21 }
 0x7b4   :  { %v2517_v46 = vmax.f32 %v2471_v38, 0.0  ;;  %v2585_v49 = vmul.f32 %v2538_v10, %v2515_v42 }
 0x7b5   :  { %v2518_v48 = vmax.f32 %v2473_v35, 0.0  ;;  %v2586_v56 = vmul.f32 %v2538_v10, %v2516_v45  ;;  %v2573_v10 = vpop.permute.xlu1 %2572 }
 0x7b6   :  { %v2587_v51 = vmul.f32 %v2543_v47, %v2517_v46 }
 0x7b7   :  { %v2588_v43 = vmul.f32 %v2543_v47, %v2518_v48  ;;  %v2476_v58 = vpop.f32.mrb[100].mxu0  ;;  %v2568_v48 = vpop.permute.xlu0 %2567 }
 0x7b8   :  { %v9150_v55 = vpack.c.bf16 %v2587_v51, %v2585_v49  ;;  %v2477_v50 = vadd.f32 %v2476_v58, %v9141_v31  ;;  %v2478_v60 = vpop.f32.mrb[101].mxu0 }
 0x7b9   :  { %v2479_v59 = vadd.f32 %v2478_v60, %v9144_v21  ;;  %v2480_v24 = vpop.f32.mrb[102].mxu0  ;;  %v9154_v6 = vpack.c.bf16 %v2588_v43, %v2586_v56 }
 0x7ba   :  { %v2519_v41 = vmax.f32 %v2477_v50, 0.0  ;;  %v2481_v3 = vadd.f32 %v2480_v24, %v9141_v31  ;;  %v2482_v62 = vpop.f32.mrb[103].mxu0 }
 0x7bb   :  { %v2520_v39 = vmax.f32 %v2479_v59, 0.0  ;;  %v2483_v61 = vadd.f32 %v2482_v62, %v9144_v21  ;;  %6944 = vmatprep.subr.bf16.mxu1 %v9154_v6 }
 0x7bc   :  { %v2521_v8 = vmax.f32 %v2481_v3, 0.0  ;;  %6946 = vmatpush1.bf16.msra.mxu1 %v9150_v55  ;;  %v2589_v12 = vmul.f32 %v2548_v4, %v2519_v41 }
 0x7bd   :  { %v2522_v52 = vmax.f32 %v2483_v61, 0.0  ;;  %v2590_v2 = vmul.f32 %v2548_v4, %v2520_v39 }
 0x7be   :  { %v2591_v9 = vmul.f32 %v2553_v40, %v2521_v8 }
 0x7bf   :  { %v2592_v54 = vmul.f32 %v2553_v40, %v2522_v52  ;;  %v2486_v14 = vpop.f32.mrb[104].mxu0 }
 0x7c0   :  { %v9160_v11 = vpack.c.bf16 %v2591_v9, %v2589_v12  ;;  %v2487_v23 = vadd.f32 %v2486_v14, %v9141_v31  ;;  %v2488_v15 = vpop.f32.mrb[105].mxu0  ;;  %v2583_v12 = vpop.permute.xlu1 %2582 }
 0x7c1   :  { %v2489_v25 = vadd.f32 %v2488_v15, %v9144_v21  ;;  %v2490_v29 = vpop.f32.mrb[106].mxu0  ;;  %v9164_v26 = vpack.c.bf16 %v2592_v54, %v2590_v2  ;;  %v2578_v9 = vpop.permute.xlu0 %2577 }
 0x7c2   :  { %v2523_v5 = vmax.f32 %v2487_v23, 0.0  ;;  %v2491_v13 = vadd.f32 %v2490_v29, %v9141_v31  ;;  %v2492_v63 = vpop.f32.mrb[107].mxu0 }
 0x7c3   :  { %v2524_v30 = vmax.f32 %v2489_v25, 0.0  ;;  %v2493_v17 = vadd.f32 %v2492_v63, %v9144_v21  ;;  %6948 = vmatprep.subr.bf16.mxu1 %v9164_v26  ;;  %v7236_v63 = vld [vmem:[%s10457_s17 + $0x110] ss:$8 sps:$4 sm:$0xff]  }
 0x7c4   :  { %v2525_v53 = vmax.f32 %v2491_v13, 0.0  ;;  %6950 = vmatpush1.bf16.msra.mxu1 %v9160_v11  ;;  %v2593_v19 = vmul.f32 %v2558_v32, %v2523_v5  ;;  %v7238_v5 = vld [vmem:[%s10457_s17 + $0x114] ss:$8 sps:$4 sm:$0xff]   ;;  %v7569_v13 = vld [vmem:[%s10506_s0] sm:$0xff] }
 0x7c5   :  { %v2526_v18 = vmax.f32 %v2493_v17, 0.0  ;;  %v2594_v34 = vmul.f32 %v2558_v32, %v2524_v30  ;;  %v7241_v30 = vld [vmem:[%s10457_s17 + $0x124] ss:$8 sps:$4 sm:$0xff]   ;;  %v7571_v32 = vld [vmem:[%s10506_s0 + $0x10] sm:$0xff] }
 0x7c6   :  { %v2595_v57 = vmul.f32 %v2563_v22, %v2525_v53  ;;  %v7570_v17 = vld [vmem:[%s10506_s0 + $0x8] sm:$0xff] }
 0x7c7   :  { %v2596_v20 = vmul.f32 %v2563_v22, %v2526_v18  ;;  %v2496_v36 = vpop.f32.mrb[108].mxu0  ;;  %v7239_v53 = vld [vmem:[%s10457_s17 + $0x120] ss:$8 sps:$4 sm:$0xff]   ;;  %v7244_v22 = vld [vmem:[%s10457_s17 + $0x134] ss:$8 sps:$4 sm:$0xff]  }
 0x7c8   :  { %v9170_v0 = vpack.c.bf16 %v2595_v57, %v2593_v19  ;;  %v2497_v27 = vadd.f32 %v2496_v36, %v9141_v31  ;;  %v2498_v33 = vpop.f32.mrb[109].mxu0  ;;  %v7242_v18 = vld [vmem:[%s10457_s17 + $0x130] ss:$8 sps:$4 sm:$0xff]   ;;  %v7247_v19 = vld [vmem:[%s10457_s17 + $0x144] ss:$8 sps:$4 sm:$0xff]  }
 0x7c9   :  { %v2499_v16 = vadd.f32 %v2498_v33, %v9144_v21  ;;  %v2500_v7 = vpop.f32.mrb[110].mxu0  ;;  %v9174_v42 = vpack.c.bf16 %v2596_v20, %v2594_v34  ;;  %v7572_v57 = vld [vmem:[%s10506_s0 + $0x18] sm:$0xff]  ;;  %v7281_v34 = vld [vmem:[%s10457_s17] ss:$8 sps:$4 sm:$0xff]   ;;  %v7283_v20 = vld [vmem:[%s10457_s17 + $0x4] ss:$8 sps:$4 sm:$0xff]  }
 0x7ca   :  { %v2527_v38 = vmax.f32 %v2497_v27, 0.0  ;;  %v2501_v44 = vadd.f32 %v2500_v7, %v9141_v31  ;;  %v2502_v45 = vpop.f32.mrb[111].mxu0  ;;  %v7245_v36 = vld [vmem:[%s10457_s17 + $0x140] ss:$8 sps:$4 sm:$0xff]   ;;  %v7286_v27 = vld [vmem:[%s10457_s17 + $0x14] ss:$8 sps:$4 sm:$0xff]   ;;  %3218 = vmatprep.subr.bf16.mxu0 %v7283_v20 }
 0x7cb   :  { %v2528_v35 = vmax.f32 %v2499_v16, 0.0  ;;  %v2503_v46 = vadd.f32 %v2502_v45, %v9144_v21  ;;  %6952 = vmatprep.subr.bf16.mxu1 %v9174_v42  ;;  %v7250_v33 = vld [vmem:[%s10457_s17 + $0x154] ss:$8 sps:$4 sm:$0xff]   ;;  %3219 = vmatpush1.bf16.msra.mxu0 %v7281_v34  ;;  %v7284_v16 = vld [vmem:[%s10457_s17 + $0x10] ss:$8 sps:$4 sm:$0xff]   ;;  %v7573_v7 = vld [vmem:[%s10506_s0 + $0x20] sm:$0xff] }
 0x7cc   :  { %v2529_v47 = vmax.f32 %v2501_v44, 0.0  ;;  %6954 = vmatpush1.bf16.msra.mxu1 %v9170_v0  ;;  %v2597_v51 = vmul.f32 %v2568_v48, %v2527_v38  ;;  %3220 = vmatprep.subr.bf16.mxu0 %v7286_v27  ;;  %v7289_v38 = vld [vmem:[%s10457_s17 + $0x24] ss:$8 sps:$4 sm:$0xff]   ;;  %v7248_v44 = vld [vmem:[%s10457_s17 + $0x150] ss:$8 sps:$4 sm:$0xff]  }
 0x7cd   :  { %v2530_v49 = vmax.f32 %v2503_v46, 0.0  ;;  %v2598_v43 = vmul.f32 %v2568_v48, %v2528_v35  ;;  %v7253_v45 = vld [vmem:[%s10457_s17 + $0x164] ss:$8 sps:$4 sm:$0xff]   ;;  %v7287_v35 = vld [vmem:[%s10457_s17 + $0x20] ss:$8 sps:$4 sm:$0xff]  }
 0x7ce   :  { %v2599_v56 = vmul.f32 %v2573_v10, %v2529_v47  ;;  %v7574_v46 = vld [vmem:[%s10506_s0 + $0x28] sm:$0xff]  ;;  %v7292_v47 = vld [vmem:[%s10457_s17 + $0x34] ss:$8 sps:$4 sm:$0xff]   ;;  %v7314_v34 = vld [vmem:[%s10457_s17 + $0xb0] ss:$8 sps:$4 sm:$0xff]  }
 0x7cf   :  { %v2600_v58 = vmul.f32 %v2573_v10, %v2530_v49  ;;  %v2506_v50 = vpop.f32.mrb[112].mxu0  ;;  %3221 = vmatpush1.bf16.msra.mxu0 %v7284_v16  ;;  %v7251_v10 = vld [vmem:[%s10457_s17 + $0x160] ss:$8 sps:$4 sm:$0xff]   ;;  %v7256_v48 = vld [vmem:[%s10457_s17 + $0x174] ss:$8 sps:$4 sm:$0xff]  }
 0x7d0   :  { %v9180_v60 = vpack.c.bf16 %v2599_v56, %v2597_v51  ;;  %v2507_v59 = vadd.f32 %v2506_v50, %v9141_v31  ;;  %v2508_v24 = vpop.f32.mrb[113].mxu0  ;;  %3222 = vmatprep.subr.bf16.mxu0 %v7289_v38  ;;  %v7290_v49 = vld [vmem:[%s10457_s17 + $0x30] ss:$8 sps:$4 sm:$0xff]   ;;  %v7295_v56 = vld [vmem:[%s10457_s17 + $0x44] ss:$8 sps:$4 sm:$0xff]  }
 0x7d1   :  { %v2509_v41 = vadd.f32 %v2508_v24, %v9144_v21  ;;  %v2510_v3 = vpop.f32.mrb[114].mxu0  ;;  %v9184_v62 = vpack.c.bf16 %v2600_v58, %v2598_v43  ;;  %v7575_v51 = vld [vmem:[%s10506_s0 + $0x30] sm:$0xff]  ;;  %v7259_v58 = vld [vmem:[%s10457_s17 + $0x184] ss:$8 sps:$4 sm:$0xff]   ;;  %v7293_v50 = vld [vmem:[%s10457_s17 + $0x40] ss:$8 sps:$4 sm:$0xff]  }
 0x7d2   :  { %v2531_v39 = vmax.f32 %v2507_v59, 0.0  ;;  %v2511_v61 = vadd.f32 %v2510_v3, %v9141_v31  ;;  %v2512_v8 = vpop.f32.mrb[115].mxu0  ;;  %v7235_v31 = vld [vmem:[%s10457_s17 + $0x104] ss:$8 sps:$4 sm:$0xff]   ;;  %v7254_v43 = vld [vmem:[%s10457_s17 + $0x170] ss:$8 sps:$4 sm:$0xff]  }
 0x7d3   :  { %v2532_v40 = vmax.f32 %v2509_v41, 0.0  ;;  %v2513_v4 = vadd.f32 %v2512_v8, %v9144_v21  ;;  %6956 = vmatprep.subr.bf16.mxu1 %v9184_v62  ;;  %v7233_v21 = vld [vmem:[%s10457_s17 + $0x100] ss:$8 sps:$4 sm:$0xff]   ;;  %3223 = vmatpush1.bf16.msra.mxu0 %v7287_v35  ;;  %v7576_v59 = vld [vmem:[%s10506_s0 + $0x38] sm:$0xff]  ;;  %v7301_v8 = vld [vmem:[%s10457_s17 + $0x64] ss:$8 sps:$4 sm:$0xff]  }
 0x7d4   :  { %v2533_v52 = vmax.f32 %v2511_v61, 0.0  ;;  %6958 = vmatpush1.bf16.msra.mxu1 %v9180_v60  ;;  %v2601_v54 = vmul.f32 %v2578_v9, %v2531_v39  ;;  %3224 = vmatprep.subr.bf16.mxu0 %v7292_v47  ;;  %v7298_v24 = vld [vmem:[%s10457_s17 + $0x54] ss:$8 sps:$4 sm:$0xff]   ;;  %v7257_v41 = vld [vmem:[%s10457_s17 + $0x180] ss:$8 sps:$4 sm:$0xff]  }
 0x7d5   :  { %v2534_v2 = vmax.f32 %v2513_v4, 0.0  ;;  %v2602_v23 = vmul.f32 %v2578_v9, %v2532_v40  ;;  %v7262_v3 = vld [vmem:[%s10457_s17 + $0x194] ss:$8 sps:$4 sm:$0xff]   ;;  %v7296_v39 = vld [vmem:[%s10457_s17 + $0x50] ss:$8 sps:$4 sm:$0xff]   ;;  %v7577_v61 = vld [vmem:[%s10506_s0 + $0x40] sm:$0xff] }
 0x7d6   :  { %v2603_v14 = vmul.f32 %v2583_v12, %v2533_v52  ;;  %v7260_v40 = vld [vmem:[%s10457_s17 + $0x190] ss:$8 sps:$4 sm:$0xff]   ;;  %v7265_v4 = vld [vmem:[%s10457_s17 + $0x1a4] ss:$8 sps:$4 sm:$0xff]   ;;  %v7299_v52 = vld [vmem:[%s10457_s17 + $0x60] ss:$8 sps:$4 sm:$0xff]  }
 0x7d7   :  { %v2604_v15 = vmul.f32 %v2583_v12, %v2534_v2  ;;  %3225 = vmatpush1.bf16.msra.mxu0 %v7290_v49  ;;  %v7578_v12 = vld [vmem:[%s10506_s0 + $0x48] sm:$0xff]  ;;  %v7304_v9 = vld [vmem:[%s10457_s17 + $0x74] ss:$8 sps:$4 sm:$0xff]   ;;  %v7320_v16 = vld [vmem:[%s10457_s17 + $0xd0] ss:$8 sps:$4 sm:$0xff]  }
 0x7d8   :  { %v9190_v25 = vpack.c.bf16 %v2603_v14, %v2601_v54  ;;  %3226 = vmatprep.subr.bf16.mxu0 %v7295_v56  ;;  %v7263_v2 = vld [vmem:[%s10457_s17 + $0x1a0] ss:$8 sps:$4 sm:$0xff]   ;;  %v7268_v54 = vld [vmem:[%s10457_s17 + $0x1b4] ss:$8 sps:$4 sm:$0xff]   ;;  %v7302_v14 = vld [vmem:[%s10457_s17 + $0x70] ss:$8 sps:$4 sm:$0xff]  }
 0x7d9   :  { %v9192_v29 = vpack.c.bf16 %v2604_v15, %v2602_v23  ;;  %v7307_v23 = vld [vmem:[%s10457_s17 + $0x84] ss:$8 sps:$4 sm:$0xff]   ;;  %v7266_v15 = vld [vmem:[%s10457_s17 + $0x1b0] ss:$8 sps:$4 sm:$0xff]   ;;  %v7317_v27 = vld [vmem:[%s10457_s17 + $0xc0] ss:$8 sps:$4 sm:$0xff]  }
 0x7da   :  { %v7319_v20 = vld [vmem:[%s10457_s17 + $0xc4] ss:$8 sps:$4 sm:$0xff]   ;;  %v7585_v38 = vld [vmem:[#allocation2 + $0x30] sm:$0xff]  ;;  %v7329_v56 = vld [vmem:[%s10457_s17 + $0x200] ss:$8 sps:$4 sm:$0xff]  }
 0x7db   :  { %6960 = vmatprep.subr.bf16.mxu1 %v9192_v29  ;;  %3227 = vmatpush1.bf16.msra.mxu0 %v7293_v50  ;;  %v7588_v35 = vld [vmem:[#allocation2 + $0x48] sm:$0xff] }
 0x7dc   :  { %6962 = vmatpush1.bf16.msra.mxu1 %v9190_v25  ;;  %3228 = vmatprep.subr.bf16.mxu0 %v7298_v24  ;;  %v7337_v24 = vld [vmem:[%s10457_s17 + $0x224] ss:$8 sps:$4 sm:$0xff]  }
 0x7dd   :  { %2975 = vmatprep.subr.bf16.mxu1 %v7235_v31  ;;  %v7271_v31 = vld [vmem:[%s10457_s17 + $0x1c4] ss:$8 sps:$4 sm:$0xff]  }
 0x7df   :  { %5864 = vmatmul.mubr.msk.f32.vlgmr.msra.gmra.mrb[104].mxu1 %vm459_vm2, %v7569_v13  ;;  %3229 = vmatpush1.bf16.msra.mxu0 %v7296_v39  ;;  %v7269_v13 = vld [vmem:[%s10457_s17 + $0x1c0] ss:$8 sps:$4 sm:$0xff]  }
 0x7e0   :  { %2976 = vmatpush1.bf16.msra.mxu1 %v7233_v21  ;;  %2675 = vmatprep.mubr.f32.mxu1 %v7904_v1  ;;  %v7305_v21 = vld [vmem:[%s10457_s17 + $0x80] ss:$8 sps:$4 sm:$0xff]  }
 0x7e1   :  { %2977 = vmatprep.subr.bf16.mxu1 %v7238_v5  ;;  %3230 = vmatprep.subr.bf16.mxu0 %v7301_v8  ;;  %v7310_v5 = vld [vmem:[%s10457_s17 + $0x94] ss:$8 sps:$4 sm:$0xff]   ;;  %v7335_v8 = vld [vmem:[%s10457_s17 + $0x220] ss:$8 sps:$4 sm:$0xff]  }
 0x7e3   :  { %5865 = vmatmul.mubr.msk.f32.gmra.mrb[106].mxu1 %vm459_vm2, %v7570_v17  ;;  %3231 = vmatpush1.bf16.msra.mxu0 %v7299_v52  ;;  %v7313_v17 = vld [vmem:[%s10457_s17 + $0xa4] ss:$8 sps:$4 sm:$0xff]  }
 0x7e4   :  { %2978 = vmatpush1.bf16.msra.mxu1 %v7236_v63  ;;  %2681 = vmatprep.mubr.f32.mxu1 %v7904_v1  ;;  %v7274_v63 = vld [vmem:[%s10457_s17 + $0x1d4] ss:$8 sps:$4 sm:$0xff]  }
 0x7e5   :  { %2979 = vmatprep.subr.bf16.mxu1 %v7241_v30  ;;  %3232 = vmatprep.subr.bf16.mxu0 %v7304_v9  ;;  %v7308_v30 = vld [vmem:[%s10457_s17 + $0x90] ss:$8 sps:$4 sm:$0xff]   ;;  %v7343_v9 = vld [vmem:[%s10457_s17 + $0x244] ss:$8 sps:$4 sm:$0xff]  }
 0x7e7   :  { %5866 = vmatmul.mubr.msk.f32.gmra.mrb[108].mxu1 %vm459_vm2, %v7571_v32  ;;  %3233 = vmatpush1.bf16.msra.mxu0 %v7302_v14  ;;  %v7311_v32 = vld [vmem:[%s10457_s17 + $0xa0] ss:$8 sps:$4 sm:$0xff]  }
 0x7e8   :  { %2980 = vmatpush1.bf16.msra.mxu1 %v7239_v53  ;;  %2687 = vmatprep.mubr.f32.mxu1 %v7904_v1  ;;  %v7272_v53 = vld [vmem:[%s10457_s17 + $0x1d0] ss:$8 sps:$4 sm:$0xff]  }
 0x7e9   :  { %2981 = vmatprep.subr.bf16.mxu1 %v7244_v22  ;;  %3234 = vmatprep.subr.bf16.mxu0 %v7307_v23  ;;  %v7277_v22 = vld [vmem:[%s10457_s17 + $0x1e4] ss:$8 sps:$4 sm:$0xff]  }
 0x7eb   :  { %5867 = vmatmul.mubr.msk.f32.gmra.mrb[110].mxu1 %vm459_vm2, %v7572_v57  ;;  %3235 = vmatpush1.bf16.msra.mxu0 %v7305_v21  ;;  %v7280_v57 = vld [vmem:[%s10457_s17 + $0x1f4] ss:$8 sps:$4 sm:$0xff]  }
 0x7ec   :  { %2982 = vmatpush1.bf16.msra.mxu1 %v7242_v18  ;;  %2693 = vmatprep.mubr.f32.mxu1 %v7904_v1  ;;  %v7316_v18 = vld [vmem:[%s10457_s17 + $0xb4] ss:$8 sps:$4 sm:$0xff]  }
 0x7ed   :  { %2983 = vmatprep.subr.bf16.mxu1 %v7247_v19  ;;  %3236 = vmatprep.subr.bf16.mxu0 %v7310_v5  ;;  %v7275_v19 = vld [vmem:[%s10457_s17 + $0x1e0] ss:$8 sps:$4 sm:$0xff]  }
 0x7ef   :  { %5868 = vmatmul.mubr.msk.f32.gmra.mrb[112].mxu1 %vm459_vm2, %v7573_v7  ;;  %3237 = vmatpush1.bf16.msra.mxu0 %v7308_v30  ;;  %v7584_v7 = vld [vmem:[#allocation2 + $0x28] sm:$0xff] }
 0x7f0   :  { %2984 = vmatpush1.bf16.msra.mxu1 %v7245_v36  ;;  %2699 = vmatprep.mubr.f32.mxu1 %v7904_v1  ;;  %v7278_v36 = vld [vmem:[%s10457_s17 + $0x1f0] ss:$8 sps:$4 sm:$0xff]  }
 0x7f1   :  { %2985 = vmatprep.subr.bf16.mxu1 %v7250_v33  ;;  %3238 = vmatprep.subr.bf16.mxu0 %v7313_v17  ;;  %v7322_v33 = vld [vmem:[%s10457_s17 + $0xd4] ss:$8 sps:$4 sm:$0xff]  }
 0x7f3   :  { %5869 = vmatmul.mubr.msk.f32.gmra.mrb[114].mxu1 %vm459_vm2, %v7574_v46  ;;  %3239 = vmatpush1.bf16.msra.mxu0 %v7311_v32  ;;  %v7347_v32 = vld [vmem:[%s10457_s17 + $0x260] ss:$8 sps:$4 sm:$0xff]  }
 0x7f4   :  { %2986 = vmatpush1.bf16.msra.mxu1 %v7248_v44  ;;  %2705 = vmatprep.mubr.f32.mxu1 %v7904_v1  ;;  %v7586_v44 = vld [vmem:[#allocation2 + $0x38] sm:$0xff] }
 0x7f5   :  { %2987 = vmatprep.subr.bf16.mxu1 %v7253_v45  ;;  %3240 = vmatprep.subr.bf16.mxu0 %v7316_v18  ;;  %v7587_v45 = vld [vmem:[#allocation2 + $0x40] sm:$0xff]  ;;  %v7352_v18 = vld [vmem:[%s10457_s17 + $0x274] ss:$8 sps:$4 sm:$0xff]  }
 0x7f7   :  { %5870 = vmatmul.mubr.msk.f32.gmra.mrb[116].mxu1 %vm459_vm2, %v7575_v51  ;;  %3241 = vmatpush1.bf16.msra.mxu0 %v7314_v34  ;;  %v7350_v34 = vld [vmem:[%s10457_s17 + $0x270] ss:$8 sps:$4 sm:$0xff]  }
 0x7f8   :  { %2988 = vmatpush1.bf16.msra.mxu1 %v7251_v10  ;;  %2711 = vmatprep.mubr.f32.mxu1 %v7904_v1 }
 0x7f9   :  { %2989 = vmatprep.subr.bf16.mxu1 %v7256_v48  ;;  %3242 = vmatprep.subr.bf16.mxu0 %v7319_v20  ;;  %v7355_v20 = vld [vmem:[%s10457_s17 + $0x284] ss:$8 sps:$4 sm:$0xff]  }
 0x7fb   :  { %5871 = vmatmul.mubr.msk.f32.gmra.mrb[118].mxu1 %vm459_vm2, %v7576_v59  ;;  %3243 = vmatpush1.bf16.msra.mxu0 %v7317_v27  ;;  %v7332_v59 = vld [vmem:[%s10457_s17 + $0x210] ss:$8 sps:$4 sm:$0xff]  }
 0x7fc   :  { %2990 = vmatpush1.bf16.msra.mxu1 %v7254_v43  ;;  %2717 = vmatprep.mubr.f32.mxu1 %v7904_v1  ;;  %v7334_v43 = vld [vmem:[%s10457_s17 + $0x214] ss:$8 sps:$4 sm:$0xff]  }
 0x7fd   :  { %2991 = vmatprep.subr.bf16.mxu1 %v7259_v58  ;;  %3244 = vmatprep.subr.bf16.mxu0 %v7322_v33 }
 0x7ff   :  { %5872 = vmatmul.mubr.msk.f32.gmra.mrb[120].mxu1 %vm459_vm2, %v7577_v61  ;;  %3245 = vmatpush1.bf16.msra.mxu0 %v7320_v16 }
 0x800   :  { %2992 = vmatpush1.bf16.msra.mxu1 %v7257_v41  ;;  %2723 = vmatprep.mubr.f32.mxu1 %v7904_v1 }
 0x801   :  { %2993 = vmatprep.subr.bf16.mxu1 %v7262_v3 }
 0x803   :  { %5873 = vmatmul.mubr.msk.f32.gmra.mrb[122].mxu1 %vm459_vm2, %v7578_v12  ;;  %v7338_v12 = vld [vmem:[%s10457_s17 + $0x230] ss:$8 sps:$4 sm:$0xff]  }
 0x804   :  { %2994 = vmatpush1.bf16.msra.mxu1 %v7260_v40  ;;  %3007 = vmatprep.mubr.bf16.mxu1 %v9154_v6  ;;  %v7340_v40 = vld [vmem:[%s10457_s17 + $0x234] ss:$8 sps:$4 sm:$0xff]  }
 0x805   :  { %2995 = vmatprep.subr.bf16.mxu1 %v7265_v4 }
 0x808   :  { %2996 = vmatpush1.bf16.msra.mxu1 %v7263_v2 }
 0x809   :  { %2997 = vmatprep.subr.bf16.mxu1 %v7268_v54 }
 0x80c   :  { %2998 = vmatpush1.bf16.msra.mxu1 %v7266_v15  ;;  %v7341_v15 = vld [vmem:[%s10457_s17 + $0x240] ss:$8 sps:$4 sm:$0xff]  }
 0x80d   :  { %2999 = vmatprep.subr.bf16.mxu1 %v7271_v31  ;;  %v7346_v31 = vld [vmem:[%s10457_s17 + $0x254] ss:$8 sps:$4 sm:$0xff]  }
 0x810   :  { %3000 = vmatpush1.bf16.msra.mxu1 %v7269_v13  ;;  %v7344_v13 = vld [vmem:[%s10457_s17 + $0x250] ss:$8 sps:$4 sm:$0xff]  }
 0x811   :  { %3001 = vmatprep.subr.bf16.mxu1 %v7274_v63  ;;  %v7349_v63 = vld [vmem:[%s10457_s17 + $0x264] ss:$8 sps:$4 sm:$0xff]  }
 0x814   :  { %3002 = vmatpush1.bf16.msra.mxu1 %v7272_v53 }
 0x815   :  { %3003 = vmatprep.subr.bf16.mxu1 %v7277_v22 }
 0x818   :  { %3004 = vmatpush1.bf16.msra.mxu1 %v7275_v19 }
 0x819   :  { %3005 = vmatprep.subr.bf16.mxu1 %v7280_v57 }
 0x81c   :  { %3006 = vmatpush1.bf16.msra.mxu1 %v7278_v36 }
 0x81d   :  { %6964 = vmatprep.subr.bf16.mxu1 %v9154_v6  ;;  %v7323_v6 = vld [vmem:[%s10457_s17 + $0xe0] ss:$8 sps:$4 sm:$0xff]  }
 0x81f   :  { %3008 = vmatmul.mubr.bf16.vlgmr.msra.gmra.mrb[124].mxu1 %v9150_v55 }
 0x820   :  { %3017 = vmatprep.mubr.bf16.mxu1 %v9164_v26  ;;  %6966 = vmatpush1.bf16.msra.mxu1 %v9150_v55  ;;  %v7325_v55 = vld [vmem:[%s10457_s17 + $0xe4] ss:$8 sps:$4 sm:$0xff]  }
 0x821   :  { %6968 = vmatprep.subr.bf16.mxu1 %v9164_v26  ;;  %3246 = vmatprep.subr.bf16.mxu0 %v7325_v55  ;;  %v7326_v26 = vld [vmem:[%s10457_s17 + $0xf0] ss:$8 sps:$4 sm:$0xff]   ;;  %v7353_v55 = vld [vmem:[%s10457_s17 + $0x280] ss:$8 sps:$4 sm:$0xff]  }
 0x822   :  { %3247 = vmatpush1.bf16.msra.mxu0 %v7323_v6  ;;  %v7358_v6 = vld [vmem:[%s10457_s17 + $0x294] ss:$8 sps:$4 sm:$0xff]  }
 0x824   :  { %6970 = vmatpush1.bf16.msra.mxu1 %v9160_v11 }
 0x825   :  { %6972 = vmatprep.subr.bf16.mxu1 %v9174_v42 }
 0x827   :  { %3018 = vmatmul.mubr.bf16.gmra.mrb[128].mxu1 %v9160_v11  ;;  %v7328_v11 = vld [vmem:[%s10457_s17 + $0xf4] ss:$8 sps:$4 sm:$0xff]  }
 0x828   :  { %3027 = vmatprep.mubr.bf16.mxu1 %v9174_v42  ;;  %6974 = vmatpush1.bf16.msra.mxu1 %v9170_v0  ;;  %v7580_v42 = vld [vmem:[#allocation2 + $0x8] sm:$0xff] }
 0x829   :  { %6976 = vmatprep.subr.bf16.mxu1 %v9184_v62  ;;  %3248 = vmatprep.subr.bf16.mxu0 %v7328_v11  ;;  %v7356_v11 = vld [vmem:[%s10457_s17 + $0x290] ss:$8 sps:$4 sm:$0xff]  }
 0x82a   :  { %3249 = vmatpush1.bf16.msra.mxu0 %v7326_v26  ;;  %v7361_v26 = vld [vmem:[%s10457_s17 + $0x2a4] ss:$8 sps:$4 sm:$0xff]  }
 0x82c   :  { %6978 = vmatpush1.bf16.msra.mxu1 %v9180_v60 }
 0x82d   :  { %6980 = vmatprep.subr.bf16.mxu1 %v9192_v29 }
 0x82f   :  { %3028 = vmatmul.mubr.bf16.gmra.mrb[132].mxu1 %v9170_v0  ;;  %v7579_v0 = vld [vmem:[#allocation2] sm:$0xff] }
 0x830   :  { %3037 = vmatprep.mubr.bf16.mxu1 %v9184_v62  ;;  %6982 = vmatpush1.bf16.msra.mxu1 %v9190_v25  ;;  %v7331_v62 = vld [vmem:[%s10457_s17 + $0x204] ss:$8 sps:$4 sm:$0xff]  }
 0x831   :  { %3629 = vmatprep.subr.bf16.mxu0 %v7331_v62  ;;  %v7367_v62 = vld [vmem:[%s10457_s17 + $0x2c4] ss:$8 sps:$4 sm:$0xff]  }
 0x837   :  { %3038 = vmatmul.mubr.bf16.gmra.mrb[136].mxu1 %v9180_v60  ;;  %v7581_v60 = vld [vmem:[#allocation2 + $0x10] sm:$0xff] }
 0x838   :  { %3047 = vmatprep.mubr.bf16.mxu1 %v9192_v29  ;;  %v7583_v29 = vld [vmem:[#allocation2 + $0x20] sm:$0xff] }
 0x83f   :  { %3048 = vmatmul.mubr.bf16.gmra.mrb[140].mxu1 %v9190_v25  ;;  %v7582_v25 = vld [vmem:[#allocation2 + $0x18] sm:$0xff] }
 0x840   :  { %3365 = vmatprep.mubr.f32.mxu1 %v7904_v1 }
 0x847   :  { %5970 = vmatmul.mubr.msk.f32.vlgmr.msra.gmra.mrb[144].mxu1 %vm459_vm2, %v7579_v0  ;;  %v7359_v0 = vld [vmem:[%s10457_s17 + $0x2a0] ss:$8 sps:$4 sm:$0xff]  }
 0x848   :  { %3371 = vmatprep.mubr.f32.mxu1 %v7904_v1 }
 0x84b   :  { %5971 = vmatmul.mubr.msk.f32.gmra.mrb[146].mxu1 %vm459_vm2, %v7580_v42  ;;  %v7364_v42 = vld [vmem:[%s10457_s17 + $0x2b4] ss:$8 sps:$4 sm:$0xff]  }
 0x84c   :  { %3377 = vmatprep.mubr.f32.mxu1 %v7904_v1 }
 0x84f   :  { %5972 = vmatmul.mubr.msk.f32.gmra.mrb[148].mxu1 %vm459_vm2, %v7581_v60  ;;  %v7362_v60 = vld [vmem:[%s10457_s17 + $0x2b0] ss:$8 sps:$4 sm:$0xff]  }
 0x850   :  { %3383 = vmatprep.mubr.f32.mxu1 %v7904_v1 }
 0x853   :  { %5973 = vmatmul.mubr.msk.f32.gmra.mrb[150].mxu1 %vm459_vm2, %v7582_v25  ;;  %v7365_v25 = vld [vmem:[%s10457_s17 + $0x2c0] ss:$8 sps:$4 sm:$0xff]  }
 0x854   :  { %3389 = vmatprep.mubr.f32.mxu1 %v7904_v1 }
 0x857   :  { %5974 = vmatmul.mubr.msk.f32.gmra.mrb[152].mxu1 %vm459_vm2, %v7583_v29  ;;  %v7370_v29 = vld [vmem:[%s10457_s17 + $0x2d4] ss:$8 sps:$4 sm:$0xff]  }
 0x858   :  { %3395 = vmatprep.mubr.f32.mxu1 %v7904_v1 }
 0x85b   :  { %5975 = vmatmul.mubr.msk.f32.gmra.mrb[154].mxu1 %vm459_vm2, %v7584_v7  ;;  %v7368_v7 = vld [vmem:[%s10457_s17 + $0x2d0] ss:$8 sps:$4 sm:$0xff]  }
 0x85c   :  { %3401 = vmatprep.mubr.f32.mxu1 %v7904_v1 }
 0x85f   :  { %5976 = vmatmul.mubr.msk.f32.gmra.mrb[156].mxu1 %vm459_vm2, %v7585_v38  ;;  %v7373_v38 = vld [vmem:[%s10457_s17 + $0x2e4] ss:$8 sps:$4 sm:$0xff]  }
 0x860   :  { %3407 = vmatprep.mubr.f32.mxu1 %v7904_v1 }
 0x863   :  { %5977 = vmatmul.mubr.msk.f32.gmra.mrb[158].mxu1 %vm459_vm2, %v7586_v44  ;;  %v7371_v44 = vld [vmem:[%s10457_s17 + $0x2e0] ss:$8 sps:$4 sm:$0xff]  }
 0x864   :  { %3413 = vmatprep.mubr.f32.mxu1 %v7904_v1 }
 0x867   :  { %5978 = vmatmul.mubr.msk.f32.gmra.mrb[160].mxu1 %vm459_vm2, %v7587_v45  ;;  %v7376_v45 = vld [vmem:[%s10457_s17 + $0x2f4] ss:$8 sps:$4 sm:$0xff]  }
 0x868   :  { %3419 = vmatprep.mubr.f32.mxu1 %v7904_v1 }
 0x86b   :  { %5979 = vmatmul.mubr.msk.f32.gmra.mrb[162].mxu1 %vm459_vm2, %v7588_v35 }
 0x86c   :  { %3888 = vmatprep.mubr.f32.mxu1 %v7904_v1 }
 0x8b2   :  { %v2671_v46 = vpop.f32.mrb[104].mxu1 }
 0x8b3   :  { %v2673_v47 = vpop.f32.mrb[105].mxu1 }
 0x8b6   :  { %v2677_v10 = vpop.f32.mrb[106].mxu1 }
 0x8b7   :  { %v2730_v48 = vpack.c.bf16 %v2677_v10, %v2671_v46  ;;  %v2679_v49 = vpop.f32.mrb[107].mxu1  ;;  %v7374_v10 = vld [vmem:[%s10457_s17 + $0x2f0] ss:$8 sps:$4 sm:$0xff]  }
 0x8b8   :  { %v2731_v51 = vpack.c.bf16 %v2679_v49, %v2673_v47 }
 0x8ba   :  { %3250 = vmatprep.mubr.bf16.mxu0 %v2731_v51  ;;  %v2683_v58 = vpop.f32.mrb[108].mxu1 }
 0x8bb   :  { %3251 = vmatmul.mubr.bf16.vlgmr.msra.gmra.mrb[116].mxu0 %v2730_v48  ;;  %v2685_v50 = vpop.f32.mrb[109].mxu1 }
 0x8bc   :  { %3630 = vmatpush1.bf16.msra.mxu0 %v7329_v56 }
 0x8bd   :  { %3631 = vmatprep.subr.bf16.mxu0 %v7334_v43 }
 0x8be   :  { %v2689_v41 = vpop.f32.mrb[110].mxu1 }
 0x8bf   :  { %v2732_v3 = vpack.c.bf16 %v2689_v41, %v2683_v58  ;;  %v2691_v39 = vpop.f32.mrb[111].mxu1 }
 0x8c0   :  { %v2733_v61 = vpack.c.bf16 %v2691_v39, %v2685_v50  ;;  %3632 = vmatpush1.bf16.msra.mxu0 %v7332_v59 }
 0x8c1   :  { %3633 = vmatprep.subr.bf16.mxu0 %v7337_v24 }
 0x8c2   :  { %3260 = vmatprep.mubr.bf16.mxu0 %v2733_v61  ;;  %v2695_v4 = vpop.f32.mrb[112].mxu1 }
 0x8c3   :  { %3261 = vmatmul.mubr.bf16.gmra.mrb[120].mxu0 %v2732_v3  ;;  %v2697_v52 = vpop.f32.mrb[113].mxu1 }
 0x8c4   :  { %3634 = vmatpush1.bf16.msra.mxu0 %v7335_v8 }
 0x8c5   :  { %3635 = vmatprep.subr.bf16.mxu0 %v7340_v40 }
 0x8c6   :  { %v2701_v2 = vpop.f32.mrb[114].mxu1 }
 0x8c7   :  { %v2734_v54 = vpack.c.bf16 %v2701_v2, %v2695_v4  ;;  %v2703_v14 = vpop.f32.mrb[115].mxu1 }
 0x8c8   :  { %v2735_v23 = vpack.c.bf16 %v2703_v14, %v2697_v52  ;;  %3636 = vmatpush1.bf16.msra.mxu0 %v7338_v12 }
 0x8c9   :  { %3637 = vmatprep.subr.bf16.mxu0 %v7343_v9 }
 0x8ca   :  { %3270 = vmatprep.mubr.bf16.mxu0 %v2735_v23  ;;  %v2707_v21 = vpop.f32.mrb[116].mxu1 }
 0x8cb   :  { %3271 = vmatmul.mubr.bf16.gmra.mrb[124].mxu0 %v2734_v54  ;;  %v2709_v5 = vpop.f32.mrb[117].mxu1 }
 0x8cc   :  { %3638 = vmatpush1.bf16.msra.mxu0 %v7341_v15 }
 0x8cd   :  { %3639 = vmatprep.subr.bf16.mxu0 %v7346_v31 }
 0x8ce   :  { %v2713_v30 = vpop.f32.mrb[118].mxu1 }
 0x8cf   :  { %v2736_v17 = vpack.c.bf16 %v2713_v30, %v2707_v21  ;;  %v2715_v53 = vpop.f32.mrb[119].mxu1 }
 0x8d0   :  { %v2737_v22 = vpack.c.bf16 %v2715_v53, %v2709_v5  ;;  %3640 = vmatpush1.bf16.msra.mxu0 %v7344_v13 }
 0x8d1   :  { %3641 = vmatprep.subr.bf16.mxu0 %v7349_v63 }
 0x8d2   :  { %3280 = vmatprep.mubr.bf16.mxu0 %v2737_v22  ;;  %v2719_v19 = vpop.f32.mrb[120].mxu1 }
 0x8d3   :  { %3281 = vmatmul.mubr.bf16.gmra.mrb[128].mxu0 %v2736_v17  ;;  %v2721_v57 = vpop.f32.mrb[121].mxu1 }
 0x8d4   :  { %3642 = vmatpush1.bf16.msra.mxu0 %v7347_v32 }
 0x8d5   :  { %3643 = vmatprep.subr.bf16.mxu0 %v7352_v18 }
 0x8d6   :  { %v2725_v36 = vpop.f32.mrb[122].mxu1 }
 0x8d7   :  { %v2738_v27 = vpack.c.bf16 %v2725_v36, %v2719_v19  ;;  %v2727_v33 = vpop.f32.mrb[123].mxu1 }
 0x8d8   :  { %v2739_v16 = vpack.c.bf16 %v2727_v33, %v2721_v57  ;;  %3644 = vmatpush1.bf16.msra.mxu0 %v7350_v34 }
 0x8d9   :  { %3645 = vmatprep.subr.bf16.mxu0 %v7355_v20 }
 0x8da   :  { %3290 = vmatprep.mubr.bf16.mxu0 %v2739_v16 }
 0x8db   :  { %3291 = vmatmul.mubr.bf16.gmra.mrb[132].mxu0 %v2738_v27 }
 0x8dc   :  { %3646 = vmatpush1.bf16.msra.mxu0 %v7353_v55 }
 0x8dd   :  { %3647 = vmatprep.subr.bf16.mxu0 %v7358_v6 }
 0x8e0   :  { %3648 = vmatpush1.bf16.msra.mxu0 %v7356_v11 }
 0x8e1   :  { %3649 = vmatprep.subr.bf16.mxu0 %v7361_v26 }
 0x8e4   :  { %3650 = vmatpush1.bf16.msra.mxu0 %v7359_v0  ;;  %v3732_v0 = vld [vmem:[#allocation15] sm:$0x3] }
 0x8e5   :  { %3651 = vmatprep.subr.bf16.mxu0 %v7364_v42  ;;  %v9615_v42 = vrot.slane %v3732_v0, %v9136_v28 }
 0x8e8   :  { %3652 = vmatpush1.bf16.msra.mxu0 %v7362_v60 }
 0x8e9   :  { %3653 = vmatprep.subr.bf16.mxu0 %v7367_v62  ;;  %v9618_v62 = vrot.slane %v3732_v0, %v9138_v37 }
 0x8ec   :  { %3654 = vmatpush1.bf16.msra.mxu0 %v7365_v25 }
 0x8ed   :  { %3655 = vmatprep.subr.bf16.mxu0 %v7370_v29 }
 0x8f0   :  { %3656 = vmatpush1.bf16.msra.mxu0 %v7368_v7 }
 0x8f1   :  { %3657 = vmatprep.subr.bf16.mxu0 %v7373_v38 }
 0x8f2   :  { %v9571_v35 = vpop.f32.mrb[124].mxu1 }
 0x8f3   :  { %v9573_v46 = vpop.f32.mrb[125].mxu1 }
 0x8f4   :  { %v9575_v47 = vpop.f32.mrb[126].mxu1  ;;  %3658 = vmatpush1.bf16.msra.mxu0 %v7371_v44 }
 0x8f5   :  { %v9580_v48 = vpop.f32.mrb[127].mxu1  ;;  %3659 = vmatprep.subr.bf16.mxu0 %v7376_v45 }
 0x8f8   :  { %3660 = vmatpush1.bf16.msra.mxu0 %v7374_v10 }
 0x8fa   :  { %v9582_v49 = vpop.f32.mrb[128].mxu1 }
 0x8fb   :  { %v9584_v51 = vpop.f32.mrb[129].mxu1 }
 0x8fc   :  { %v9586_v56 = vpop.f32.mrb[130].mxu1 }
 0x8fd   :  { %v9588_v43 = vpop.f32.mrb[131].mxu1 }
 0x902   :  { %v9590_v58 = vpop.f32.mrb[132].mxu1 }
 0x903   :  { %v9592_v50 = vpop.f32.mrb[133].mxu1 }
 0x904   :  { %v9594_v59 = vpop.f32.mrb[134].mxu1 }
 0x905   :  { %v9596_v24 = vpop.f32.mrb[135].mxu1 }
 0x90a   :  { %v9598_v41 = vpop.f32.mrb[136].mxu1 }
 0x90b   :  { %v9600_v3 = vpop.f32.mrb[137].mxu1 }
 0x90c   :  { %v9602_v39 = vpop.f32.mrb[138].mxu1 }
 0x90d   :  { %v9604_v61 = vpop.f32.mrb[139].mxu1 }
 0x912   :  { %v9606_v8 = vpop.f32.mrb[140].mxu1 }
 0x913   :  { %v9608_v40 = vpop.f32.mrb[141].mxu1 }
 0x914   :  { %v9610_v4 = vpop.f32.mrb[142].mxu1 }
 0x915   :  { %v9612_v52 = vpop.f32.mrb[143].mxu1 }
 0x91a   :  { %v3367_v12 = vpop.f32.mrb[144].mxu1 }
 0x91b   :  { %v3369_v9 = vpop.f32.mrb[145].mxu1 }
 0x91e   :  { %v3373_v2 = vpop.f32.mrb[146].mxu1 }
 0x91f   :  { %v3426_v54 = vpack.c.bf16 %v3373_v2, %v3367_v12  ;;  %v3375_v14 = vpop.f32.mrb[147].mxu1 }
 0x920   :  { %v3427_v23 = vpack.c.bf16 %v3375_v14, %v3369_v9 }
 0x922   :  { %v3379_v15 = vpop.f32.mrb[148].mxu1  ;;  %3661 = vmatprep.mubr.bf16.mxu0 %v3427_v23 }
 0x923   :  { %v3381_v31 = vpop.f32.mrb[149].mxu1  ;;  %3662 = vmatmul.mubr.bf16.vlgmr.msra.gmra.mrb[116].mxu0 %v3426_v54 }
 0x926   :  { %v3385_v21 = vpop.f32.mrb[150].mxu1 }
 0x927   :  { %v3428_v5 = vpack.c.bf16 %v3385_v21, %v3379_v15  ;;  %v3387_v13 = vpop.f32.mrb[151].mxu1 }
 0x928   :  { %v3429_v63 = vpack.c.bf16 %v3387_v13, %v3381_v31 }
 0x92a   :  { %v3391_v30 = vpop.f32.mrb[152].mxu1  ;;  %3671 = vmatprep.mubr.bf16.mxu0 %v3429_v63 }
 0x92b   :  { %v3393_v17 = vpop.f32.mrb[153].mxu1  ;;  %3672 = vmatmul.mubr.bf16.gmra.mrb[120].mxu0 %v3428_v5 }
 0x92e   :  { %v3397_v53 = vpop.f32.mrb[154].mxu1 }
 0x92f   :  { %v3430_v22 = vpack.c.bf16 %v3397_v53, %v3391_v30  ;;  %v3399_v32 = vpop.f32.mrb[155].mxu1 }
 0x930   :  { %v3431_v18 = vpack.c.bf16 %v3399_v32, %v3393_v17 }
 0x932   :  { %v3403_v19 = vpop.f32.mrb[156].mxu1  ;;  %3681 = vmatprep.mubr.bf16.mxu0 %v3431_v18 }
 0x933   :  { %v3405_v57 = vpop.f32.mrb[157].mxu1  ;;  %3682 = vmatmul.mubr.bf16.gmra.mrb[124].mxu0 %v3430_v22 }
 0x936   :  { %v3409_v34 = vpop.f32.mrb[158].mxu1 }
 0x937   :  { %v3432_v20 = vpack.c.bf16 %v3409_v34, %v3403_v19  ;;  %v3411_v36 = vpop.f32.mrb[159].mxu1 }
 0x938   :  { %v3433_v27 = vpack.c.bf16 %v3411_v36, %v3405_v57 }
 0x93a   :  { %v3415_v33 = vpop.f32.mrb[160].mxu1  ;;  %3691 = vmatprep.mubr.bf16.mxu0 %v3433_v27 }
 0x93b   :  { %v3417_v16 = vpop.f32.mrb[161].mxu1  ;;  %3692 = vmatmul.mubr.bf16.gmra.mrb[128].mxu0 %v3432_v20 }
 0x93e   :  { %v3421_v55 = vpop.f32.mrb[162].mxu1 }
 0x93f   :  { %v3434_v6 = vpack.c.bf16 %v3421_v55, %v3415_v33  ;;  %v3423_v11 = vpop.f32.mrb[163].mxu1 }
 0x940   :  { %v3435_v26 = vpack.c.bf16 %v3423_v11, %v3417_v16 }
 0x942   :  { %3701 = vmatprep.mubr.bf16.mxu0 %v3435_v26 }
 0x943   :  { %3702 = vmatmul.mubr.bf16.gmra.mrb[132].mxu0 %v3434_v6 }
 0x9f6   :  { %v3663_v60 = vpop.f32.mrb[116].mxu0 }
 0x9f7   :  { %v7049_v25 = vadd.f32 %v3663_v60, %v9571_v35  ;;  %v3665_v29 = vpop.f32.mrb[117].mxu0 }
 0x9f8   :  { %v7050_v7 = vadd.f32 %v3665_v29, %v9573_v46  ;;  %v3667_v38 = vpop.f32.mrb[118].mxu0 }
 0x9f9   :  { %v3744_v44 = vadd.f32 %v7049_v25, %v9615_v42  ;;  %v7051_v45 = vadd.f32 %v3667_v38, %v9575_v47  ;;  %v3669_v10 = vpop.f32.mrb[119].mxu0 }
 0x9fa   :  { %v3745_v12 = vadd.f32 %v7050_v7, %v9618_v62  ;;  %v7052_v9 = vadd.f32 %v3669_v10, %v9580_v48 }
 0x9fb   :  { %v3746_v2 = vadd.f32 %v7051_v45, %v9615_v42  ;;  %v3774_v14 = vmax.f32 %v3744_v44, 0.0 }
 0x9fc   :  { %v3747_v54 = vadd.f32 %v7052_v9, %v9618_v62  ;;  %v3775_v35 = vmax.f32 %v3745_v12, 0.0 }
 0x9fd   :  { %v3776_v23 = vmax.f32 %v3746_v2, 0.0 }
 0x9fe   :  { %v3777_v15 = vmax.f32 %v3747_v54, 0.0  ;;  %v3673_v31 = vpop.f32.mrb[120].mxu0 }
 0x9ff   :  { %v6985_v46 = vpack.c.bf16 %v3776_v23, %v3774_v14  ;;  %v7053_v21 = vadd.f32 %v3673_v31, %v9582_v49  ;;  %v3675_v5 = vpop.f32.mrb[121].mxu0 }
 0xa00   :  { %v7054_v47 = vadd.f32 %v3675_v5, %v9584_v51  ;;  %v3677_v13 = vpop.f32.mrb[122].mxu0  ;;  %v6983_v63 = vpack.c.bf16 %v3777_v15, %v3775_v35 }
 0xa01   :  { %v3748_v30 = vadd.f32 %v7053_v21, %v9615_v42  ;;  %v7055_v48 = vadd.f32 %v3677_v13, %v9586_v56  ;;  %v3679_v17 = vpop.f32.mrb[123].mxu0 }
 0xa02   :  { %v3749_v53 = vadd.f32 %v7054_v47, %v9618_v62  ;;  %v7056_v22 = vadd.f32 %v3679_v17, %v9588_v43  ;;  %6984 = vmatprep.subr.bf16.mxu1 %v6983_v63 }
 0xa03   :  { %v3750_v32 = vadd.f32 %v7055_v48, %v9615_v42  ;;  %6986 = vmatpush1.bf16.msra.mxu1 %v6985_v46  ;;  %v3778_v18 = vmax.f32 %v3748_v30, 0.0 }
 0xa04   :  { %v3751_v49 = vadd.f32 %v7056_v22, %v9618_v62  ;;  %v3779_v51 = vmax.f32 %v3749_v53, 0.0 }
 0xa05   :  { %v3780_v19 = vmax.f32 %v3750_v32, 0.0 }
 0xa06   :  { %v3781_v57 = vmax.f32 %v3751_v49, 0.0  ;;  %v3683_v34 = vpop.f32.mrb[124].mxu0 }
 0xa07   :  { %v6989_v20 = vpack.c.bf16 %v3780_v19, %v3778_v18  ;;  %v7057_v36 = vadd.f32 %v3683_v34, %v9590_v58  ;;  %v3685_v56 = vpop.f32.mrb[125].mxu0  ;;  %v7380_v34 = vld [vmem:[%s10461_s21 + $0x10] ss:$8 sps:$4 sm:$0xff]  }
 0xa08   :  { %v7058_v27 = vadd.f32 %v3685_v56, %v9592_v50  ;;  %v3687_v33 = vpop.f32.mrb[126].mxu0  ;;  %v6987_v16 = vpack.c.bf16 %v3781_v57, %v3779_v51  ;;  %v3764_v57 = vld [vmem:[#allocation16] sm:$0xff] }
 0xa09   :  { %v3752_v43 = vadd.f32 %v7057_v36, %v9615_v42  ;;  %v7059_v55 = vadd.f32 %v3687_v33, %v9594_v59  ;;  %v3689_v6 = vpop.f32.mrb[127].mxu0  ;;  %v3766_v36 = vld [vmem:[#allocation16 + $0x10] sm:$0xff]  ;;  %v7383_v56 = vld [vmem:[%s10461_s21 + $0x20] ss:$8 sps:$4 sm:$0xff]   ;;  %v3767_v33 = vld [vmem:[#allocation16 + $0x18] sm:$0xff] }
 0xa0a   :  { %v3753_v11 = vadd.f32 %v7058_v27, %v9618_v62  ;;  %v7060_v26 = vadd.f32 %v3689_v6, %v9596_v24  ;;  %6988 = vmatprep.subr.bf16.mxu1 %v6987_v16  ;;  %v7388_v27 = vld [vmem:[%s10461_s21 + $0x34] ss:$8 sps:$4 sm:$0xff]   ;;  %v7386_v16 = vld [vmem:[%s10461_s21 + $0x30] ss:$8 sps:$4 sm:$0xff]   ;;  %v7389_v6 = vld [vmem:[%s10461_s21 + $0x40] ss:$8 sps:$4 sm:$0xff]  }
 0xa0b   :  { %v3754_v0 = vadd.f32 %v7059_v55, %v9615_v42  ;;  %6990 = vmatpush1.bf16.msra.mxu1 %v6989_v20  ;;  %v3782_v60 = vmax.f32 %v3752_v43, 0.0  ;;  %v7385_v20 = vld [vmem:[%s10461_s21 + $0x24] ss:$8 sps:$4 sm:$0xff]   ;;  %v3768_v55 = vld [vmem:[#allocation16 + $0x20] sm:$0xff] }
 0xa0c   :  { %v3755_v58 = vadd.f32 %v7060_v26, %v9618_v62  ;;  %v3783_v50 = vmax.f32 %v3753_v11, 0.0  ;;  %v7391_v43 = vld [vmem:[%s10461_s21 + $0x44] ss:$8 sps:$4 sm:$0xff]   ;;  %v7394_v11 = vld [vmem:[%s10461_s21 + $0x54] ss:$8 sps:$4 sm:$0xff]  }
 0xa0d   :  { %v3784_v25 = vmax.f32 %v3754_v0, 0.0  ;;  %v3769_v26 = vld [vmem:[#allocation16 + $0x28] sm:$0xff]  ;;  %v7392_v0 = vld [vmem:[%s10461_s21 + $0x50] ss:$8 sps:$4 sm:$0xff]  }
 0xa0e   :  { %v3785_v29 = vmax.f32 %v3755_v58, 0.0  ;;  %v3693_v7 = vpop.f32.mrb[128].mxu0  ;;  %v7397_v58 = vld [vmem:[%s10461_s21 + $0x64] ss:$8 sps:$4 sm:$0xff]  }
 0xa0f   :  { %v6993_v38 = vpack.c.bf16 %v3784_v25, %v3782_v60  ;;  %v7061_v44 = vadd.f32 %v3693_v7, %v9598_v41  ;;  %v3695_v59 = vpop.f32.mrb[129].mxu0  ;;  %v3770_v60 = vld [vmem:[#allocation16 + $0x30] sm:$0xff]  ;;  %v7395_v25 = vld [vmem:[%s10461_s21 + $0x60] ss:$8 sps:$4 sm:$0xff]  }
 0xa10   :  { %v7062_v45 = vadd.f32 %v3695_v59, %v9600_v3  ;;  %v3697_v10 = vpop.f32.mrb[130].mxu0  ;;  %v6991_v12 = vpack.c.bf16 %v3785_v29, %v3783_v50  ;;  %v7400_v50 = vld [vmem:[%s10461_s21 + $0x74] ss:$8 sps:$4 sm:$0xff]   ;;  %v7398_v7 = vld [vmem:[%s10461_s21 + $0x70] ss:$8 sps:$4 sm:$0xff]  }
 0xa11   :  { %v3756_v24 = vadd.f32 %v7061_v44, %v9615_v42  ;;  %v7063_v9 = vadd.f32 %v3697_v10, %v9602_v39  ;;  %v3699_v2 = vpop.f32.mrb[131].mxu0  ;;  %v3771_v29 = vld [vmem:[#allocation16 + $0x38] sm:$0xff]  ;;  %v3772_v44 = vld [vmem:[#allocation16 + $0x40] sm:$0xff]  ;;  %v3773_v10 = vld [vmem:[#allocation16 + $0x48] sm:$0xff] }
 0xa12   :  { %v3757_v54 = vadd.f32 %v7062_v45, %v9618_v62  ;;  %v7064_v14 = vadd.f32 %v3699_v2, %v9604_v61  ;;  %6992 = vmatprep.subr.bf16.mxu1 %v6991_v12  ;;  %v7401_v59 = vld [vmem:[%s10461_s21 + $0x80] ss:$8 sps:$4 sm:$0xff]   ;;  %v7406_v45 = vld [vmem:[%s10461_s21 + $0x94] ss:$8 sps:$4 sm:$0xff]   ;;  %v7404_v12 = vld [vmem:[%s10461_s21 + $0x90] ss:$8 sps:$4 sm:$0xff]  }
 0xa13   :  { %v3758_v23 = vadd.f32 %v7063_v9, %v9615_v42  ;;  %6994 = vmatpush1.bf16.msra.mxu1 %v6993_v38  ;;  %v3786_v35 = vmax.f32 %v3756_v24, 0.0  ;;  %v7403_v38 = vld [vmem:[%s10461_s21 + $0x84] ss:$8 sps:$4 sm:$0xff]   ;;  %v7407_v9 = vld [vmem:[%s10461_s21 + $0xa0] ss:$8 sps:$4 sm:$0xff]  }
 0xa14   :  { %v3759_v41 = vadd.f32 %v7064_v14, %v9618_v62  ;;  %v3787_v3 = vmax.f32 %v3757_v54, 0.0  ;;  %v7409_v24 = vld [vmem:[%s10461_s21 + $0xa4] ss:$8 sps:$4 sm:$0xff]   ;;  %v7412_v2 = vld [vmem:[%s10461_s21 + $0xb4] ss:$8 sps:$4 sm:$0xff]  }
 0xa15   :  { %v3788_v15 = vmax.f32 %v3758_v23, 0.0  ;;  %v7410_v54 = vld [vmem:[%s10461_s21 + $0xb0] ss:$8 sps:$4 sm:$0xff]   ;;  %v7415_v14 = vld [vmem:[%s10461_s21 + $0xc4] ss:$8 sps:$4 sm:$0xff]  }
 0xa16   :  { %v3789_v31 = vmax.f32 %v3759_v41, 0.0  ;;  %v3703_v46 = vpop.f32.mrb[132].mxu0  ;;  %v7413_v23 = vld [vmem:[%s10461_s21 + $0xc0] ss:$8 sps:$4 sm:$0xff]   ;;  %v7418_v41 = vld [vmem:[%s10461_s21 + $0xd4] ss:$8 sps:$4 sm:$0xff]  }
 0xa17   :  { %v6997_v21 = vpack.c.bf16 %v3788_v15, %v3786_v35  ;;  %v7065_v5 = vadd.f32 %v3703_v46, %v9606_v8  ;;  %v3705_v39 = vpop.f32.mrb[133].mxu0  ;;  %v7416_v35 = vld [vmem:[%s10461_s21 + $0xd0] ss:$8 sps:$4 sm:$0xff]   ;;  %v7421_v15 = vld [vmem:[%s10461_s21 + $0xe4] ss:$8 sps:$4 sm:$0xff]  }
 0xa18   :  { %v7066_v47 = vadd.f32 %v3705_v39, %v9608_v40  ;;  %v3707_v13 = vpop.f32.mrb[134].mxu0  ;;  %v6995_v63 = vpack.c.bf16 %v3789_v31, %v3787_v3  ;;  %v7419_v3 = vld [vmem:[%s10461_s21 + $0xe0] ss:$8 sps:$4 sm:$0xff]   ;;  %v7424_v31 = vld [vmem:[%s10461_s21 + $0xf4] ss:$8 sps:$4 sm:$0xff]  }
 0xa19   :  { %v3760_v61 = vadd.f32 %v7065_v5, %v9615_v42  ;;  %v7067_v30 = vadd.f32 %v3707_v13, %v9610_v4  ;;  %v3709_v48 = vpop.f32.mrb[135].mxu0  ;;  %v7379_v4 = vld [vmem:[%s10461_s21 + $0x4] ss:$8 sps:$4 sm:$0xff]   ;;  %v7422_v46 = vld [vmem:[%s10461_s21 + $0xf0] ss:$8 sps:$4 sm:$0xff]  }
 0xa1a   :  { %v3761_v17 = vadd.f32 %v7066_v47, %v9618_v62  ;;  %v7068_v53 = vadd.f32 %v3709_v48, %v9612_v52  ;;  %6996 = vmatprep.subr.bf16.mxu1 %v6995_v63  ;;  %v7377_v52 = vld [vmem:[%s10461_s21] ss:$8 sps:$4 sm:$0xff]   ;;  %v7427_v5 = vld [vmem:[%s10508_s22 + $0x104] ss:$8 sps:$4 sm:$0xff]   ;;  %v7430_v39 = vld [vmem:[%s10508_s22 + $0x114] ss:$8 sps:$4 sm:$0xff]  }
 0xa1b   :  { %v3762_v22 = vadd.f32 %v7067_v30, %v9615_v42  ;;  %6998 = vmatpush1.bf16.msra.mxu1 %v6997_v21  ;;  %v3790_v32 = vmax.f32 %v3760_v61, 0.0  ;;  %v7382_v42 = vld [vmem:[%s10461_s21 + $0x14] ss:$8 sps:$4 sm:$0xff]   ;;  %v7425_v21 = vld [vmem:[%s10508_s22 + $0x100] ss:$8 sps:$4 sm:$0xff]   ;;  %4736 = vmatprep.subr.bf16.mxu0 %v7427_v5 }
 0xa1c   :  { %v3763_v8 = vadd.f32 %v7068_v53, %v9618_v62  ;;  %v3791_v40 = vmax.f32 %v3761_v17, 0.0  ;;  %v3765_v62 = vld [vmem:[#allocation16 + $0x8] sm:$0xff]  ;;  %4737 = vmatpush1.bf16.msra.mxu0 %v7425_v21  ;;  %v7428_v47 = vld [vmem:[%s10508_s22 + $0x110] ss:$8 sps:$4 sm:$0xff]   ;;  %v7436_v61 = vld [vmem:[%s10508_s22 + $0x134] ss:$8 sps:$4 sm:$0xff]  }
 0xa1d   :  { %v3792_v49 = vmax.f32 %v3762_v22, 0.0  ;;  %4738 = vmatprep.subr.bf16.mxu0 %v7430_v39  ;;  %v7433_v13 = vld [vmem:[%s10508_s22 + $0x124] ss:$8 sps:$4 sm:$0xff]   ;;  %v7431_v63 = vld [vmem:[%s10508_s22 + $0x120] ss:$8 sps:$4 sm:$0xff]  }
 0xa1e   :  { %v3793_v18 = vmax.f32 %v3763_v8, 0.0  ;;  %v7434_v30 = vld [vmem:[%s10508_s22 + $0x130] ss:$8 sps:$4 sm:$0xff]   ;;  %v7439_v48 = vld [vmem:[%s10508_s22 + $0x144] ss:$8 sps:$4 sm:$0xff]  }
 0xa1f   :  { %v7001_v19 = vpack.c.bf16 %v3792_v49, %v3790_v32  ;;  %v7437_v17 = vld [vmem:[%s10508_s22 + $0x140] ss:$8 sps:$4 sm:$0xff]   ;;  %v7442_v53 = vld [vmem:[%s10508_s22 + $0x154] ss:$8 sps:$4 sm:$0xff]   ;;  %v7440_v22 = vld [vmem:[%s10508_s22 + $0x150] ss:$8 sps:$4 sm:$0xff]  }
 0xa20   :  { %v6999_v51 = vpack.c.bf16 %v3793_v18, %v3791_v40  ;;  %4739 = vmatpush1.bf16.msra.mxu0 %v7428_v47  ;;  %v7445_v8 = vld [vmem:[%s10508_s22 + $0x164] ss:$8 sps:$4 sm:$0xff]   ;;  %v7443_v32 = vld [vmem:[%s10508_s22 + $0x160] ss:$8 sps:$4 sm:$0xff]   ;;  %v7448_v49 = vld [vmem:[%s10508_s22 + $0x174] ss:$8 sps:$4 sm:$0xff]  }
 0xa21   :  { %4740 = vmatprep.subr.bf16.mxu0 %v7433_v13  ;;  %v7446_v40 = vld [vmem:[%s10508_s22 + $0x170] ss:$8 sps:$4 sm:$0xff]   ;;  %v7451_v18 = vld [vmem:[%s10508_s22 + $0x184] ss:$8 sps:$4 sm:$0xff]  }
 0xa22   :  { %7000 = vmatprep.subr.bf16.mxu1 %v6999_v51  ;;  %v7454_v51 = vld [vmem:[%s10508_s22 + $0x194] ss:$8 sps:$4 sm:$0xff]   ;;  %v7470_v21 = vld [vmem:[%s10508_s22 + $0x1f0] ss:$8 sps:$4 sm:$0xff]   ;;  %v4001_v5 = vld [vmem:[#allocation18] sm:$0x3] }
 0xa23   :  { %7002 = vmatpush1.bf16.msra.mxu1 %v7001_v19  ;;  %v7449_v19 = vld [vmem:[%s10508_s22 + $0x180] ss:$8 sps:$4 sm:$0xff]   ;;  %v9933_v39 = vrot.slane %v4001_v5, %v9136_v28  ;;  %v9936_v47 = vrot.slane %v4001_v5, %v9138_v37  ;;  %v7475_v13 = vld [vmem:[%s10508_s22 + $0x4] ss:$8 sps:$4 sm:$0xff]   ;;  %v7476_v5 = vld [vmem:[%s10508_s22 + $0x10] ss:$8 sps:$4 sm:$0xff]  }
 0xa24   :  { %4173 = vmatprep.subr.bf16.mxu1 %v7379_v4  ;;  %4741 = vmatpush1.bf16.msra.mxu0 %v7431_v63  ;;  %v7452_v4 = vld [vmem:[%s10508_s22 + $0x190] ss:$8 sps:$4 sm:$0xff]  }
 0xa25   :  { %4742 = vmatprep.subr.bf16.mxu0 %v7436_v61 }
 0xa26   :  { %6044 = vmatmul.mubr.msk.f32.vlgmr.msra.gmra.mrb[164].mxu1 %vm459_vm2, %v3764_v57  ;;  %v7457_v57 = vld [vmem:[%s10508_s22 + $0x1a4] ss:$8 sps:$4 sm:$0xff]  }
 0xa27   :  { %3894 = vmatprep.mubr.f32.mxu1 %v7904_v1  ;;  %4174 = vmatpush1.bf16.msra.mxu1 %v7377_v52  ;;  %v7455_v52 = vld [vmem:[%s10508_s22 + $0x1a0] ss:$8 sps:$4 sm:$0xff]  }
 0xa28   :  { %4175 = vmatprep.subr.bf16.mxu1 %v7382_v42  ;;  %4743 = vmatpush1.bf16.msra.mxu0 %v7434_v30  ;;  %v7460_v42 = vld [vmem:[%s10508_s22 + $0x1b4] ss:$8 sps:$4 sm:$0xff]  }
 0xa29   :  { %4744 = vmatprep.subr.bf16.mxu0 %v7439_v48 }
 0xa2a   :  { %6045 = vmatmul.mubr.msk.f32.gmra.mrb[166].mxu1 %vm459_vm2, %v3765_v62  ;;  %v7458_v62 = vld [vmem:[%s10508_s22 + $0x1b0] ss:$8 sps:$4 sm:$0xff]  }
 0xa2b   :  { %3900 = vmatprep.mubr.f32.mxu1 %v7904_v1  ;;  %4176 = vmatpush1.bf16.msra.mxu1 %v7380_v34  ;;  %v7463_v34 = vld [vmem:[%s10508_s22 + $0x1c4] ss:$8 sps:$4 sm:$0xff]  }
 0xa2c   :  { %4177 = vmatprep.subr.bf16.mxu1 %v7385_v20  ;;  %4745 = vmatpush1.bf16.msra.mxu0 %v7437_v17  ;;  %v7461_v20 = vld [vmem:[%s10508_s22 + $0x1c0] ss:$8 sps:$4 sm:$0xff]  }
 0xa2d   :  { %4746 = vmatprep.subr.bf16.mxu0 %v7442_v53 }
 0xa2e   :  { %6046 = vmatmul.mubr.msk.f32.gmra.mrb[168].mxu1 %vm459_vm2, %v3766_v36 }
 0xa2f   :  { %3906 = vmatprep.mubr.f32.mxu1 %v7904_v1  ;;  %4178 = vmatpush1.bf16.msra.mxu1 %v7383_v56 }
 0xa30   :  { %4179 = vmatprep.subr.bf16.mxu1 %v7388_v27  ;;  %4747 = vmatpush1.bf16.msra.mxu0 %v7440_v22 }
 0xa31   :  { %4748 = vmatprep.subr.bf16.mxu0 %v7445_v8 }
 0xa32   :  { %6047 = vmatmul.mubr.msk.f32.gmra.mrb[170].mxu1 %vm459_vm2, %v3767_v33 }
 0xa33   :  { %3912 = vmatprep.mubr.f32.mxu1 %v7904_v1  ;;  %4180 = vmatpush1.bf16.msra.mxu1 %v7386_v16 }
 0xa34   :  { %4181 = vmatprep.subr.bf16.mxu1 %v7391_v43  ;;  %4749 = vmatpush1.bf16.msra.mxu0 %v7443_v32 }
 0xa35   :  { %4750 = vmatprep.subr.bf16.mxu0 %v7448_v49 }
 0xa36   :  { %6048 = vmatmul.mubr.msk.f32.gmra.mrb[172].mxu1 %vm459_vm2, %v3768_v55 }
 0xa37   :  { %3918 = vmatprep.mubr.f32.mxu1 %v7904_v1  ;;  %4182 = vmatpush1.bf16.msra.mxu1 %v7389_v6 }
 0xa38   :  { %4183 = vmatprep.subr.bf16.mxu1 %v7394_v11  ;;  %4751 = vmatpush1.bf16.msra.mxu0 %v7446_v40 }
 0xa39   :  { %4752 = vmatprep.subr.bf16.mxu0 %v7451_v18 }
 0xa3a   :  { %6049 = vmatmul.mubr.msk.f32.gmra.mrb[174].mxu1 %vm459_vm2, %v3769_v26 }
 0xa3b   :  { %3924 = vmatprep.mubr.f32.mxu1 %v7904_v1  ;;  %4184 = vmatpush1.bf16.msra.mxu1 %v7392_v0 }
 0xa3c   :  { %4185 = vmatprep.subr.bf16.mxu1 %v7397_v58  ;;  %4753 = vmatpush1.bf16.msra.mxu0 %v7449_v19 }
 0xa3d   :  { %4754 = vmatprep.subr.bf16.mxu0 %v7454_v51 }
 0xa3e   :  { %6050 = vmatmul.mubr.msk.f32.gmra.mrb[176].mxu1 %vm459_vm2, %v3770_v60 }
 0xa3f   :  { %3930 = vmatprep.mubr.f32.mxu1 %v7904_v1  ;;  %4186 = vmatpush1.bf16.msra.mxu1 %v7395_v25 }
 0xa40   :  { %4187 = vmatprep.subr.bf16.mxu1 %v7400_v50  ;;  %4755 = vmatpush1.bf16.msra.mxu0 %v7452_v4 }
 0xa41   :  { %4756 = vmatprep.subr.bf16.mxu0 %v7457_v57  ;;  %v4304_v57 = vpop.permute.xlu1 %4303 }
 0xa42   :  { %6051 = vmatmul.mubr.msk.f32.gmra.mrb[178].mxu1 %vm459_vm2, %v3771_v29 }
 0xa43   :  { %3936 = vmatprep.mubr.f32.mxu1 %v7904_v1  ;;  %4188 = vmatpush1.bf16.msra.mxu1 %v7398_v7 }
 0xa44   :  { %4189 = vmatprep.subr.bf16.mxu1 %v7403_v38  ;;  %4757 = vmatpush1.bf16.msra.mxu0 %v7455_v52 }
 0xa45   :  { %4758 = vmatprep.subr.bf16.mxu0 %v7460_v42 }
 0xa46   :  { %6052 = vmatmul.mubr.msk.f32.gmra.mrb[180].mxu1 %vm459_vm2, %v3772_v44 }
 0xa47   :  { %3942 = vmatprep.mubr.f32.mxu1 %v7904_v1  ;;  %4190 = vmatpush1.bf16.msra.mxu1 %v7401_v59 }
 0xa48   :  { %4191 = vmatprep.subr.bf16.mxu1 %v7406_v45  ;;  %4759 = vmatpush1.bf16.msra.mxu0 %v7458_v62  ;;  %v4299_v62 = vpop.permute.xlu0 %4298 }
 0xa49   :  { %4760 = vmatprep.subr.bf16.mxu0 %v7463_v34 }
 0xa4a   :  { %6053 = vmatmul.mubr.msk.f32.gmra.mrb[182].mxu1 %vm459_vm2, %v3773_v10 }
 0xa4b   :  { %4192 = vmatpush1.bf16.msra.mxu1 %v7404_v12 }
 0xa4c   :  { %4193 = vmatprep.subr.bf16.mxu1 %v7409_v24  ;;  %4761 = vmatpush1.bf16.msra.mxu0 %v7461_v20 }
 0xa4f   :  { %4194 = vmatpush1.bf16.msra.mxu1 %v7407_v9 }
 0xa50   :  { %4195 = vmatprep.subr.bf16.mxu1 %v7412_v2 }
 0xa53   :  { %4196 = vmatpush1.bf16.msra.mxu1 %v7410_v54 }
 0xa54   :  { %4197 = vmatprep.subr.bf16.mxu1 %v7415_v14 }
 0xa57   :  { %4198 = vmatpush1.bf16.msra.mxu1 %v7413_v23 }
 0xa58   :  { %4199 = vmatprep.subr.bf16.mxu1 %v7418_v41 }
 0xa5b   :  { %4200 = vmatpush1.bf16.msra.mxu1 %v7416_v35  ;;  %v7466_v35 = vld [vmem:[%s10508_s22 + $0x1d4] ss:$8 sps:$4 sm:$0xff]  }
 0xa5c   :  { %4201 = vmatprep.subr.bf16.mxu1 %v7421_v15  ;;  %v7464_v15 = vld [vmem:[%s10508_s22 + $0x1d0] ss:$8 sps:$4 sm:$0xff]   ;;  %4762 = vmatprep.subr.bf16.mxu0 %v7466_v35 }
 0xa5d   :  { %4763 = vmatpush1.bf16.msra.mxu0 %v7464_v15 }
 0xa5f   :  { %4202 = vmatpush1.bf16.msra.mxu1 %v7419_v3  ;;  %v7469_v3 = vld [vmem:[%s10508_s22 + $0x1e4] ss:$8 sps:$4 sm:$0xff]  }
 0xa60   :  { %4203 = vmatprep.subr.bf16.mxu1 %v7424_v31  ;;  %v7467_v31 = vld [vmem:[%s10508_s22 + $0x1e0] ss:$8 sps:$4 sm:$0xff]   ;;  %4764 = vmatprep.subr.bf16.mxu0 %v7469_v3 }
 0xa61   :  { %4765 = vmatpush1.bf16.msra.mxu0 %v7467_v31 }
 0xa63   :  { %4204 = vmatpush1.bf16.msra.mxu1 %v7422_v46  ;;  %v7472_v46 = vld [vmem:[%s10508_s22 + $0x1f4] ss:$8 sps:$4 sm:$0xff]  }
 0xa64   :  { %4766 = vmatprep.subr.bf16.mxu0 %v7472_v46  ;;  %v4314_v46 = vpop.permute.xlu1 %4313 }
 0xa65   :  { %4767 = vmatpush1.bf16.msra.mxu0 %v7470_v21 }
 0xa66   :  { %4979 = vmatprep.subr.bf16.mxu0 %v7475_v13  ;;  %v4309_v13 = vpop.permute.xlu0 %4308 }
 0xaf9   :  { %v9853_v36 = vpop.f32.mrb[164].mxu1 }
 0xafa   :  { %v9855_v56 = vpop.f32.mrb[165].mxu1 }
 0xafd   :  { %v9857_v27 = vpop.f32.mrb[166].mxu1 }
 0xafe   :  { %v3959_v33 = vpack.c.bf16 %v9857_v27, %v9853_v36  ;;  %v9861_v16 = vpop.f32.mrb[167].mxu1 }
 0xaff   :  { %v3960_v43 = vpack.c.bf16 %v9861_v16, %v9855_v56 }
 0xb01   :  { %v9865_v55 = vpop.f32.mrb[168].mxu1  ;;  %4205 = vmatprep.mubr.bf16.mxu1 %v3960_v43 }
 0xb02   :  { %v9867_v6 = vpop.f32.mrb[169].mxu1  ;;  %4206 = vmatmul.mubr.bf16.vlgmr.msra.gmra.mrb[184].mxu1 %v3959_v33 }
 0xb05   :  { %v9869_v11 = vpop.f32.mrb[170].mxu1 }
 0xb06   :  { %v3961_v26 = vpack.c.bf16 %v9869_v11, %v9865_v55  ;;  %v9873_v0 = vpop.f32.mrb[171].mxu1 }
 0xb07   :  { %v3962_v58 = vpack.c.bf16 %v9873_v0, %v9867_v6 }
 0xb09   :  { %v9877_v60 = vpop.f32.mrb[172].mxu1  ;;  %4215 = vmatprep.mubr.bf16.mxu1 %v3962_v58 }
 0xb0a   :  { %v9879_v25 = vpop.f32.mrb[173].mxu1  ;;  %4216 = vmatmul.mubr.bf16.gmra.mrb[188].mxu1 %v3961_v26 }
 0xb0d   :  { %v9881_v50 = vpop.f32.mrb[174].mxu1 }
 0xb0e   :  { %v3963_v29 = vpack.c.bf16 %v9881_v50, %v9877_v60  ;;  %v9885_v7 = vpop.f32.mrb[175].mxu1 }
 0xb0f   :  { %v3964_v38 = vpack.c.bf16 %v9885_v7, %v9879_v25 }
 0xb11   :  { %v9889_v44 = vpop.f32.mrb[176].mxu1  ;;  %4225 = vmatprep.mubr.bf16.mxu1 %v3964_v38 }
 0xb12   :  { %v9891_v59 = vpop.f32.mrb[177].mxu1  ;;  %4226 = vmatmul.mubr.bf16.gmra.mrb[192].mxu1 %v3963_v29 }
 0xb15   :  { %v9893_v45 = vpop.f32.mrb[178].mxu1 }
 0xb16   :  { %v3965_v10 = vpack.c.bf16 %v9893_v45, %v9889_v44  ;;  %v9897_v12 = vpop.f32.mrb[179].mxu1 }
 0xb17   :  { %v3966_v24 = vpack.c.bf16 %v9897_v12, %v9891_v59 }
 0xb19   :  { %v9901_v9 = vpop.f32.mrb[180].mxu1  ;;  %4235 = vmatprep.mubr.bf16.mxu1 %v3966_v24 }
 0xb1a   :  { %v9903_v2 = vpop.f32.mrb[181].mxu1  ;;  %4236 = vmatmul.mubr.bf16.gmra.mrb[196].mxu1 %v3965_v10 }
 0xb1d   :  { %v9905_v54 = vpop.f32.mrb[182].mxu1 }
 0xb1e   :  { %v3967_v14 = vpack.c.bf16 %v9905_v54, %v9901_v9  ;;  %v9909_v23 = vpop.f32.mrb[183].mxu1 }
 0xb1f   :  { %v3968_v41 = vpack.c.bf16 %v9909_v23, %v9903_v2 }
 0xb21   :  { %4245 = vmatprep.mubr.bf16.mxu1 %v3968_v41 }
 0xb22   :  { %4246 = vmatmul.mubr.bf16.gmra.mrb[200].mxu1 %v3967_v14  ;;  %v7473_v14 = vld [vmem:[%s10508_s22] ss:$8 sps:$4 sm:$0xff]  }
 0xb23   :  { %4430 = vmatprep.mubr.f32.mxu1 %v7904_v1 }
 0xbd5   :  { %v4207_v63 = vpop.f32.mrb[184].mxu1 }
 0xbd6   :  { %v4208_v61 = vadd.f32 %v4207_v63, %v9933_v39  ;;  %v4209_v30 = vpop.f32.mrb[185].mxu1 }
 0xbd7   :  { %v4210_v48 = vadd.f32 %v4209_v30, %v9936_v47  ;;  %v4211_v17 = vpop.f32.mrb[186].mxu1  ;;  %v7481_v30 = vld [vmem:[%s10508_s22 + $0x24] ss:$8 sps:$4 sm:$0xff]  }
 0xbd8   :  { %v4256_v53 = vadd.f32 %v4208_v61, %v9853_v36  ;;  %v4212_v22 = vadd.f32 %v4211_v17, %v9933_v39  ;;  %v4213_v8 = vpop.f32.mrb[187].mxu1 }
 0xbd9   :  { %v4257_v32 = vadd.f32 %v4210_v48, %v9855_v56  ;;  %v4214_v49 = vadd.f32 %v4213_v8, %v9936_v47 }
 0xbda   :  { %v4258_v40 = vadd.f32 %v4212_v22, %v9857_v27  ;;  %v4276_v51 = vmax.f32 %v4256_v53, 0.0 }
 0xbdb   :  { %v4277_v18 = vmax.f32 %v4257_v32, 0.0  ;;  %v4259_v19 = vadd.f32 %v4214_v49, %v9861_v16 }
 0xbdc   :  { %v4278_v4 = vmax.f32 %v4258_v40, 0.0  ;;  %v9957_v26 = vmul.f32 %v4299_v62, %v4276_v51 }
 0xbdd   :  { %v4279_v52 = vmax.f32 %v4259_v19, 0.0  ;;  %v4217_v42 = vpop.f32.mrb[188].mxu1  ;;  %v9952_v33 = vmul.f32 %v4299_v62, %v4277_v18 }
 0xbde   :  { %v9949_v34 = vmul.f32 %v4304_v57, %v4278_v4  ;;  %v4218_v20 = vadd.f32 %v4217_v42, %v9933_v39  ;;  %v4219_v36 = vpop.f32.mrb[189].mxu1  ;;  %v7479_v4 = vld [vmem:[%s10508_s22 + $0x20] ss:$8 sps:$4 sm:$0xff]  }
 0xbdf   :  { %v9954_v56 = vmul.f32 %v4304_v57, %v4279_v52  ;;  %v4220_v27 = vadd.f32 %v4219_v36, %v9936_v47  ;;  %v4221_v43 = vpop.f32.mrb[190].mxu1  ;;  %v4324_v36 = vpop.permute.xlu1 %4323 }
 0xbe0   :  { %v4260_v16 = vadd.f32 %v4218_v20, %v9865_v55  ;;  %v4222_v58 = vadd.f32 %v4221_v43, %v9933_v39  ;;  %v4223_v29 = vpop.f32.mrb[191].mxu1  ;;  %v9972_v41 = vpack.c.bf16 %v9949_v34, %v9957_v26  ;;  %v7482_v43 = vld [vmem:[%s10508_s22 + $0x30] ss:$8 sps:$4 sm:$0xff]  }
 0xbe1   :  { %v4261_v38 = vadd.f32 %v4220_v27, %v9867_v6  ;;  %v4224_v10 = vadd.f32 %v4223_v29, %v9936_v47  ;;  %v9965_v24 = vpack.c.bf16 %v9954_v56, %v9952_v33  ;;  %v7478_v6 = vld [vmem:[%s10508_s22 + $0x14] ss:$8 sps:$4 sm:$0xff]  }
 0xbe2   :  { %v4262_v55 = vadd.f32 %v4222_v58, %v9869_v11  ;;  %v4280_v3 = vmax.f32 %v4260_v16, 0.0  ;;  %v4319_v16 = vpop.permute.xlu0 %4318 }
 0xbe3   :  { %v4281_v35 = vmax.f32 %v4261_v38, 0.0  ;;  %v4263_v15 = vadd.f32 %v4224_v10, %v9873_v0  ;;  %7004 = vmatprep.subr.bf16.mxu1 %v9965_v24  ;;  %4768 = vmatprep.mubr.bf16.mxu0 %v9965_v24  ;;  %v7487_v38 = vld [vmem:[%s10508_s22 + $0x44] ss:$8 sps:$4 sm:$0xff]  }
 0xbe4   :  { %v4282_v31 = vmax.f32 %v4262_v55, 0.0  ;;  %7006 = vmatpush1.bf16.msra.mxu1 %v9972_v41  ;;  %4769 = vmatmul.mubr.bf16.vlgmr.msra.gmra.mrb[136].mxu0 %v9972_v41  ;;  %v9997_v8 = vmul.f32 %v4309_v13, %v4280_v3 }
 0xbe5   :  { %v4283_v21 = vmax.f32 %v4263_v15, 0.0  ;;  %v4227_v11 = vpop.f32.mrb[192].mxu1  ;;  %4980 = vmatpush1.bf16.msra.mxu0 %v7473_v14  ;;  %v9992_v48 = vmul.f32 %v4309_v13, %v4281_v35 }
 0xbe6   :  { %v9986_v0 = vmul.f32 %v4314_v46, %v4282_v31  ;;  %v4228_v63 = vadd.f32 %v4227_v11, %v9933_v39  ;;  %v4229_v61 = vpop.f32.mrb[193].mxu1  ;;  %4981 = vmatprep.subr.bf16.mxu0 %v7478_v6 }
 0xbe7   :  { %v9994_v17 = vmul.f32 %v4314_v46, %v4283_v21  ;;  %v4230_v53 = vadd.f32 %v4229_v61, %v9936_v47  ;;  %v4231_v22 = vpop.f32.mrb[194].mxu1 }
 0xbe8   :  { %v4264_v32 = vadd.f32 %v4228_v63, %v9877_v60  ;;  %v4232_v49 = vadd.f32 %v4231_v22, %v9933_v39  ;;  %v4233_v40 = vpop.f32.mrb[195].mxu1  ;;  %v10012_v57 = vpack.c.bf16 %v9986_v0, %v9997_v8  ;;  %v4334_v22 = vpop.permute.xlu1 %4333 }
 0xbe9   :  { %v4265_v18 = vadd.f32 %v4230_v53, %v9879_v25  ;;  %v4234_v19 = vadd.f32 %v4233_v40, %v9936_v47  ;;  %v10005_v51 = vpack.c.bf16 %v9994_v17, %v9992_v48  ;;  %4982 = vmatpush1.bf16.msra.mxu0 %v7476_v5  ;;  %v7484_v25 = vld [vmem:[%s10508_s22 + $0x34] ss:$8 sps:$4 sm:$0xff]   ;;  %v7485_v5 = vld [vmem:[%s10508_s22 + $0x40] ss:$8 sps:$4 sm:$0xff]   ;;  %v4329_v40 = vpop.permute.xlu0 %4328 }
 0xbea   :  { %v4266_v60 = vadd.f32 %v4232_v49, %v9881_v50  ;;  %4983 = vmatprep.subr.bf16.mxu0 %v7481_v30  ;;  %v4284_v62 = vmax.f32 %v4264_v32, 0.0  ;;  %v7488_v49 = vld [vmem:[%s10508_s22 + $0x50] ss:$8 sps:$4 sm:$0xff]  }
 0xbeb   :  { %v4285_v52 = vmax.f32 %v4265_v18, 0.0  ;;  %v4267_v42 = vadd.f32 %v4234_v19, %v9885_v7  ;;  %7008 = vmatprep.subr.bf16.mxu1 %v10005_v51  ;;  %4778 = vmatprep.mubr.bf16.mxu0 %v10005_v51 }
 0xbec   :  { %v4286_v20 = vmax.f32 %v4266_v60, 0.0  ;;  %7010 = vmatpush1.bf16.msra.mxu1 %v10012_v57  ;;  %4779 = vmatmul.mubr.bf16.gmra.mrb[140].mxu0 %v10012_v57  ;;  %v10037_v35 = vmul.f32 %v4319_v16, %v4284_v62 }
 0xbed   :  { %v4287_v50 = vmax.f32 %v4267_v42, 0.0  ;;  %v4237_v27 = vpop.f32.mrb[196].mxu1  ;;  %4984 = vmatpush1.bf16.msra.mxu0 %v7479_v4  ;;  %v10032_v10 = vmul.f32 %v4319_v16, %v4285_v52  ;;  %v7493_v4 = vld [vmem:[%s10508_s22 + $0x64] ss:$8 sps:$4 sm:$0xff]  }
 0xbee   :  { %v10026_v7 = vmul.f32 %v4324_v36, %v4286_v20  ;;  %v4238_v58 = vadd.f32 %v4237_v27, %v9933_v39  ;;  %v4239_v29 = vpop.f32.mrb[197].mxu1  ;;  %4985 = vmatprep.subr.bf16.mxu0 %v7484_v25 }
 0xbef   :  { %v10034_v14 = vmul.f32 %v4324_v36, %v4287_v50  ;;  %v4240_v55 = vadd.f32 %v4239_v29, %v9936_v47  ;;  %v4241_v6 = vpop.f32.mrb[198].mxu1 }
 0xbf0   :  { %v4268_v15 = vadd.f32 %v4238_v58, %v9889_v44  ;;  %v4242_v3 = vadd.f32 %v4241_v6, %v9933_v39  ;;  %v4243_v31 = vpop.f32.mrb[199].mxu1  ;;  %v10052_v13 = vpack.c.bf16 %v10026_v7, %v10037_v35  ;;  %v7491_v58 = vld [vmem:[%s10508_s22 + $0x60] ss:$8 sps:$4 sm:$0xff]   ;;  %v4344_v6 = vpop.permute.xlu1 %4343 }
 0xbf1   :  { %v4269_v46 = vadd.f32 %v4240_v55, %v9891_v59  ;;  %v4244_v21 = vadd.f32 %v4243_v31, %v9936_v47  ;;  %v10045_v11 = vpack.c.bf16 %v10034_v14, %v10032_v10  ;;  %4986 = vmatpush1.bf16.msra.mxu0 %v7482_v43  ;;  %v7490_v59 = vld [vmem:[%s10508_s22 + $0x54] ss:$8 sps:$4 sm:$0xff]  }
 0xbf2   :  { %v4270_v44 = vadd.f32 %v4242_v3, %v9893_v45  ;;  %4987 = vmatprep.subr.bf16.mxu0 %v7487_v38  ;;  %v4288_v30 = vmax.f32 %v4268_v15, 0.0  ;;  %v4339_v3 = vpop.permute.xlu0 %4338 }
 0xbf3   :  { %v4289_v63 = vmax.f32 %v4269_v46, 0.0  ;;  %v4271_v61 = vadd.f32 %v4244_v21, %v9897_v12  ;;  %7012 = vmatprep.subr.bf16.mxu1 %v10045_v11  ;;  %4788 = vmatprep.mubr.bf16.mxu0 %v10045_v11 }
 0xbf4   :  { %v4290_v53 = vmax.f32 %v4270_v44, 0.0  ;;  %7014 = vmatpush1.bf16.msra.mxu1 %v10052_v13  ;;  %4789 = vmatmul.mubr.bf16.gmra.mrb[144].mxu0 %v10052_v13  ;;  %v10077_v62 = vmul.f32 %v4329_v40, %v4288_v30  ;;  %v7500_v30 = vld [vmem:[%s10508_s22 + $0x90] ss:$8 sps:$4 sm:$0xff]  }
 0xbf5   :  { %v4291_v45 = vmax.f32 %v4271_v61, 0.0  ;;  %v4247_v32 = vpop.f32.mrb[200].mxu1  ;;  %4988 = vmatpush1.bf16.msra.mxu0 %v7485_v5  ;;  %v10072_v60 = vmul.f32 %v4329_v40, %v4289_v63  ;;  %v7502_v61 = vld [vmem:[%s10508_s22 + $0x94] ss:$8 sps:$4 sm:$0xff]  }
 0xbf6   :  { %v10066_v12 = vmul.f32 %v4334_v22, %v4290_v53  ;;  %v4248_v18 = vadd.f32 %v4247_v32, %v9933_v39  ;;  %v4249_v19 = vpop.f32.mrb[201].mxu1  ;;  %4989 = vmatprep.subr.bf16.mxu0 %v7490_v59  ;;  %v7497_v59 = vld [vmem:[%s10508_s22 + $0x80] ss:$8 sps:$4 sm:$0xff]   ;;  %v7505_v53 = vld [vmem:[%s10508_s22 + $0xa4] ss:$8 sps:$4 sm:$0xff]   ;;  %v7592_v40 = vld [vmem:[%s10506_s0 + $0x18] sm:$0xff] }
 0xbf7   :  { %v10074_v25 = vmul.f32 %v4334_v22, %v4291_v45  ;;  %v4250_v52 = vadd.f32 %v4249_v19, %v9936_v47  ;;  %v4251_v42 = vpop.f32.mrb[202].mxu1  ;;  %v7589_v22 = vld [vmem:[%s10506_s0] sm:$0xff]  ;;  %v7508_v45 = vld [vmem:[%s10508_s22 + $0xb4] ss:$8 sps:$4 sm:$0xff]   ;;  %v7590_v32 = vld [vmem:[%s10506_s0 + $0x8] sm:$0xff] }
 0xbf8   :  { %v4272_v20 = vadd.f32 %v4248_v18, %v9901_v9  ;;  %v4252_v36 = vadd.f32 %v4251_v42, %v9933_v39  ;;  %v4253_v50 = vpop.f32.mrb[203].mxu1  ;;  %v10090_v29 = vpack.c.bf16 %v10066_v12, %v10077_v62  ;;  %v7517_v18 = vld [vmem:[%s10508_s22 + $0xe4] ss:$8 sps:$4 sm:$0xff]   ;;  %v7595_v42 = vld [vmem:[%s10506_s0 + $0x30] sm:$0xff] }
 0xbf9   :  { %v4273_v27 = vadd.f32 %v4250_v52, %v9903_v2  ;;  %v4254_v43 = vadd.f32 %v4253_v50, %v9936_v47  ;;  %v7015_v16 = vpack.c.bf16 %v10074_v25, %v10072_v60  ;;  %4990 = vmatpush1.bf16.msra.mxu0 %v7488_v49  ;;  %v7496_v2 = vld [vmem:[%s10508_s22 + $0x74] ss:$8 sps:$4 sm:$0xff]   ;;  %v7593_v19 = vld [vmem:[%s10506_s0 + $0x20] sm:$0xff]  ;;  %v7594_v52 = vld [vmem:[%s10506_s0 + $0x28] sm:$0xff] }
 0xbfa   :  { %v4274_v9 = vadd.f32 %v4252_v36, %v9905_v54  ;;  %4991 = vmatprep.subr.bf16.mxu0 %v7493_v4  ;;  %v4292_v38 = vmax.f32 %v4272_v20, 0.0  ;;  %v7494_v54 = vld [vmem:[%s10508_s22 + $0x70] ss:$8 sps:$4 sm:$0xff]   ;;  %v7515_v4 = vld [vmem:[%s10508_s22 + $0xe0] ss:$8 sps:$4 sm:$0xff]  }
 0xbfb   :  { %v4293_v39 = vmax.f32 %v4273_v27, 0.0  ;;  %v4275_v47 = vadd.f32 %v4254_v43, %v9909_v23  ;;  %7016 = vmatprep.subr.bf16.mxu1 %v7015_v16  ;;  %4798 = vmatprep.mubr.bf16.mxu0 %v7015_v16  ;;  %v7499_v23 = vld [vmem:[%s10508_s22 + $0x84] ss:$8 sps:$4 sm:$0xff]   ;;  %v7591_v49 = vld [vmem:[%s10506_s0 + $0x10] sm:$0xff]  ;;  %v7596_v20 = vld [vmem:[%s10506_s0 + $0x38] sm:$0xff] }
 0xbfc   :  { %v4294_v55 = vmax.f32 %v4274_v9, 0.0  ;;  %7018 = vmatpush1.bf16.msra.mxu1 %v10090_v29  ;;  %4799 = vmatmul.mubr.bf16.gmra.mrb[148].mxu0 %v10090_v29  ;;  %v10111_v5 = vmul.f32 %v4339_v3, %v4292_v38  ;;  %v7597_v36 = vld [vmem:[%s10506_s0 + $0x40] sm:$0xff]  ;;  %v7598_v50 = vld [vmem:[%s10506_s0 + $0x48] sm:$0xff] }
 0xbfd   :  { %v4295_v15 = vmax.f32 %v4275_v47, 0.0  ;;  %4992 = vmatpush1.bf16.msra.mxu0 %v7491_v58  ;;  %v10107_v46 = vmul.f32 %v4339_v3, %v4293_v39  ;;  %v7599_v27 = vld [vmem:[#allocation2] sm:$0xff]  ;;  %v7600_v43 = vld [vmem:[#allocation2 + $0x8] sm:$0xff]  ;;  %v7602_v58 = vld [vmem:[#allocation2 + $0x18] sm:$0xff] }
 0xbfe   :  { %v10102_v31 = vmul.f32 %v4344_v6, %v4294_v55  ;;  %4993 = vmatprep.subr.bf16.mxu0 %v7496_v2  ;;  %v7604_v9 = vld [vmem:[#allocation2 + $0x28] sm:$0xff]  ;;  %v7605_v2 = vld [vmem:[#allocation2 + $0x30] sm:$0xff]  ;;  %v7606_v39 = vld [vmem:[#allocation2 + $0x38] sm:$0xff] }
 0xbff   :  { %v10109_v21 = vmul.f32 %v4344_v6, %v4295_v15  ;;  %v7607_v47 = vld [vmem:[#allocation2 + $0x40] sm:$0xff]  ;;  %v7608_v38 = vld [vmem:[#allocation2 + $0x48] sm:$0xff]  ;;  %v7520_v55 = vld [vmem:[%s10508_s22 + $0xf4] ss:$8 sps:$4 sm:$0xff]  }
 0xc00   :  { %v7021_v63 = vpack.c.bf16 %v10102_v31, %v10111_v5  ;;  %v7518_v6 = vld [vmem:[%s10508_s22 + $0xf0] ss:$8 sps:$4 sm:$0xff]   ;;  %v7523_v15 = vld [vmem:[%s10508_s22 + $0x204] ss:$8 sps:$4 sm:$0xff]  }
 0xc01   :  { %v7019_v44 = vpack.c.bf16 %v10109_v21, %v10107_v46  ;;  %4994 = vmatpush1.bf16.msra.mxu0 %v7494_v54 }
 0xc02   :  { %4995 = vmatprep.subr.bf16.mxu0 %v7499_v23 }
 0xc03   :  { %7020 = vmatprep.subr.bf16.mxu1 %v7019_v44  ;;  %4808 = vmatprep.mubr.bf16.mxu0 %v7019_v44 }
 0xc04   :  { %7022 = vmatpush1.bf16.msra.mxu1 %v7021_v63  ;;  %4809 = vmatmul.mubr.bf16.gmra.mrb[152].mxu0 %v7021_v63 }
 0xc05   :  { %7024 = vmatprep.subr.bf16.mxu1 %v9965_v24  ;;  %4996 = vmatpush1.bf16.msra.mxu0 %v7497_v59  ;;  %v7503_v24 = vld [vmem:[%s10508_s22 + $0xa0] ss:$8 sps:$4 sm:$0xff]  }
 0xc06   :  { %4997 = vmatprep.subr.bf16.mxu0 %v7502_v61  ;;  %v7526_v61 = vld [vmem:[%s10508_s22 + $0x214] ss:$8 sps:$4 sm:$0xff]  }
 0xc07   :  { %6086 = vmatmul.mubr.msk.f32.vlgmr.msra.gmra.mrb[204].mxu1 %vm459_vm2, %v7589_v22  ;;  %v7524_v22 = vld [vmem:[%s10508_s22 + $0x210] ss:$8 sps:$4 sm:$0xff]  }
 0xc08   :  { %7026 = vmatpush1.bf16.msra.mxu1 %v9972_v41  ;;  %4436 = vmatprep.mubr.f32.mxu1 %v7904_v1  ;;  %v7506_v41 = vld [vmem:[%s10508_s22 + $0xb0] ss:$8 sps:$4 sm:$0xff]  }
 0xc09   :  { %7028 = vmatprep.subr.bf16.mxu1 %v10005_v51  ;;  %4998 = vmatpush1.bf16.msra.mxu0 %v7500_v30  ;;  %v7511_v51 = vld [vmem:[%s10508_s22 + $0xc4] ss:$8 sps:$4 sm:$0xff]  }
 0xc0a   :  { %4999 = vmatprep.subr.bf16.mxu0 %v7505_v53 }
 0xc0b   :  { %6087 = vmatmul.mubr.msk.f32.gmra.mrb[206].mxu1 %vm459_vm2, %v7590_v32 }
 0xc0c   :  { %7030 = vmatpush1.bf16.msra.mxu1 %v10012_v57  ;;  %4442 = vmatprep.mubr.f32.mxu1 %v7904_v1  ;;  %v7509_v57 = vld [vmem:[%s10508_s22 + $0xc0] ss:$8 sps:$4 sm:$0xff]  }
 0xc0d   :  { %7032 = vmatprep.subr.bf16.mxu1 %v10045_v11  ;;  %5000 = vmatpush1.bf16.msra.mxu0 %v7503_v24  ;;  %v7514_v11 = vld [vmem:[%s10508_s22 + $0xd4] ss:$8 sps:$4 sm:$0xff]   ;;  %v7529_v24 = vld [vmem:[%s10508_s22 + $0x224] ss:$8 sps:$4 sm:$0xff]  }
 0xc0e   :  { %5001 = vmatprep.subr.bf16.mxu0 %v7508_v45 }
 0xc0f   :  { %6088 = vmatmul.mubr.msk.f32.gmra.mrb[208].mxu1 %vm459_vm2, %v7591_v49 }
 0xc10   :  { %7034 = vmatpush1.bf16.msra.mxu1 %v10052_v13  ;;  %4448 = vmatprep.mubr.f32.mxu1 %v7904_v1  ;;  %v7512_v13 = vld [vmem:[%s10508_s22 + $0xd0] ss:$8 sps:$4 sm:$0xff]  }
 0xc11   :  { %7036 = vmatprep.subr.bf16.mxu1 %v7015_v16  ;;  %5002 = vmatpush1.bf16.msra.mxu0 %v7506_v41  ;;  %v7601_v16 = vld [vmem:[#allocation2 + $0x10] sm:$0xff] }
 0xc12   :  { %5003 = vmatprep.subr.bf16.mxu0 %v7511_v51  ;;  %v7527_v51 = vld [vmem:[%s10508_s22 + $0x220] ss:$8 sps:$4 sm:$0xff]  }
 0xc13   :  { %6089 = vmatmul.mubr.msk.f32.gmra.mrb[210].mxu1 %vm459_vm2, %v7592_v40 }
 0xc14   :  { %7038 = vmatpush1.bf16.msra.mxu1 %v10090_v29  ;;  %4454 = vmatprep.mubr.f32.mxu1 %v7904_v1  ;;  %v7603_v29 = vld [vmem:[#allocation2 + $0x20] sm:$0xff] }
 0xc15   :  { %7040 = vmatprep.subr.bf16.mxu1 %v7019_v44  ;;  %5004 = vmatpush1.bf16.msra.mxu0 %v7509_v57  ;;  %v7532_v57 = vld [vmem:[%s10508_s22 + $0x234] ss:$8 sps:$4 sm:$0xff]  }
 0xc16   :  { %5005 = vmatprep.subr.bf16.mxu0 %v7514_v11 }
 0xc17   :  { %6090 = vmatmul.mubr.msk.f32.gmra.mrb[212].mxu1 %vm459_vm2, %v7593_v19 }
 0xc18   :  { %7042 = vmatpush1.bf16.msra.mxu1 %v7021_v63  ;;  %4460 = vmatprep.mubr.f32.mxu1 %v7904_v1  ;;  %v7521_v63 = vld [vmem:[%s10508_s22 + $0x200] ss:$8 sps:$4 sm:$0xff]  }
 0xc19   :  { %5006 = vmatpush1.bf16.msra.mxu0 %v7512_v13  ;;  %v7530_v13 = vld [vmem:[%s10508_s22 + $0x230] ss:$8 sps:$4 sm:$0xff]  }
 0xc1a   :  { %5007 = vmatprep.subr.bf16.mxu0 %v7517_v18  ;;  %v7535_v18 = vld [vmem:[%s10508_s22 + $0x244] ss:$8 sps:$4 sm:$0xff]  }
 0xc1b   :  { %6091 = vmatmul.mubr.msk.f32.gmra.mrb[214].mxu1 %vm459_vm2, %v7594_v52 }
 0xc1c   :  { %4466 = vmatprep.mubr.f32.mxu1 %v7904_v1 }
 0xc1d   :  { %5008 = vmatpush1.bf16.msra.mxu0 %v7515_v4 }
 0xc1e   :  { %5009 = vmatprep.subr.bf16.mxu0 %v7520_v55 }
 0xc1f   :  { %6092 = vmatmul.mubr.msk.f32.gmra.mrb[216].mxu1 %vm459_vm2, %v7595_v42  ;;  %v7533_v42 = vld [vmem:[%s10508_s22 + $0x240] ss:$8 sps:$4 sm:$0xff]  }
 0xc20   :  { %4472 = vmatprep.mubr.f32.mxu1 %v7904_v1 }
 0xc21   :  { %5010 = vmatpush1.bf16.msra.mxu0 %v7518_v6  ;;  %v7542_v6 = vld [vmem:[%s10508_s22 + $0x270] ss:$8 sps:$4 sm:$0xff]  }
 0xc22   :  { %5390 = vmatprep.subr.bf16.mxu0 %v7523_v15  ;;  %v7547_v15 = vld [vmem:[%s10508_s22 + $0x284] ss:$8 sps:$4 sm:$0xff]  }
 0xc23   :  { %6093 = vmatmul.mubr.msk.f32.gmra.mrb[218].mxu1 %vm459_vm2, %v7596_v20 }
 0xc24   :  { %4478 = vmatprep.mubr.f32.mxu1 %v7904_v1 }
 0xc27   :  { %6094 = vmatmul.mubr.msk.f32.gmra.mrb[220].mxu1 %vm459_vm2, %v7597_v36  ;;  %v7538_v36 = vld [vmem:[%s10508_s22 + $0x254] ss:$8 sps:$4 sm:$0xff]  }
 0xc28   :  { %4484 = vmatprep.mubr.f32.mxu1 %v7904_v1 }
 0xc2b   :  { %6095 = vmatmul.mubr.msk.f32.gmra.mrb[222].mxu1 %vm459_vm2, %v7598_v50 }
 0xc2c   :  { %5126 = vmatprep.mubr.f32.mxu1 %v7904_v1 }
 0xc2f   :  { %6192 = vmatmul.mubr.msk.f32.vlgmr.msra.gmra.mrb[224].mxu1 %vm459_vm2, %v7599_v27 }
 0xc30   :  { %5132 = vmatprep.mubr.f32.mxu1 %v7904_v1 }
 0xc33   :  { %6193 = vmatmul.mubr.msk.f32.gmra.mrb[226].mxu1 %vm459_vm2, %v7600_v43  ;;  %v7536_v43 = vld [vmem:[%s10508_s22 + $0x250] ss:$8 sps:$4 sm:$0xff]  }
 0xc34   :  { %5138 = vmatprep.mubr.f32.mxu1 %v7904_v1 }
 0xc37   :  { %6194 = vmatmul.mubr.msk.f32.gmra.mrb[228].mxu1 %vm459_vm2, %v7601_v16  ;;  %v7541_v16 = vld [vmem:[%s10508_s22 + $0x264] ss:$8 sps:$4 sm:$0xff]  }
 0xc38   :  { %5144 = vmatprep.mubr.f32.mxu1 %v7904_v1 }
 0xc3b   :  { %6195 = vmatmul.mubr.msk.f32.gmra.mrb[230].mxu1 %vm459_vm2, %v7602_v58 }
 0xc3c   :  { %5150 = vmatprep.mubr.f32.mxu1 %v7904_v1 }
 0xc3f   :  { %6196 = vmatmul.mubr.msk.f32.gmra.mrb[232].mxu1 %vm459_vm2, %v7603_v29 }
 0xc40   :  { %5156 = vmatprep.mubr.f32.mxu1 %v7904_v1 }
 0xc43   :  { %6197 = vmatmul.mubr.msk.f32.gmra.mrb[234].mxu1 %vm459_vm2, %v7604_v9 }
 0xc44   :  { %5162 = vmatprep.mubr.f32.mxu1 %v7904_v1 }
 0xc47   :  { %6198 = vmatmul.mubr.msk.f32.gmra.mrb[236].mxu1 %vm459_vm2, %v7605_v2  ;;  %v7539_v2 = vld [vmem:[%s10508_s22 + $0x260] ss:$8 sps:$4 sm:$0xff]  }
 0xc48   :  { %5168 = vmatprep.mubr.f32.mxu1 %v7904_v1 }
 0xc4b   :  { %6199 = vmatmul.mubr.msk.f32.gmra.mrb[238].mxu1 %vm459_vm2, %v7606_v39 }
 0xc4c   :  { %5174 = vmatprep.mubr.f32.mxu1 %v7904_v1 }
 0xc4f   :  { %6200 = vmatmul.mubr.msk.f32.gmra.mrb[240].mxu1 %vm459_vm2, %v7607_v47  ;;  %v7544_v47 = vld [vmem:[%s10508_s22 + $0x274] ss:$8 sps:$4 sm:$0xff]  }
 0xc50   :  { %5180 = vmatprep.mubr.f32.mxu1 %v7904_v1 }
 0xc53   :  { %6201 = vmatmul.mubr.msk.f32.gmra.mrb[242].mxu1 %vm459_vm2, %v7608_v38 }
 0xcda   :  { %v4432_v54 = vpop.f32.mrb[204].mxu1 }
 0xcdb   :  { %v4434_v1 = vpop.f32.mrb[205].mxu1 }
 0xcde   :  { %v4438_v3 = vpop.f32.mrb[206].mxu1 }
 0xcdf   :  { %v4491_v23 = vpack.c.bf16 %v4438_v3, %v4432_v54  ;;  %v4440_v44 = vpop.f32.mrb[207].mxu1 }
 0xce0   :  { %v4492_v59 = vpack.c.bf16 %v4440_v44, %v4434_v1 }
 0xce2   :  { %5011 = vmatprep.mubr.bf16.mxu0 %v4492_v59  ;;  %v4444_v30 = vpop.f32.mrb[208].mxu1  ;;  %v7550_v59 = vld [vmem:[%s10508_s22 + $0x294] ss:$8 sps:$4 sm:$0xff]  }
 0xce3   :  { %5012 = vmatmul.mubr.bf16.vlgmr.msra.gmra.mrb[136].mxu0 %v4491_v23  ;;  %v4446_v53 = vpop.f32.mrb[209].mxu1  ;;  %v7545_v23 = vld [vmem:[%s10508_s22 + $0x280] ss:$8 sps:$4 sm:$0xff]  }
 0xce4   :  { %5391 = vmatpush1.bf16.msra.mxu0 %v7521_v63 }
 0xce5   :  { %5392 = vmatprep.subr.bf16.mxu0 %v7526_v61 }
 0xce6   :  { %v4450_v45 = vpop.f32.mrb[210].mxu1 }
 0xce7   :  { %v4493_v32 = vpack.c.bf16 %v4450_v45, %v4444_v30  ;;  %v4452_v41 = vpop.f32.mrb[211].mxu1  ;;  %v7548_v30 = vld [vmem:[%s10508_s22 + $0x290] ss:$8 sps:$4 sm:$0xff]  }
 0xce8   :  { %5393 = vmatpush1.bf16.msra.mxu0 %v7524_v22  ;;  %v4494_v49 = vpack.c.bf16 %v4452_v41, %v4446_v53  ;;  %v7553_v53 = vld [vmem:[%s10508_s22 + $0x2a4] ss:$8 sps:$4 sm:$0xff]  }
 0xce9   :  { %5394 = vmatprep.subr.bf16.mxu0 %v7529_v24 }
 0xcea   :  { %5021 = vmatprep.mubr.bf16.mxu0 %v4494_v49  ;;  %v4456_v11 = vpop.f32.mrb[212].mxu1 }
 0xceb   :  { %5022 = vmatmul.mubr.bf16.gmra.mrb[140].mxu0 %v4493_v32  ;;  %v4458_v40 = vpop.f32.mrb[213].mxu1  ;;  %v7551_v32 = vld [vmem:[%s10508_s22 + $0x2a0] ss:$8 sps:$4 sm:$0xff]  }
 0xcec   :  { %5395 = vmatpush1.bf16.msra.mxu0 %v7527_v51  ;;  %v7556_v51 = vld [vmem:[%s10508_s22 + $0x2b4] ss:$8 sps:$4 sm:$0xff]  }
 0xced   :  { %5396 = vmatprep.subr.bf16.mxu0 %v7532_v57 }
 0xcee   :  { %v4462_v19 = vpop.f32.mrb[214].mxu1 }
 0xcef   :  { %v4495_v4 = vpack.c.bf16 %v4462_v19, %v4456_v11  ;;  %v4464_v52 = vpop.f32.mrb[215].mxu1  ;;  %v7554_v11 = vld [vmem:[%s10508_s22 + $0x2b0] ss:$8 sps:$4 sm:$0xff]  }
 0xcf0   :  { %5397 = vmatpush1.bf16.msra.mxu0 %v7530_v13  ;;  %v4496_v20 = vpack.c.bf16 %v4464_v52, %v4458_v40  ;;  %v7559_v40 = vld [vmem:[%s10508_s22 + $0x2c4] ss:$8 sps:$4 sm:$0xff]  }
 0xcf1   :  { %5398 = vmatprep.subr.bf16.mxu0 %v7535_v18 }
 0xcf2   :  { %5031 = vmatprep.mubr.bf16.mxu0 %v4496_v20  ;;  %v4468_v50 = vpop.f32.mrb[216].mxu1 }
 0xcf3   :  { %5032 = vmatmul.mubr.bf16.gmra.mrb[144].mxu0 %v4495_v4  ;;  %v4470_v27 = vpop.f32.mrb[217].mxu1  ;;  %v7557_v4 = vld [vmem:[%s10508_s22 + $0x2c0] ss:$8 sps:$4 sm:$0xff]  }
 0xcf4   :  { %5399 = vmatpush1.bf16.msra.mxu0 %v7533_v42  ;;  %v7562_v42 = vld [vmem:[%s10508_s22 + $0x2d4] ss:$8 sps:$4 sm:$0xff]  }
 0xcf5   :  { %5400 = vmatprep.subr.bf16.mxu0 %v7538_v36 }
 0xcf6   :  { %v4474_v58 = vpop.f32.mrb[218].mxu1 }
 0xcf7   :  { %v4497_v29 = vpack.c.bf16 %v4474_v58, %v4468_v50  ;;  %v4476_v9 = vpop.f32.mrb[219].mxu1  ;;  %v7560_v50 = vld [vmem:[%s10508_s22 + $0x2d0] ss:$8 sps:$4 sm:$0xff]  }
 0xcf8   :  { %5401 = vmatpush1.bf16.msra.mxu0 %v7536_v43  ;;  %v4498_v39 = vpack.c.bf16 %v4476_v9, %v4470_v27  ;;  %v7565_v27 = vld [vmem:[%s10508_s22 + $0x2e4] ss:$8 sps:$4 sm:$0xff]  }
 0xcf9   :  { %5402 = vmatprep.subr.bf16.mxu0 %v7541_v16 }
 0xcfa   :  { %5041 = vmatprep.mubr.bf16.mxu0 %v4498_v39  ;;  %v4480_v38 = vpop.f32.mrb[220].mxu1 }
 0xcfb   :  { %5042 = vmatmul.mubr.bf16.gmra.mrb[148].mxu0 %v4497_v29  ;;  %v4482_v55 = vpop.f32.mrb[221].mxu1  ;;  %v7563_v29 = vld [vmem:[%s10508_s22 + $0x2e0] ss:$8 sps:$4 sm:$0xff]  }
 0xcfc   :  { %5403 = vmatpush1.bf16.msra.mxu0 %v7539_v2  ;;  %v7568_v2 = vld [vmem:[%s10508_s22 + $0x2f4] ss:$8 sps:$4 sm:$0xff]  }
 0xcfd   :  { %5404 = vmatprep.subr.bf16.mxu0 %v7544_v47 }
 0xcfe   :  { %v4486_v54 = vpop.f32.mrb[222].mxu1 }
 0xcff   :  { %v4499_v1 = vpack.c.bf16 %v4486_v54, %v4480_v38  ;;  %v4488_v3 = vpop.f32.mrb[223].mxu1  ;;  %v7566_v38 = vld [vmem:[%s10508_s22 + $0x2f0] ss:$8 sps:$4 sm:$0xff]  }
 0xd00   :  { %5405 = vmatpush1.bf16.msra.mxu0 %v7542_v6  ;;  %v4500_v44 = vpack.c.bf16 %v4488_v3, %v4482_v55 }
 0xd01   :  { %5406 = vmatprep.subr.bf16.mxu0 %v7547_v15 }
 0xd02   :  { %5051 = vmatprep.mubr.bf16.mxu0 %v4500_v44  ;;  %v5128_v63 = vpop.f32.mrb[224].mxu1 }
 0xd03   :  { %5052 = vmatmul.mubr.bf16.gmra.mrb[152].mxu0 %v4499_v1  ;;  %v5130_v61 = vpop.f32.mrb[225].mxu1 }
 0xd04   :  { %5407 = vmatpush1.bf16.msra.mxu0 %v7545_v23 }
 0xd05   :  { %5408 = vmatprep.subr.bf16.mxu0 %v7550_v59 }
 0xd06   :  { %v5134_v22 = vpop.f32.mrb[226].mxu1 }
 0xd07   :  { %v5187_v24 = vpack.c.bf16 %v5134_v22, %v5128_v63  ;;  %v5136_v45 = vpop.f32.mrb[227].mxu1 }
 0xd08   :  { %5409 = vmatpush1.bf16.msra.mxu0 %v7548_v30  ;;  %v5188_v41 = vpack.c.bf16 %v5136_v45, %v5130_v61  ;;  %v5493_v61 = vld [vmem:[#allocation19] sm:$0x3] }
 0xd09   :  { %5410 = vmatprep.subr.bf16.mxu0 %v7553_v53  ;;  %v10335_v30 = vrot.slane %v5493_v61, %v9136_v28  ;;  %v10338_v53 = vrot.slane %v5493_v61, %v9138_v37 }
 0xd0a   :  { %5422 = vmatprep.mubr.bf16.mxu0 %v5188_v41  ;;  %v5140_v49 = vpop.f32.mrb[228].mxu1 }
 0xd0b   :  { %v5142_v57 = vpop.f32.mrb[229].mxu1 }
 0xd0c   :  { %5411 = vmatpush1.bf16.msra.mxu0 %v7551_v32 }
 0xd0d   :  { %5412 = vmatprep.subr.bf16.mxu0 %v7556_v51 }
 0xd0e   :  { %v5146_v13 = vpop.f32.mrb[230].mxu1 }
 0xd0f   :  { %v5189_v18 = vpack.c.bf16 %v5146_v13, %v5140_v49  ;;  %v5148_v19 = vpop.f32.mrb[231].mxu1  ;;  %v5578_v13 = vpop.permute.xlu0 %5577 }
 0xd10   :  { %5413 = vmatpush1.bf16.msra.mxu0 %v7554_v11  ;;  %v5190_v52 = vpack.c.bf16 %v5148_v19, %v5142_v57 }
 0xd11   :  { %5414 = vmatprep.subr.bf16.mxu0 %v7559_v40 }
 0xd12   :  { %v5152_v20 = vpop.f32.mrb[232].mxu1 }
 0xd13   :  { %v5154_v36 = vpop.f32.mrb[233].mxu1 }
 0xd14   :  { %5415 = vmatpush1.bf16.msra.mxu0 %v7557_v4 }
 0xd15   :  { %5416 = vmatprep.subr.bf16.mxu0 %v7562_v42  ;;  %v5583_v42 = vpop.permute.xlu1 %5582 }
 0xd16   :  { %v5158_v43 = vpop.f32.mrb[234].mxu1 }
 0xd17   :  { %v5191_v16 = vpack.c.bf16 %v5158_v43, %v5152_v20  ;;  %v5160_v58 = vpop.f32.mrb[235].mxu1 }
 0xd18   :  { %5417 = vmatpush1.bf16.msra.mxu0 %v7560_v50  ;;  %v5192_v9 = vpack.c.bf16 %v5160_v58, %v5154_v36 }
 0xd19   :  { %5418 = vmatprep.subr.bf16.mxu0 %v7565_v27 }
 0xd1a   :  { %v5164_v39 = vpop.f32.mrb[236].mxu1 }
 0xd1b   :  { %v5166_v47 = vpop.f32.mrb[237].mxu1 }
 0xd1c   :  { %5419 = vmatpush1.bf16.msra.mxu0 %v7563_v29 }
 0xd1d   :  { %5420 = vmatprep.subr.bf16.mxu0 %v7568_v2 }
 0xd1e   :  { %v5170_v55 = vpop.f32.mrb[238].mxu1 }
 0xd1f   :  { %v5193_v6 = vpack.c.bf16 %v5170_v55, %v5164_v39  ;;  %v5172_v15 = vpop.f32.mrb[239].mxu1 }
 0xd20   :  { %5421 = vmatpush1.bf16.msra.mxu0 %v7566_v38  ;;  %v5194_v54 = vpack.c.bf16 %v5172_v15, %v5166_v47  ;;  %v5588_v38 = vpop.permute.xlu0 %5587 }
 0xd22   :  { %v5176_v1 = vpop.f32.mrb[240].mxu1 }
 0xd23   :  { %5423 = vmatmul.mubr.bf16.vlgmr.msra.gmra.mrb[136].mxu0 %v5187_v24  ;;  %v5178_v3 = vpop.f32.mrb[241].mxu1 }
 0xd24   :  { %5432 = vmatprep.mubr.bf16.mxu0 %v5190_v52 }
 0xd26   :  { %v5182_v23 = vpop.f32.mrb[242].mxu1 }
 0xd27   :  { %v5195_v44 = vpack.c.bf16 %v5182_v23, %v5176_v1  ;;  %v5184_v59 = vpop.f32.mrb[243].mxu1 }
 0xd28   :  { %v5196_v63 = vpack.c.bf16 %v5184_v59, %v5178_v3 }
 0xd2b   :  { %5433 = vmatmul.mubr.bf16.gmra.mrb[140].mxu0 %v5189_v18 }
 0xd2c   :  { %5442 = vmatprep.mubr.bf16.mxu0 %v5192_v9 }
 0xd33   :  { %5443 = vmatmul.mubr.bf16.gmra.mrb[144].mxu0 %v5191_v16 }
 0xd34   :  { %5452 = vmatprep.mubr.bf16.mxu0 %v5194_v54  ;;  %v5593_v54 = vpop.permute.xlu1 %5592 }
 0xd3b   :  { %5453 = vmatmul.mubr.bf16.gmra.mrb[148].mxu0 %v5193_v6 }
 0xd3c   :  { %5462 = vmatprep.mubr.bf16.mxu0 %v5196_v63 }
 0xd43   :  { %5463 = vmatmul.mubr.bf16.gmra.mrb[152].mxu0 %v5195_v44 }
 0xdf6   :  { %v5424_v22 = vpop.f32.mrb[136].mxu0 }
 0xdf7   :  { %v5505_v24 = vadd.f32 %v10335_v30, %v5424_v22  ;;  %v5426_v45 = vpop.f32.mrb[137].mxu0 }
 0xdf8   :  { %v5506_v32 = vadd.f32 %v10338_v53, %v5426_v45  ;;  %v5428_v41 = vpop.f32.mrb[138].mxu0 }
 0xdf9   :  { %v5525_v51 = vadd.f32 %v5505_v24, %v9957_v26  ;;  %v5507_v49 = vadd.f32 %v10335_v30, %v5428_v41  ;;  %v5430_v57 = vpop.f32.mrb[139].mxu0 }
 0xdfa   :  { %v5526_v11 = vadd.f32 %v5506_v32, %v9952_v33  ;;  %v5508_v28 = vadd.f32 %v10338_v53, %v5430_v57 }
 0xdfb   :  { %v5545_v40 = vmax.f32 %v5525_v51, 0.0  ;;  %v5527_v37 = vadd.f32 %v5507_v49, %v9949_v34  ;;  %v5598_v49 = vpop.permute.xlu0 %5597 }
 0xdfc   :  { %v5546_v18 = vmax.f32 %v5526_v11, 0.0  ;;  %v5528_v19 = vadd.f32 %v5508_v28, %v9954_v56 }
 0xdfd   :  { %v5625_v4 = vmul.f32 %v5578_v13, %v5545_v40  ;;  %v5547_v52 = vmax.f32 %v5527_v37, 0.0  ;;  %v5603_v40 = vpop.permute.xlu1 %5602 }
 0xdfe   :  { %v5626_v20 = vmul.f32 %v5578_v13, %v5546_v18  ;;  %v5548_v36 = vmax.f32 %v5528_v19, 0.0  ;;  %v5434_v26 = vpop.f32.mrb[140].mxu0 }
 0xdff   :  { %5645 = vst [vmem:[%s10509_s15] sm:$0xff] %v5625_v4  ;;  %v5627_v33 = vmul.f32 %v5583_v42, %v5547_v52  ;;  %v5509_v50 = vadd.f32 %v10335_v30, %v5434_v26  ;;  %v5436_v27 = vpop.f32.mrb[141].mxu0 }
 0xe00   :  { %5646 = vst [vmem:[%s10509_s15 + $0x8] sm:$0xff] %v5626_v20  ;;  %v5628_v34 = vmul.f32 %v5583_v42, %v5548_v36  ;;  %v5510_v56 = vadd.f32 %v10338_v53, %v5436_v27  ;;  %v5438_v43 = vpop.f32.mrb[142].mxu0 }
 0xe01   :  { %5647 = vst [vmem:[%s10509_s15 + $0x10] sm:$0xff] %v5627_v33  ;;  %v5529_v16 = vadd.f32 %v5509_v50, %v9997_v8  ;;  %v5511_v58 = vadd.f32 %v10335_v30, %v5438_v43  ;;  %v5440_v29 = vpop.f32.mrb[143].mxu0 }
 0xe02   :  { %5648 = vst [vmem:[%s10509_s15 + $0x18] sm:$0xff] %v5628_v34  ;;  %v5530_v9 = vadd.f32 %v5510_v56, %v9992_v48  ;;  %v5512_v2 = vadd.f32 %v10338_v53, %v5440_v29  ;;  %v5608_v34 = vpop.permute.xlu0 %5607 }
 0xe03   :  { %v5549_v39 = vmax.f32 %v5529_v16, 0.0  ;;  %v5531_v47 = vadd.f32 %v5511_v58, %v9986_v0  ;;  %v5613_v58 = vpop.permute.xlu1 %5612 }
 0xe04   :  { %v5550_v55 = vmax.f32 %v5530_v9, 0.0  ;;  %v5532_v6 = vadd.f32 %v5512_v2, %v9994_v17 }
 0xe05   :  { %v5629_v15 = vmul.f32 %v5588_v38, %v5549_v39  ;;  %v5551_v8 = vmax.f32 %v5531_v47, 0.0 }
 0xe06   :  { %v5630_v1 = vmul.f32 %v5588_v38, %v5550_v55  ;;  %v5552_v3 = vmax.f32 %v5532_v6, 0.0  ;;  %v5444_v23 = vpop.f32.mrb[144].mxu0 }
 0xe07   :  { %5649 = vst [vmem:[%s10509_s15 + $0x20] sm:$0xff] %v5629_v15  ;;  %v5631_v48 = vmul.f32 %v5593_v54, %v5551_v8  ;;  %v5513_v44 = vadd.f32 %v10335_v30, %v5444_v23  ;;  %v5446_v59 = vpop.f32.mrb[145].mxu0  ;;  %v5618_v23 = vpop.permute.xlu0 %5617 }
 0xe08   :  { %5650 = vst [vmem:[%s10509_s15 + $0x28] sm:$0xff] %v5630_v1  ;;  %v5632_v0 = vmul.f32 %v5593_v54, %v5552_v3  ;;  %v5514_v17 = vadd.f32 %v10338_v53, %v5446_v59  ;;  %v5448_v63 = vpop.f32.mrb[146].mxu0 }
 0xe09   :  { %5651 = vst [vmem:[%s10509_s15 + $0x30] sm:$0xff] %v5631_v48  ;;  %v5533_v61 = vadd.f32 %v5513_v44, %v10037_v35  ;;  %v5515_v22 = vadd.f32 %v10335_v30, %v5448_v63  ;;  %v5450_v24 = vpop.f32.mrb[147].mxu0 }
 0xe0a   :  { %5652 = vst [vmem:[%s10509_s15 + $0x38] sm:$0xff] %v5632_v0  ;;  %v5534_v45 = vadd.f32 %v5514_v17, %v10032_v10  ;;  %v5516_v32 = vadd.f32 %v10338_v53, %v5450_v24  ;;  %v5623_v0 = vpop.permute.xlu1 %5622 }
 0xe0b   :  { %v5553_v41 = vmax.f32 %v5533_v61, 0.0  ;;  %v5535_v51 = vadd.f32 %v5515_v22, %v10026_v7 }
 0xe0c   :  { %v5554_v57 = vmax.f32 %v5534_v45, 0.0  ;;  %v5536_v11 = vadd.f32 %v5516_v32, %v10034_v14 }
 0xe0d   :  { %v5633_v28 = vmul.f32 %v5598_v49, %v5553_v41  ;;  %v5555_v35 = vmax.f32 %v5535_v51, 0.0 }
 0xe0e   :  { %v5634_v37 = vmul.f32 %v5598_v49, %v5554_v57  ;;  %v5556_v13 = vmax.f32 %v5536_v11, 0.0  ;;  %v5454_v18 = vpop.f32.mrb[148].mxu0 }
 0xe0f   :  { %5653 = vst [vmem:[%s10509_s15 + $0x40] sm:$0xff] %v5633_v28  ;;  %v5635_v10 = vmul.f32 %v5603_v40, %v5555_v35  ;;  %v5517_v19 = vadd.f32 %v10335_v30, %v5454_v18  ;;  %v5456_v4 = vpop.f32.mrb[149].mxu0 }
 0xe10   :  { %5654 = vst [vmem:[%s10509_s15 + $0x48] sm:$0xff] %v5634_v37  ;;  %v5636_v7 = vmul.f32 %v5603_v40, %v5556_v13  ;;  %v5518_v14 = vadd.f32 %v10338_v53, %v5456_v4  ;;  %v5458_v52 = vpop.f32.mrb[150].mxu0 }
 0xe11   :  { %5655 = vst [vmem:[%s10509_s15 + $0x50] sm:$0xff] %v5635_v10  ;;  %v5537_v42 = vadd.f32 %v5517_v19, %v10077_v62  ;;  %v5519_v20 = vadd.f32 %v10335_v30, %v5458_v52  ;;  %v5460_v36 = vpop.f32.mrb[151].mxu0 }
 0xe12   :  { %5656 = vst [vmem:[%s10509_s15 + $0x58] sm:$0xff] %v5636_v7  ;;  %v5538_v26 = vadd.f32 %v5518_v14, %v10072_v60  ;;  %v5520_v33 = vadd.f32 %v10338_v53, %v5460_v36 }
 0xe13   :  { %v5557_v50 = vmax.f32 %v5537_v42, 0.0  ;;  %v5539_v27 = vadd.f32 %v5519_v20, %v10066_v12 }
 0xe14   :  { %v5558_v56 = vmax.f32 %v5538_v26, 0.0  ;;  %v5540_v43 = vadd.f32 %v5520_v33, %v10074_v25 }
 0xe15   :  { %v5637_v16 = vmul.f32 %v5608_v34, %v5557_v50  ;;  %v5559_v62 = vmax.f32 %v5539_v27, 0.0 }
 0xe16   :  { %v5638_v29 = vmul.f32 %v5608_v34, %v5558_v56  ;;  %v5560_v9 = vmax.f32 %v5540_v43, 0.0  ;;  %v5464_v2 = vpop.f32.mrb[152].mxu0 }
 0xe17   :  { %5657 = vst [vmem:[%s10509_s15 + $0x60] sm:$0xff] %v5637_v16  ;;  %v5639_v60 = vmul.f32 %v5613_v58, %v5559_v62  ;;  %v5521_v39 = vadd.f32 %v10335_v30, %v5464_v2  ;;  %v5466_v47 = vpop.f32.mrb[153].mxu0 }
 0xe18   :  { %5658 = vst [vmem:[%s10509_s15 + $0x68] sm:$0xff] %v5638_v29  ;;  %v5640_v12 = vmul.f32 %v5613_v58, %v5560_v9  ;;  %v5522_v25 = vadd.f32 %v10338_v53, %v5466_v47  ;;  %v5468_v38 = vpop.f32.mrb[154].mxu0 }
 0xe19   :  { %5659 = vst [vmem:[%s10509_s15 + $0x70] sm:$0xff] %v5639_v60  ;;  %v5541_v55 = vadd.f32 %v5521_v39, %v10111_v5  ;;  %v5523_v6 = vadd.f32 %v10335_v30, %v5468_v38  ;;  %v5470_v15 = vpop.f32.mrb[155].mxu0 }
 0xe1a   :  { %5660 = vst [vmem:[%s10509_s15 + $0x78] sm:$0xff] %v5640_v12  ;;  %v5542_v8 = vadd.f32 %v5522_v25, %v10107_v46  ;;  %v5524_v54 = vadd.f32 %v10338_v53, %v5470_v15 }
 0xe1b   :  { %v5561_v1 = vmax.f32 %v5541_v55, 0.0  ;;  %v5543_v3 = vadd.f32 %v5523_v6, %v10102_v31 }
 0xe1c   :  { %v5562_v48 = vmax.f32 %v5542_v8, 0.0  ;;  %v5544_v44 = vadd.f32 %v5524_v54, %v10109_v21 }
 0xe1d   :  { %v5641_v59 = vmul.f32 %v5618_v23, %v5561_v1  ;;  %v5563_v5 = vmax.f32 %v5543_v3, 0.0 }
 0xe1e   :  { %v5642_v30 = vmul.f32 %v5618_v23, %v5562_v48  ;;  %v5564_v17 = vmax.f32 %v5544_v44, 0.0 }
 0xe1f   :  { %5661 = vst [vmem:[%s10509_s15 + $0x80] sm:$0xff] %v5641_v59  ;;  %v5643_v63 = vmul.f32 %v5623_v0, %v5563_v5 }
 0xe20   :  { %5662 = vst [vmem:[%s10509_s15 + $0x88] sm:$0xff] %v5642_v30  ;;  %v5644_v46 = vmul.f32 %v5623_v0, %v5564_v17 }
 0xe21   :  { %5663 = vst [vmem:[%s10509_s15 + $0x90] sm:$0xff] %v5643_v63 }
 0xe22   :  { %5664 = vst [vmem:[%s10509_s15 + $0x98] sm:$0xff] %v5644_v46 }
 0xe23   :  { %5669 = vsyncpa [#allocation3], 1 }
 0xe24   :  { %5670 = vsyncpa [#allocation5], 1 }
 0xe25   :  { %5671 = vsyncpa [#allocation8], 1 }
 0xe26   :  { %5672 = vsyncpa [#allocation11], 1 }
 0xe27   :  { %5673 = vsyncpa [#allocation14], 1 }
 0xe28   :  { %5674 = vsyncpa [#allocation17], 1 }
 0xe29   :  { %5675 = vsyncpa [#allocation20], 1 }

</bundles_post_ra>
